<compile_context>
chip_gen: v7x
topology: tpu7x:2x2x1
jax: 0.10.0
libtpu: 0.0.40
codegen_flags: <defaults>
</compile_context>

<pallas_src>
import functools

import jax
import jax.numpy as jnp
from jax.experimental import pallas as pl
from jax.experimental.pallas import tpu as pltpu

NPAD = 128                       # lane-dense matmul output width, all layers
_VMEM_LIMIT = 32 * 1024 * 1024   # explicit & portable (v5e default is 16 MiB)


# ----------------------------------------------------------------------------
# Pallas kernels
# ----------------------------------------------------------------------------
def _conv_kernel(p_ref, w_ref, eps_ref, o_ref, *, relu_bn):
    """One image: out = relu(patches @ W + bias) * scale + shift.

    p_ref: (1, M, K) bf16, w_ref: (K, NPAD) bf16,
    eps_ref: (3, NPAD) f32 = [bias; scale; shift], o_ref: (1, M, NPAD) bf16.
    """
    eps = eps_ref[...]
    z = jnp.dot(p_ref[0], w_ref[...], preferred_element_type=jnp.float32)
    z = z + eps[0:1, :]
    if relu_bn:
        z = jnp.maximum(z, 0.0)
        z = z * eps[1:2, :] + eps[2:3, :]
    o_ref[0] = z.astype(o_ref.dtype)


def _deconv_logsoftmax_kernel(p_ref, w_ref, b_ref, o_ref, *, n_valid):
    """Last deconv (no ReLU/BN, Cout=1) fused with the per-image log-softmax.

    log-softmax is permutation invariant over the image, so it is applied on
    the phase-major matmul output; depth-to-space happens outside on the tiny
    result.  Only the first `n_valid` lane columns hold real phases.
    """
    z = jnp.dot(p_ref[0], w_ref[...], preferred_element_type=jnp.float32)
    z = z + b_ref[...]
    col = jax.lax.broadcasted_iota(jnp.int32, z.shape, dimension=1)
    valid = col < n_valid
    zm = jnp.where(valid, z, -1e30)
    m = jnp.max(jnp.max(zm, axis=1, keepdims=True), axis=0, keepdims=True)
    e = jnp.where(valid, jnp.exp(z - m), 0.0)
    s = jnp.sum(jnp.sum(e, axis=1, keepdims=True), axis=0, keepdims=True)
    o_ref[0] = (z - m - jnp.log(s)).astype(o_ref.dtype)


# ----------------------------------------------------------------------------
# Layer wrappers (im2col stays XLA glue on tiny bf16 arrays)
# ----------------------------------------------------------------------------
def _im2col_nhwc(x, k, s):
    """x: [B, H, W, C] -> patches [B, OH*OW, k*k*C]; K ordered (kh, kw, c)."""
    B, H, W, C = x.shape
    OH = (H - k) // s + 1
    OW = (W - k) // s + 1
    cols = []
    for ki in range(k):
        for kj in range(k):
            cols.append(x[:, ki: ki + s * (OH - 1) + 1: s,
                          kj: kj + s * (OW - 1) + 1: s, :])
    p = jnp.concatenate(cols, axis=-1)
    return p.reshape(B, OH * OW, k * k * C), OH, OW


def _layer_matmul(patches, w_packed, eps_packed, *, relu_bn):
    """patches: [B, M, K] bf16 -> [B, M, NPAD] bf16 with fused epilogue."""
    B, M, K = patches.shape
    Kp, Np = w_packed.shape
    if Kp > K:  # zero K-pad so the contraction stays lane-aligned (128)
        patches = jnp.pad(patches, ((0, 0), (0, 0), (0, Kp - K)))
    return pl.pallas_call(
        functools.partial(_conv_kernel, relu_bn=relu_bn),
        out_shape=jax.ShapeDtypeStruct((B, M, Np), jnp.bfloat16),
        grid_spec=pltpu.PrefetchScalarGridSpec(
            num_scalar_prefetch=0,
            grid=(B,),
            in_specs=[
                pl.BlockSpec((1, M, Kp), lambda i: (i, 0, 0)),
                pl.BlockSpec((Kp, Np), lambda i: (0, 0)),
                pl.BlockSpec((3, Np), lambda i: (0, 0)),
            ],
            out_specs=pl.BlockSpec((1, M, Np), lambda i: (i, 0, 0)),
        ),
        compiler_params=pltpu.CompilerParams(
            dimension_semantics=("parallel",),
            vmem_limit_bytes=_VMEM_LIMIT),
    )(patches, w_packed, eps_packed)


def conv_layer(x, w_packed, eps_packed, *, k, s, cout):
    """Conv2d(k, stride=s) + ReLU + BN(eval), NHWC in/out (bf16)."""
    B = x.shape[0]
    patches, OH, OW = _im2col_nhwc(x, k, s)
    y = _layer_matmul(patches, w_packed, eps_packed, relu_bn=True)
    return y[:, :, :cout].reshape(B, OH, OW, cout)


def deconv_layer(x, w_packed, eps_packed, *, k, s, cout):
    """ConvTranspose2d(k, stride=s) + ReLU + BN(eval) via phase decomposition."""
    assert k % s == 0, "phase decomposition needs s | k"
    kk = k // s
    B = x.shape[0]
    xp = jnp.pad(x, ((0, 0), (kk - 1, kk - 1), (kk - 1, kk - 1), (0, 0)))
    patches, OHq, OWq = _im2col_nhwc(xp, kk, 1)
    y = _layer_matmul(patches, w_packed, eps_packed, relu_bn=True)
    n = s * s * cout
    y = y[:, :, :n].reshape(B, OHq, OWq, s, s, cout)
    y = y.transpose(0, 1, 3, 2, 4, 5)                 # depth-to-space
    return y.reshape(B, OHq * s, OWq * s, cout)


def deconv_logsoftmax_layer(x, w_packed, bias_packed, *, k, s):
    """Last ConvTranspose2d (Cout=1) fused with flatten + log-softmax."""
    assert k % s == 0
    kk = k // s
    B = x.shape[0]
    xp = jnp.pad(x, ((0, 0), (kk - 1, kk - 1), (kk - 1, kk - 1), (0, 0)))
    patches, OHq, OWq = _im2col_nhwc(xp, kk, 1)
    _, M, K = patches.shape
    Kp, Np = w_packed.shape
    if Kp > K:
        patches = jnp.pad(patches, ((0, 0), (0, 0), (0, Kp - K)))
    n_valid = s * s                                   # Cout == 1
    y = pl.pallas_call(
        functools.partial(_deconv_logsoftmax_kernel, n_valid=n_valid),
        out_shape=jax.ShapeDtypeStruct((B, M, Np), jnp.float32),
        grid_spec=pltpu.PrefetchScalarGridSpec(
            num_scalar_prefetch=0,
            grid=(B,),
            in_specs=[
                pl.BlockSpec((1, M, Kp), lambda i: (i, 0, 0)),
                pl.BlockSpec((Kp, Np), lambda i: (0, 0)),
                pl.BlockSpec((1, Np), lambda i: (0, 0)),
            ],
            out_specs=pl.BlockSpec((1, M, Np), lambda i: (i, 0, 0)),
        ),
        compiler_params=pltpu.CompilerParams(
            dimension_semantics=("parallel",),
            vmem_limit_bytes=_VMEM_LIMIT),
    )(patches, w_packed, bias_packed)
    # depth-to-space on the tiny, already log-softmaxed phase map.
    y = y[:, :, :n_valid].reshape(B, OHq, OWq, s, s)
    y = y.transpose(0, 1, 3, 2, 4)
    return y.reshape(B, OHq * s, OWq * s)


# ----------------------------------------------------------------------------
# One-time weight packing (outside the jitted forward)
# ----------------------------------------------------------------------------
def _round_up(x, m):
    return ((x + m - 1) // m) * m


def prepare_params(raw):
    def pack_eps(b, scale, shift):
        eps = jnp.stack([b, scale, shift]).astype(jnp.float32)
        return jnp.pad(eps, ((0, 0), (0, NPAD - eps.shape[1])))

    def pack_conv(p):
        w, b, scale, shift = p                          # w: [Cout, Cin, k, k]
        cout, cin, k, _ = w.shape
        wm = jnp.transpose(w, (2, 3, 1, 0)).reshape(k * k * cin, cout)
        kp = _round_up(wm.shape[0], 128)
        wm = jnp.pad(wm, ((0, kp - wm.shape[0]), (0, NPAD - cout)))
        return wm.astype(jnp.bfloat16), pack_eps(b, scale, shift)

    def pack_deconv(p, k, s):
        wt, b, scale, shift = p                         # wt: [Cin, Cout, k, k]
        cin, cout = wt.shape[0], wt.shape[1]
        kk = k // s
        w6 = wt.reshape(cin, cout, kk, s, kk, s)        # (ci, co, dy, ry, dx, rx)
        w6 = jnp.flip(w6, axis=(2, 4))                  # dy' = kk-1-dy, dx' = ...
        w6 = w6.transpose(2, 4, 0, 3, 5, 1)             # (dy', dx', ci, ry, rx, co)
        wm = w6.reshape(kk * kk * cin, s * s * cout)
        kp = _round_up(wm.shape[0], 128)
        wm = jnp.pad(wm, ((0, kp - wm.shape[0]), (0, NPAD - s * s * cout)))
        eps = pack_eps(jnp.tile(b, s * s), jnp.tile(scale, s * s),
                       jnp.tile(shift, s * s))
        return wm.astype(jnp.bfloat16), eps

    pp = {
        "c1": pack_conv(raw["c1"]),
        "c2": pack_conv(raw["c2"]),
        "c3": pack_conv(raw["c3"]),
        "d1": pack_deconv(raw["d1"], 3, 1),
        "d2": pack_deconv(raw["d2"], 4, 2),
    }
    wm, eps = pack_deconv(raw["d3"], 8, 4)              # no ReLU/BN: bias only
    pp["d3"] = (wm, eps[0:1, :])
    return pp


# ----------------------------------------------------------------------------
# Deterministic synthetic parameters (mirror the nn.Module shapes)
# ----------------------------------------------------------------------------
def init_params(key):
    keys = iter(jax.random.split(key, 64))

    def bn_fold(c):
        gamma = 1.0 + 0.1 * jax.random.normal(next(keys), (c,), jnp.float32)
        beta = 0.1 * jax.random.normal(next(keys), (c,), jnp.float32)
        mean = 0.1 * jax.random.normal(next(keys), (c,), jnp.float32)
        var = 1.0 + 0.1 * jnp.abs(jax.random.normal(next(keys), (c,), jnp.float32))
        scale = gamma / jnp.sqrt(var + 1e-5)
        shift = beta - mean * scale
        return scale, shift

    def conv_p(cout, cin, k):
        w = 0.05 * jax.random.normal(next(keys), (cout, cin, k, k), jnp.float32)
        b = 0.05 * jax.random.normal(next(keys), (cout,), jnp.float32)
        s, sh = bn_fold(cout)
        return (w, b, s, sh)

    def deconv_p(cin, cout, k, with_bn=True):
        w = 0.05 * jax.random.normal(next(keys), (cin, cout, k, k), jnp.float32)
        b = 0.05 * jax.random.normal(next(keys), (cout,), jnp.float32)
        if with_bn:
            s, sh = bn_fold(cout)
        else:
            s, sh = jnp.ones((cout,), jnp.float32), jnp.zeros((cout,), jnp.float32)
        return (w, b, s, sh)

    return {
        "c1": conv_p(32, 4, 8),      # Conv2d(4, 32, 8, 4)   + BN(32)
        "c2": conv_p(64, 32, 4),     # Conv2d(32, 64, 4, 2)  + BN(64)
        "c3": conv_p(64, 64, 3),     # Conv2d(64, 64, 3, 1)  + BN(64)
        "d1": deconv_p(64, 64, 3),   # ConvT(64, 64, 3, 1)   + BN(64)
        "d2": deconv_p(64, 32, 4),   # ConvT(64, 32, 4, 2)   + BN(32)
        "d3": deconv_p(32, 1, 8, with_bn=False),  # ConvT(32, 1, 8, 4)
    }


# ----------------------------------------------------------------------------
# Full forward pass (Pallas) and an f32 XLA reference
# ----------------------------------------------------------------------------
def gaze_prediction_forward(x, pp):
    # x: [B, 4, 84, 84] NCHW f32.  One layout change + bf16 cast, then bf16
    # NHWC end-to-end; 84x84 input is required by the final view(B, 84, 84).
    x = jnp.transpose(x, (0, 2, 3, 1)).astype(jnp.bfloat16)     # [B, 84, 84, 4]
    x = conv_layer(x, *pp["c1"], k=8, s=4, cout=32)             # [B, 20, 20, 32]
    x = conv_layer(x, *pp["c2"], k=4, s=2, cout=64)             # [B,  9,  9, 64]
    x = conv_layer(x, *pp["c3"], k=3, s=1, cout=64)             # [B,  7,  7, 64]
    x = deconv_layer(x, *pp["d1"], k=3, s=1, cout=64)           # [B,  9,  9, 64]
    x = deconv_layer(x, *pp["d2"], k=4, s=2, cout=32)           # [B, 20, 20, 32]
    return deconv_logsoftmax_layer(x, *pp["d3"], k=8, s=4)      # [B, 84, 84] f32


def reference_forward(x, raw):
    """Pure-XLA f32 reference (lax convs) of the same eval-mode forward."""
    dn = ("NHWC", "HWIO", "NHWC")
    x = jnp.transpose(x, (0, 2, 3, 1))

    def conv(x, p, s):
        w, b, sc, sh = p
        wh = jnp.transpose(w, (2, 3, 1, 0))
        y = jax.lax.conv_general_dilated(x, wh, (s, s), "VALID",
                                         dimension_numbers=dn)
        return jnp.maximum(y + b, 0.0) * sc + sh

    def deconv(x, p, k, s, relu_bn=True):
        wt, b, sc, sh = p
        wh = jnp.transpose(jnp.flip(wt, (2, 3)), (2, 3, 0, 1))
        y = jax.lax.conv_general_dilated(x, wh, (1, 1),
                                         [(k - 1, k - 1), (k - 1, k - 1)],
                                         lhs_dilation=(s, s),
                                         dimension_numbers=dn)
        y = y + b
        if relu_bn:
            y = jnp.maximum(y, 0.0) * sc + sh
        return y

    x = conv(x, raw["c1"], 4)
    x = conv(x, raw["c2"], 2)
    x = conv(x, raw["c3"], 1)
    x = deconv(x, raw["d1"], 3, 1)
    x = deconv(x, raw["d2"], 4, 2)
    x = deconv(x, raw["d3"], 8, 4, relu_bn=False)
    B = x.shape[0]
    x = jax.nn.log_softmax(x.reshape(B, -1), axis=-1)
    return x.reshape(B, 84, 84)


if __name__ == "__main__":
    key = jax.random.PRNGKey(0)
    pkey, xkey = jax.random.split(key)
    raw = init_params(pkey)
    pp = prepare_params(raw)          # one-time weight packing, outside jit
    x = jax.random.uniform(xkey, (2, 4, 84, 84), dtype=jnp.float32)

    fwd = jax.jit(gaze_prediction_forward)
    out = jax.block_until_ready(fwd(x, pp))

    assert out.shape == (2, 84, 84), out.shape
    assert bool(jnp.all(jnp.isfinite(out)))
    # log-softmax rows must (numerically) sum to 1 after exp
    sums = jnp.sum(jnp.exp(out.reshape(2, -1)), axis=-1)
    assert bool(jnp.all(jnp.abs(sums - 1.0) < 1e-3)), sums
    # compare against the f32 XLA reference (bf16 path drifts at ~1e-2 level)
    ref = jax.block_until_ready(jax.jit(reference_forward)(x, raw))
    max_err = float(jnp.max(jnp.abs(out - ref)))
    assert max_err < 0.15, max_err
    print("KERNEL_OK")
</pallas_src>

<mosaic_0001>
module attributes {stable_mosaic.version = 11 : i64} {
  func.func @_conv_kernel(%arg0: i32, %arg1: memref<1x400x256xbf16, #tpu.memory_space<vmem>>, %arg2: memref<256x128xbf16, #tpu.memory_space<vmem>>, %arg3: memref<3x128xf32, #tpu.memory_space<vmem>>, %arg4: memref<1x400x128xbf16, #tpu.memory_space<vmem>>) attributes {dimension_semantics = [#tpu.dimension_semantics<parallel>], iteration_bounds = array<i64: 2>, scalar_prefetch = 0 : i64, scratch_operands = 0 : i64, tpu.core_type = #tpu.core_type<tc>, window_params = [{transform_indices = @transform_0, window_bounds = array<i64: 1, 400, 256>}, {pipeline_mode = #tpu.pipeline_mode<synchronous>, transform_indices = @transform_1, window_bounds = array<i64: 256, 128>}, {pipeline_mode = #tpu.pipeline_mode<synchronous>, transform_indices = @transform_2, window_bounds = array<i64: 3, 128>}, {transform_indices = @transform_3, window_bounds = array<i64: 1, 400, 128>}]} {
    %c0 = arith.constant 0 : index
    %c0_0 = arith.constant 0 : index
    %0 = vector.load %arg3[%c0, %c0_0] : memref<3x128xf32, #tpu.memory_space<vmem>>, vector<3x128xf32>
    %c0_1 = arith.constant 0 : index
    %c0_2 = arith.constant 0 : index
    %c0_3 = arith.constant 0 : index
    %1 = vector.load %arg1[%c0_1, %c0_2, %c0_3] : memref<1x400x256xbf16, #tpu.memory_space<vmem>>, vector<1x400x256xbf16>
    %2 = vector.shape_cast %1 : vector<1x400x256xbf16> to vector<400x256xbf16>
    %c0_4 = arith.constant 0 : index
    %c0_5 = arith.constant 0 : index
    %3 = vector.load %arg2[%c0_4, %c0_5] : memref<256x128xbf16, #tpu.memory_space<vmem>>, vector<256x128xbf16>
    %cst = arith.constant dense<0.000000e+00> : vector<400x128xf32>
    %4 = tpu.matmul %2, %3, %cst {dimension_numbers = #tpu.dot_dimension_numbers<[1], [0], [0], [1], [0, 0, 1, 1], [], []>} : vector<400x256xbf16>, vector<256x128xbf16>, vector<400x128xf32> -> vector<400x128xf32>
    %5 = vector.extract_strided_slice %0 {offsets = [0, 0], sizes = [1, 128], strides = [1, 1]} : vector<3x128xf32> to vector<1x128xf32>
    %6 = vector.broadcast %5 : vector<1x128xf32> to vector<400x128xf32>
    %7 = arith.addf %4, %6 : vector<400x128xf32>
    %cst_6 = arith.constant 0.000000e+00 : f32
    %8 = vector.broadcast %cst_6 : f32 to vector<400x128xf32>
    %9 = arith.maximumf %7, %8 : vector<400x128xf32>
    %10 = vector.extract_strided_slice %0 {offsets = [1, 0], sizes = [1, 128], strides = [1, 1]} : vector<3x128xf32> to vector<1x128xf32>
    %11 = vector.broadcast %10 : vector<1x128xf32> to vector<400x128xf32>
    %12 = arith.mulf %9, %11 : vector<400x128xf32>
    %13 = vector.extract_strided_slice %0 {offsets = [2, 0], sizes = [1, 128], strides = [1, 1]} : vector<3x128xf32> to vector<1x128xf32>
    %14 = vector.broadcast %13 : vector<1x128xf32> to vector<400x128xf32>
    %15 = arith.addf %12, %14 : vector<400x128xf32>
    %16 = arith.truncf %15 : vector<400x128xf32> to vector<400x128xbf16>
    %c0_7 = arith.constant 0 : index
    %c0_8 = arith.constant 0 : index
    %c0_9 = arith.constant 0 : index
    %17 = vector.load %arg4[%c0_7, %c0_8, %c0_9] : memref<1x400x128xbf16, #tpu.memory_space<vmem>>, vector<1x400x128xbf16>
    %18 = vector.shape_cast %17 : vector<1x400x128xbf16> to vector<400x128xbf16>
    %19 = vector.shape_cast %16 : vector<400x128xbf16> to vector<1x400x128xbf16>
    tpu.vector_store %arg4[%c0_7, %c0_8, %c0_9], %19 {strides = array<i32>} : memref<1x400x128xbf16, #tpu.memory_space<vmem>>, vector<1x400x128xbf16>,
    return
  }
  func.func @transform_0(%arg0: i32) -> (i32, i32, i32) {
    %c0_i32 = arith.constant 0 : i32
    %c0_i32_0 = arith.constant 0 : i32
    %c0_i32_1 = arith.constant 0 : i32
    return %arg0, %c0_i32, %c0_i32_0 : i32, i32, i32
  }
  func.func @transform_1(%arg0: i32) -> (i32, i32) {
    %c0_i32 = arith.constant 0 : i32
    %c0_i32_0 = arith.constant 0 : i32
    %c0_i32_1 = arith.constant 0 : i32
    return %c0_i32, %c0_i32_0 : i32, i32
  }
  func.func @transform_2(%arg0: i32) -> (i32, i32) {
    %c0_i32 = arith.constant 0 : i32
    %c0_i32_0 = arith.constant 0 : i32
    %c0_i32_1 = arith.constant 0 : i32
    return %c0_i32, %c0_i32_0 : i32, i32
  }
  func.func @transform_3(%arg0: i32) -> (i32, i32, i32) {
    %c0_i32 = arith.constant 0 : i32
    %c0_i32_0 = arith.constant 0 : i32
    %c0_i32_1 = arith.constant 0 : i32
    return %arg0, %c0_i32, %c0_i32_0 : i32, i32, i32
  }
}

module attributes {stable_mosaic.version = 11 : i64} {
  func.func @_conv_kernel(%arg0: i32, %arg1: memref<1x81x512xbf16, #tpu.memory_space<vmem>>, %arg2: memref<512x128xbf16, #tpu.memory_space<vmem>>, %arg3: memref<3x128xf32, #tpu.memory_space<vmem>>, %arg4: memref<1x81x128xbf16, #tpu.memory_space<vmem>>) attributes {dimension_semantics = [#tpu.dimension_semantics<parallel>], iteration_bounds = array<i64: 2>, scalar_prefetch = 0 : i64, scratch_operands = 0 : i64, tpu.core_type = #tpu.core_type<tc>, window_params = [{transform_indices = @transform_0, window_bounds = array<i64: 1, 81, 512>}, {pipeline_mode = #tpu.pipeline_mode<synchronous>, transform_indices = @transform_1, window_bounds = array<i64: 512, 128>}, {pipeline_mode = #tpu.pipeline_mode<synchronous>, transform_indices = @transform_2, window_bounds = array<i64: 3, 128>}, {transform_indices = @transform_3, window_bounds = array<i64: 1, 81, 128>}]} {
    %c0 = arith.constant 0 : index
    %c0_0 = arith.constant 0 : index
    %0 = vector.load %arg3[%c0, %c0_0] : memref<3x128xf32, #tpu.memory_space<vmem>>, vector<3x128xf32>
    %c0_1 = arith.constant 0 : index
    %c0_2 = arith.constant 0 : index
    %c0_3 = arith.constant 0 : index
    %1 = vector.load %arg1[%c0_1, %c0_2, %c0_3] : memref<1x81x512xbf16, #tpu.memory_space<vmem>>, vector<1x81x512xbf16>
    %2 = vector.shape_cast %1 : vector<1x81x512xbf16> to vector<81x512xbf16>
    %c0_4 = arith.constant 0 : index
    %c0_5 = arith.constant 0 : index
    %3 = vector.load %arg2[%c0_4, %c0_5] : memref<512x128xbf16, #tpu.memory_space<vmem>>, vector<512x128xbf16>
    %cst = arith.constant dense<0.000000e+00> : vector<81x128xf32>
    %4 = tpu.matmul %2, %3, %cst {dimension_numbers = #tpu.dot_dimension_numbers<[1], [0], [0], [1], [0, 0, 1, 1], [], []>} : vector<81x512xbf16>, vector<512x128xbf16>, vector<81x128xf32> -> vector<81x128xf32>
    %5 = vector.extract_strided_slice %0 {offsets = [0, 0], sizes = [1, 128], strides = [1, 1]} : vector<3x128xf32> to vector<1x128xf32>
    %6 = vector.broadcast %5 : vector<1x128xf32> to vector<81x128xf32>
    %7 = arith.addf %4, %6 : vector<81x128xf32>
    %cst_6 = arith.constant 0.000000e+00 : f32
    %8 = vector.broadcast %cst_6 : f32 to vector<81x128xf32>
    %9 = arith.maximumf %7, %8 : vector<81x128xf32>
    %10 = vector.extract_strided_slice %0 {offsets = [1, 0], sizes = [1, 128], strides = [1, 1]} : vector<3x128xf32> to vector<1x128xf32>
    %11 = vector.broadcast %10 : vector<1x128xf32> to vector<81x128xf32>
    %12 = arith.mulf %9, %11 : vector<81x128xf32>
    %13 = vector.extract_strided_slice %0 {offsets = [2, 0], sizes = [1, 128], strides = [1, 1]} : vector<3x128xf32> to vector<1x128xf32>
    %14 = vector.broadcast %13 : vector<1x128xf32> to vector<81x128xf32>
    %15 = arith.addf %12, %14 : vector<81x128xf32>
    %16 = arith.truncf %15 : vector<81x128xf32> to vector<81x128xbf16>
    %c0_7 = arith.constant 0 : index
    %c0_8 = arith.constant 0 : index
    %c0_9 = arith.constant 0 : index
    %17 = vector.load %arg4[%c0_7, %c0_8, %c0_9] : memref<1x81x128xbf16, #tpu.memory_space<vmem>>, vector<1x81x128xbf16>
    %18 = vector.shape_cast %17 : vector<1x81x128xbf16> to vector<81x128xbf16>
    %19 = vector.shape_cast %16 : vector<81x128xbf16> to vector<1x81x128xbf16>
    tpu.vector_store %arg4[%c0_7, %c0_8, %c0_9], %19 {strides = array<i32>} : memref<1x81x128xbf16, #tpu.memory_space<vmem>>, vector<1x81x128xbf16>,
    return
  }
  func.func @transform_0(%arg0: i32) -> (i32, i32, i32) {
    %c0_i32 = arith.constant 0 : i32
    %c0_i32_0 = arith.constant 0 : i32
    %c0_i32_1 = arith.constant 0 : i32
    return %arg0, %c0_i32, %c0_i32_0 : i32, i32, i32
  }
  func.func @transform_1(%arg0: i32) -> (i32, i32) {
    %c0_i32 = arith.constant 0 : i32
    %c0_i32_0 = arith.constant 0 : i32
    %c0_i32_1 = arith.constant 0 : i32
    return %c0_i32, %c0_i32_0 : i32, i32
  }
  func.func @transform_2(%arg0: i32) -> (i32, i32) {
    %c0_i32 = arith.constant 0 : i32
    %c0_i32_0 = arith.constant 0 : i32
    %c0_i32_1 = arith.constant 0 : i32
    return %c0_i32, %c0_i32_0 : i32, i32
  }
  func.func @transform_3(%arg0: i32) -> (i32, i32, i32) {
    %c0_i32 = arith.constant 0 : i32
    %c0_i32_0 = arith.constant 0 : i32
    %c0_i32_1 = arith.constant 0 : i32
    return %arg0, %c0_i32, %c0_i32_0 : i32, i32, i32
  }
}

module attributes {stable_mosaic.version = 11 : i64} {
  func.func @_conv_kernel(%arg0: i32, %arg1: memref<1x49x640xbf16, #tpu.memory_space<vmem>>, %arg2: memref<640x128xbf16, #tpu.memory_space<vmem>>, %arg3: memref<3x128xf32, #tpu.memory_space<vmem>>, %arg4: memref<1x49x128xbf16, #tpu.memory_space<vmem>>) attributes {dimension_semantics = [#tpu.dimension_semantics<parallel>], iteration_bounds = array<i64: 2>, scalar_prefetch = 0 : i64, scratch_operands = 0 : i64, tpu.core_type = #tpu.core_type<tc>, window_params = [{transform_indices = @transform_0, window_bounds = array<i64: 1, 49, 640>}, {pipeline_mode = #tpu.pipeline_mode<synchronous>, transform_indices = @transform_1, window_bounds = array<i64: 640, 128>}, {pipeline_mode = #tpu.pipeline_mode<synchronous>, transform_indices = @transform_2, window_bounds = array<i64: 3, 128>}, {transform_indices = @transform_3, window_bounds = array<i64: 1, 49, 128>}]} {
    %c0 = arith.constant 0 : index
    %c0_0 = arith.constant 0 : index
    %0 = vector.load %arg3[%c0, %c0_0] : memref<3x128xf32, #tpu.memory_space<vmem>>, vector<3x128xf32>
    %c0_1 = arith.constant 0 : index
    %c0_2 = arith.constant 0 : index
    %c0_3 = arith.constant 0 : index
    %1 = vector.load %arg1[%c0_1, %c0_2, %c0_3] : memref<1x49x640xbf16, #tpu.memory_space<vmem>>, vector<1x49x640xbf16>
    %2 = vector.shape_cast %1 : vector<1x49x640xbf16> to vector<49x640xbf16>
    %c0_4 = arith.constant 0 : index
    %c0_5 = arith.constant 0 : index
    %3 = vector.load %arg2[%c0_4, %c0_5] : memref<640x128xbf16, #tpu.memory_space<vmem>>, vector<640x128xbf16>
    %cst = arith.constant dense<0.000000e+00> : vector<49x128xf32>
    %4 = tpu.matmul %2, %3, %cst {dimension_numbers = #tpu.dot_dimension_numbers<[1], [0], [0], [1], [0, 0, 1, 1], [], []>} : vector<49x640xbf16>, vector<640x128xbf16>, vector<49x128xf32> -> vector<49x128xf32>
    %5 = vector.extract_strided_slice %0 {offsets = [0, 0], sizes = [1, 128], strides = [1, 1]} : vector<3x128xf32> to vector<1x128xf32>
    %6 = vector.broadcast %5 : vector<1x128xf32> to vector<49x128xf32>
    %7 = arith.addf %4, %6 : vector<49x128xf32>
    %cst_6 = arith.constant 0.000000e+00 : f32
    %8 = vector.broadcast %cst_6 : f32 to vector<49x128xf32>
    %9 = arith.maximumf %7, %8 : vector<49x128xf32>
    %10 = vector.extract_strided_slice %0 {offsets = [1, 0], sizes = [1, 128], strides = [1, 1]} : vector<3x128xf32> to vector<1x128xf32>
    %11 = vector.broadcast %10 : vector<1x128xf32> to vector<49x128xf32>
    %12 = arith.mulf %9, %11 : vector<49x128xf32>
    %13 = vector.extract_strided_slice %0 {offsets = [2, 0], sizes = [1, 128], strides = [1, 1]} : vector<3x128xf32> to vector<1x128xf32>
    %14 = vector.broadcast %13 : vector<1x128xf32> to vector<49x128xf32>
    %15 = arith.addf %12, %14 : vector<49x128xf32>
    %16 = arith.truncf %15 : vector<49x128xf32> to vector<49x128xbf16>
    %c0_7 = arith.constant 0 : index
    %c0_8 = arith.constant 0 : index
    %c0_9 = arith.constant 0 : index
    %17 = vector.load %arg4[%c0_7, %c0_8, %c0_9] : memref<1x49x128xbf16, #tpu.memory_space<vmem>>, vector<1x49x128xbf16>
    %18 = vector.shape_cast %17 : vector<1x49x128xbf16> to vector<49x128xbf16>
    %19 = vector.shape_cast %16 : vector<49x128xbf16> to vector<1x49x128xbf16>
    tpu.vector_store %arg4[%c0_7, %c0_8, %c0_9], %19 {strides = array<i32>} : memref<1x49x128xbf16, #tpu.memory_space<vmem>>, vector<1x49x128xbf16>,
    return
  }
  func.func @transform_0(%arg0: i32) -> (i32, i32, i32) {
    %c0_i32 = arith.constant 0 : i32
    %c0_i32_0 = arith.constant 0 : i32
    %c0_i32_1 = arith.constant 0 : i32
    return %arg0, %c0_i32, %c0_i32_0 : i32, i32, i32
  }
  func.func @transform_1(%arg0: i32) -> (i32, i32) {
    %c0_i32 = arith.constant 0 : i32
    %c0_i32_0 = arith.constant 0 : i32
    %c0_i32_1 = arith.constant 0 : i32
    return %c0_i32, %c0_i32_0 : i32, i32
  }
  func.func @transform_2(%arg0: i32) -> (i32, i32) {
    %c0_i32 = arith.constant 0 : i32
    %c0_i32_0 = arith.constant 0 : i32
    %c0_i32_1 = arith.constant 0 : i32
    return %c0_i32, %c0_i32_0 : i32, i32
  }
  func.func @transform_3(%arg0: i32) -> (i32, i32, i32) {
    %c0_i32 = arith.constant 0 : i32
    %c0_i32_0 = arith.constant 0 : i32
    %c0_i32_1 = arith.constant 0 : i32
    return %arg0, %c0_i32, %c0_i32_0 : i32, i32, i32
  }
}

module attributes {stable_mosaic.version = 11 : i64} {
  func.func @_conv_kernel(%arg0: i32, %arg1: memref<1x81x640xbf16, #tpu.memory_space<vmem>>, %arg2: memref<640x128xbf16, #tpu.memory_space<vmem>>, %arg3: memref<3x128xf32, #tpu.memory_space<vmem>>, %arg4: memref<1x81x128xbf16, #tpu.memory_space<vmem>>) attributes {dimension_semantics = [#tpu.dimension_semantics<parallel>], iteration_bounds = array<i64: 2>, scalar_prefetch = 0 : i64, scratch_operands = 0 : i64, tpu.core_type = #tpu.core_type<tc>, window_params = [{transform_indices = @transform_0, window_bounds = array<i64: 1, 81, 640>}, {pipeline_mode = #tpu.pipeline_mode<synchronous>, transform_indices = @transform_1, window_bounds = array<i64: 640, 128>}, {pipeline_mode = #tpu.pipeline_mode<synchronous>, transform_indices = @transform_2, window_bounds = array<i64: 3, 128>}, {transform_indices = @transform_3, window_bounds = array<i64: 1, 81, 128>}]} {
    %c0 = arith.constant 0 : index
    %c0_0 = arith.constant 0 : index
    %0 = vector.load %arg3[%c0, %c0_0] : memref<3x128xf32, #tpu.memory_space<vmem>>, vector<3x128xf32>
    %c0_1 = arith.constant 0 : index
    %c0_2 = arith.constant 0 : index
    %c0_3 = arith.constant 0 : index
    %1 = vector.load %arg1[%c0_1, %c0_2, %c0_3] : memref<1x81x640xbf16, #tpu.memory_space<vmem>>, vector<1x81x640xbf16>
    %2 = vector.shape_cast %1 : vector<1x81x640xbf16> to vector<81x640xbf16>
    %c0_4 = arith.constant 0 : index
    %c0_5 = arith.constant 0 : index
    %3 = vector.load %arg2[%c0_4, %c0_5] : memref<640x128xbf16, #tpu.memory_space<vmem>>, vector<640x128xbf16>
    %cst = arith.constant dense<0.000000e+00> : vector<81x128xf32>
    %4 = tpu.matmul %2, %3, %cst {dimension_numbers = #tpu.dot_dimension_numbers<[1], [0], [0], [1], [0, 0, 1, 1], [], []>} : vector<81x640xbf16>, vector<640x128xbf16>, vector<81x128xf32> -> vector<81x128xf32>
    %5 = vector.extract_strided_slice %0 {offsets = [0, 0], sizes = [1, 128], strides = [1, 1]} : vector<3x128xf32> to vector<1x128xf32>
    %6 = vector.broadcast %5 : vector<1x128xf32> to vector<81x128xf32>
    %7 = arith.addf %4, %6 : vector<81x128xf32>
    %cst_6 = arith.constant 0.000000e+00 : f32
    %8 = vector.broadcast %cst_6 : f32 to vector<81x128xf32>
    %9 = arith.maximumf %7, %8 : vector<81x128xf32>
    %10 = vector.extract_strided_slice %0 {offsets = [1, 0], sizes = [1, 128], strides = [1, 1]} : vector<3x128xf32> to vector<1x128xf32>
    %11 = vector.broadcast %10 : vector<1x128xf32> to vector<81x128xf32>
    %12 = arith.mulf %9, %11 : vector<81x128xf32>
    %13 = vector.extract_strided_slice %0 {offsets = [2, 0], sizes = [1, 128], strides = [1, 1]} : vector<3x128xf32> to vector<1x128xf32>
    %14 = vector.broadcast %13 : vector<1x128xf32> to vector<81x128xf32>
    %15 = arith.addf %12, %14 : vector<81x128xf32>
    %16 = arith.truncf %15 : vector<81x128xf32> to vector<81x128xbf16>
    %c0_7 = arith.constant 0 : index
    %c0_8 = arith.constant 0 : index
    %c0_9 = arith.constant 0 : index
    %17 = vector.load %arg4[%c0_7, %c0_8, %c0_9] : memref<1x81x128xbf16, #tpu.memory_space<vmem>>, vector<1x81x128xbf16>
    %18 = vector.shape_cast %17 : vector<1x81x128xbf16> to vector<81x128xbf16>
    %19 = vector.shape_cast %16 : vector<81x128xbf16> to vector<1x81x128xbf16>
    tpu.vector_store %arg4[%c0_7, %c0_8, %c0_9], %19 {strides = array<i32>} : memref<1x81x128xbf16, #tpu.memory_space<vmem>>, vector<1x81x128xbf16>,
    return
  }
  func.func @transform_0(%arg0: i32) -> (i32, i32, i32) {
    %c0_i32 = arith.constant 0 : i32
    %c0_i32_0 = arith.constant 0 : i32
    %c0_i32_1 = arith.constant 0 : i32
    return %arg0, %c0_i32, %c0_i32_0 : i32, i32, i32
  }
  func.func @transform_1(%arg0: i32) -> (i32, i32) {
    %c0_i32 = arith.constant 0 : i32
    %c0_i32_0 = arith.constant 0 : i32
    %c0_i32_1 = arith.constant 0 : i32
    return %c0_i32, %c0_i32_0 : i32, i32
  }
  func.func @transform_2(%arg0: i32) -> (i32, i32) {
    %c0_i32 = arith.constant 0 : i32
    %c0_i32_0 = arith.constant 0 : i32
    %c0_i32_1 = arith.constant 0 : i32
    return %c0_i32, %c0_i32_0 : i32, i32
  }
  func.func @transform_3(%arg0: i32) -> (i32, i32, i32) {
    %c0_i32 = arith.constant 0 : i32
    %c0_i32_0 = arith.constant 0 : i32
    %c0_i32_1 = arith.constant 0 : i32
    return %arg0, %c0_i32, %c0_i32_0 : i32, i32, i32
  }
}

module attributes {stable_mosaic.version = 11 : i64} {
  func.func @_conv_kernel(%arg0: i32, %arg1: memref<1x100x256xbf16, #tpu.memory_space<vmem>>, %arg2: memref<256x128xbf16, #tpu.memory_space<vmem>>, %arg3: memref<3x128xf32, #tpu.memory_space<vmem>>, %arg4: memref<1x100x128xbf16, #tpu.memory_space<vmem>>) attributes {dimension_semantics = [#tpu.dimension_semantics<parallel>], iteration_bounds = array<i64: 2>, scalar_prefetch = 0 : i64, scratch_operands = 0 : i64, tpu.core_type = #tpu.core_type<tc>, window_params = [{transform_indices = @transform_0, window_bounds = array<i64: 1, 100, 256>}, {pipeline_mode = #tpu.pipeline_mode<synchronous>, transform_indices = @transform_1, window_bounds = array<i64: 256, 128>}, {pipeline_mode = #tpu.pipeline_mode<synchronous>, transform_indices = @transform_2, window_bounds = array<i64: 3, 128>}, {transform_indices = @transform_3, window_bounds = array<i64: 1, 100, 128>}]} {
    %c0 = arith.constant 0 : index
    %c0_0 = arith.constant 0 : index
    %0 = vector.load %arg3[%c0, %c0_0] : memref<3x128xf32, #tpu.memory_space<vmem>>, vector<3x128xf32>
    %c0_1 = arith.constant 0 : index
    %c0_2 = arith.constant 0 : index
    %c0_3 = arith.constant 0 : index
    %1 = vector.load %arg1[%c0_1, %c0_2, %c0_3] : memref<1x100x256xbf16, #tpu.memory_space<vmem>>, vector<1x100x256xbf16>
    %2 = vector.shape_cast %1 : vector<1x100x256xbf16> to vector<100x256xbf16>
    %c0_4 = arith.constant 0 : index
    %c0_5 = arith.constant 0 : index
    %3 = vector.load %arg2[%c0_4, %c0_5] : memref<256x128xbf16, #tpu.memory_space<vmem>>, vector<256x128xbf16>
    %cst = arith.constant dense<0.000000e+00> : vector<100x128xf32>
    %4 = tpu.matmul %2, %3, %cst {dimension_numbers = #tpu.dot_dimension_numbers<[1], [0], [0], [1], [0, 0, 1, 1], [], []>} : vector<100x256xbf16>, vector<256x128xbf16>, vector<100x128xf32> -> vector<100x128xf32>
    %5 = vector.extract_strided_slice %0 {offsets = [0, 0], sizes = [1, 128], strides = [1, 1]} : vector<3x128xf32> to vector<1x128xf32>
    %6 = vector.broadcast %5 : vector<1x128xf32> to vector<100x128xf32>
    %7 = arith.addf %4, %6 : vector<100x128xf32>
    %cst_6 = arith.constant 0.000000e+00 : f32
    %8 = vector.broadcast %cst_6 : f32 to vector<100x128xf32>
    %9 = arith.maximumf %7, %8 : vector<100x128xf32>
    %10 = vector.extract_strided_slice %0 {offsets = [1, 0], sizes = [1, 128], strides = [1, 1]} : vector<3x128xf32> to vector<1x128xf32>
    %11 = vector.broadcast %10 : vector<1x128xf32> to vector<100x128xf32>
    %12 = arith.mulf %9, %11 : vector<100x128xf32>
    %13 = vector.extract_strided_slice %0 {offsets = [2, 0], sizes = [1, 128], strides = [1, 1]} : vector<3x128xf32> to vector<1x128xf32>
    %14 = vector.broadcast %13 : vector<1x128xf32> to vector<100x128xf32>
    %15 = arith.addf %12, %14 : vector<100x128xf32>
    %16 = arith.truncf %15 : vector<100x128xf32> to vector<100x128xbf16>
    %c0_7 = arith.constant 0 : index
    %c0_8 = arith.constant 0 : index
    %c0_9 = arith.constant 0 : index
    %17 = vector.load %arg4[%c0_7, %c0_8, %c0_9] : memref<1x100x128xbf16, #tpu.memory_space<vmem>>, vector<1x100x128xbf16>
    %18 = vector.shape_cast %17 : vector<1x100x128xbf16> to vector<100x128xbf16>
    %19 = vector.shape_cast %16 : vector<100x128xbf16> to vector<1x100x128xbf16>
    tpu.vector_store %arg4[%c0_7, %c0_8, %c0_9], %19 {strides = array<i32>} : memref<1x100x128xbf16, #tpu.memory_space<vmem>>, vector<1x100x128xbf16>,
    return
  }
  func.func @transform_0(%arg0: i32) -> (i32, i32, i32) {
    %c0_i32 = arith.constant 0 : i32
    %c0_i32_0 = arith.constant 0 : i32
    %c0_i32_1 = arith.constant 0 : i32
    return %arg0, %c0_i32, %c0_i32_0 : i32, i32, i32
  }
  func.func @transform_1(%arg0: i32) -> (i32, i32) {
    %c0_i32 = arith.constant 0 : i32
    %c0_i32_0 = arith.constant 0 : i32
    %c0_i32_1 = arith.constant 0 : i32
    return %c0_i32, %c0_i32_0 : i32, i32
  }
  func.func @transform_2(%arg0: i32) -> (i32, i32) {
    %c0_i32 = arith.constant 0 : i32
    %c0_i32_0 = arith.constant 0 : i32
    %c0_i32_1 = arith.constant 0 : i32
    return %c0_i32, %c0_i32_0 : i32, i32
  }
  func.func @transform_3(%arg0: i32) -> (i32, i32, i32) {
    %c0_i32 = arith.constant 0 : i32
    %c0_i32_0 = arith.constant 0 : i32
    %c0_i32_1 = arith.constant 0 : i32
    return %arg0, %c0_i32, %c0_i32_0 : i32, i32, i32
  }
}

module attributes {stable_mosaic.version = 11 : i64} {
  func.func @_deconv_logsoftmax_kernel(%arg0: i32, %arg1: memref<1x441x128xbf16, #tpu.memory_space<vmem>>, %arg2: memref<128x128xbf16, #tpu.memory_space<vmem>>, %arg3: memref<1x128xf32, #tpu.memory_space<vmem>>, %arg4: memref<1x441x128xf32, #tpu.memory_space<vmem>>) attributes {dimension_semantics = [#tpu.dimension_semantics<parallel>], iteration_bounds = array<i64: 2>, scalar_prefetch = 0 : i64, scratch_operands = 0 : i64, tpu.core_type = #tpu.core_type<tc>, window_params = [{transform_indices = @transform_0, window_bounds = array<i64: 1, 441, 128>}, {pipeline_mode = #tpu.pipeline_mode<synchronous>, transform_indices = @transform_1, window_bounds = array<i64: 128, 128>}, {pipeline_mode = #tpu.pipeline_mode<synchronous>, transform_indices = @transform_2, window_bounds = array<i64: 1, 128>}, {transform_indices = @transform_3, window_bounds = array<i64: 1, 441, 128>}]} {
    %c0 = arith.constant 0 : index
    %c0_0 = arith.constant 0 : index
    %c0_1 = arith.constant 0 : index
    %0 = vector.load %arg1[%c0, %c0_0, %c0_1] : memref<1x441x128xbf16, #tpu.memory_space<vmem>>, vector<1x441x128xbf16>
    %1 = vector.shape_cast %0 : vector<1x441x128xbf16> to vector<441x128xbf16>
    %c0_2 = arith.constant 0 : index
    %c0_3 = arith.constant 0 : index
    %2 = vector.load %arg2[%c0_2, %c0_3] : memref<128x128xbf16, #tpu.memory_space<vmem>>, vector<128x128xbf16>
    %cst = arith.constant dense<0.000000e+00> : vector<441x128xf32>
    %3 = tpu.matmul %1, %2, %cst {dimension_numbers = #tpu.dot_dimension_numbers<[1], [0], [0], [1], [0, 0, 1, 1], [], []>} : vector<441x128xbf16>, vector<128x128xbf16>, vector<441x128xf32> -> vector<441x128xf32>
    %c0_4 = arith.constant 0 : index
    %c0_5 = arith.constant 0 : index
    %4 = vector.load %arg3[%c0_4, %c0_5] : memref<1x128xf32, #tpu.memory_space<vmem>>, vector<1x128xf32>
    %5 = vector.broadcast %4 : vector<1x128xf32> to vector<441x128xf32>
    %6 = arith.addf %3, %5 : vector<441x128xf32>
    %7 = tpu.iota {dimensions = array<i32: 1>} : vector<441x128xi32>
    %c16_i32 = arith.constant 16 : i32
    %8 = vector.broadcast %c16_i32 : i32 to vector<441x128xi32>
    %9 = arith.cmpi slt, %7, %8 : vector<441x128xi32>
    %cst_6 = arith.constant -1.000000e+30 : f32
    %10 = vector.broadcast %cst_6 : f32 to vector<441x128xf32>
    %11 = arith.select %9, %6, %10 : vector<441x128xi1>, vector<441x128xf32>
    %cst_7 = arith.constant dense<0xFF800000> : vector<441xf32>
    %12 = vector.multi_reduction <maximumf>, %11, %cst_7 [1] : vector<441x128xf32> to vector<441xf32>
    %13 = vector.shape_cast %12 : vector<441xf32> to vector<441x1xf32>
    %cst_8 = arith.constant dense<0xFF800000> : vector<1xf32>
    %14 = vector.multi_reduction <maximumf>, %13, %cst_8 [0] : vector<441x1xf32> to vector<1xf32>
    %15 = vector.shape_cast %14 : vector<1xf32> to vector<1x1xf32>
    %16 = vector.broadcast %15 : vector<1x1xf32> to vector<441x128xf32>
    %17 = arith.subf %6, %16 : vector<441x128xf32>
    %18 = math.exp %17 : vector<441x128xf32>
    %cst_9 = arith.constant 0.000000e+00 : f32
    %19 = vector.broadcast %cst_9 : f32 to vector<441x128xf32>
    %20 = arith.select %9, %18, %19 : vector<441x128xi1>, vector<441x128xf32>
    %cst_10 = arith.constant dense<0.000000e+00> : vector<441xf32>
    %21 = vector.multi_reduction <add>, %20, %cst_10 [1] : vector<441x128xf32> to vector<441xf32>
    %22 = vector.shape_cast %21 : vector<441xf32> to vector<441x1xf32>
    %cst_11 = arith.constant dense<0.000000e+00> : vector<1xf32>
    %23 = vector.multi_reduction <add>, %22, %cst_11 [0] : vector<441x1xf32> to vector<1xf32>
    %24 = vector.shape_cast %23 : vector<1xf32> to vector<1x1xf32>
    %25 = vector.broadcast %15 : vector<1x1xf32> to vector<441x128xf32>
    %26 = arith.subf %6, %25 : vector<441x128xf32>
    %27 = math.log %24 : vector<1x1xf32>
    %28 = vector.broadcast %27 : vector<1x1xf32> to vector<441x128xf32>
    %29 = arith.subf %26, %28 : vector<441x128xf32>
    %c0_12 = arith.constant 0 : index
    %c0_13 = arith.constant 0 : index
    %c0_14 = arith.constant 0 : index
    %30 = vector.load %arg4[%c0_12, %c0_13, %c0_14] : memref<1x441x128xf32, #tpu.memory_space<vmem>>, vector<1x441x128xf32>
    %31 = vector.shape_cast %30 : vector<1x441x128xf32> to vector<441x128xf32>
    %32 = vector.shape_cast %29 : vector<441x128xf32> to vector<1x441x128xf32>
    tpu.vector_store %arg4[%c0_12, %c0_13, %c0_14], %32 {strides = array<i32>} : memref<1x441x128xf32, #tpu.memory_space<vmem>>, vector<1x441x128xf32>,
    return
  }
  func.func @transform_0(%arg0: i32) -> (i32, i32, i32) {
    %c0_i32 = arith.constant 0 : i32
    %c0_i32_0 = arith.constant 0 : i32
    %c0_i32_1 = arith.constant 0 : i32
    return %arg0, %c0_i32, %c0_i32_0 : i32, i32, i32
  }
  func.func @transform_1(%arg0: i32) -> (i32, i32) {
    %c0_i32 = arith.constant 0 : i32
    %c0_i32_0 = arith.constant 0 : i32
    %c0_i32_1 = arith.constant 0 : i32
    return %c0_i32, %c0_i32_0 : i32, i32
  }
  func.func @transform_2(%arg0: i32) -> (i32, i32) {
    %c0_i32 = arith.constant 0 : i32
    %c0_i32_0 = arith.constant 0 : i32
    %c0_i32_1 = arith.constant 0 : i32
    return %c0_i32, %c0_i32_0 : i32, i32
  }
  func.func @transform_3(%arg0: i32) -> (i32, i32, i32) {
    %c0_i32 = arith.constant 0 : i32
    %c0_i32_0 = arith.constant 0 : i32
    %c0_i32_1 = arith.constant 0 : i32
    return %arg0, %c0_i32, %c0_i32_0 : i32, i32, i32
  }
}

</mosaic_0001>

<bundles_post_ra>
// kernel: gaze_prediction_forward.6
= control target key start
LH: loop header
LB: loop body
LE: loop exit
PB: predicated region body
PF: predicated region fallthrough
CT: control target
= control target key end

     0   :  { %s1788_s12 = smov 0   ;;  %s2127_s0 = inlined_call_operand.vmem [shape: bf16[2,400,256], index: 0, kind: input, shape index: {}]   ;;  %s2128_s1 = inlined_call_operand.vmem [shape: bf16[256,128], index: 1, kind: input, shape index: {}]   ;;  %s2129_s2 = inlined_call_operand.vmem [shape: f32[3,128], index: 2, kind: input, shape index: {}]   ;;  %s2130_s3 = inlined_call_operand.vmem [shape: bf16[2,400,128], index: 3, kind: output, shape index: {}]  }
   0x1 LB: > { %s1301_s13 = sadd.s32 4294967295, %s1765_s12   ;;  %p1305_p0 = scmp.ge.s32.totalorder %s1765_s12, 1  ;;  %s1765_s12 = sphi %s1788_s12, %s13_s12  }
   0x2   : > { %p137_p1 = scmp.lt.s32.totalorder %s1765_s12, 3 }
   0x4   : > { %p138_p2 = pnand %p1305_p0, %p137_p1 }
   0x5   : > { %v1668_v0 = vld [vmem:[%s2128_s1] sm:$0xff] (!%p138_p2)   ;;  %v1767_v1 = vmov (!%p138_p2), 0   ;;  %v1669_v2 = vld [vmem:[%s2128_s1 + $0x8] sm:$0xff] (!%p138_p2)   ;;  %p161_p3 = scmp.lt.s32.totalorder (!%p138_p2), %s1301_s13, 1  ;;  %v1670_v3 = vld [vmem:[%s2128_s1 + $0x10] sm:$0xff] (!%p138_p2)  }
   0x6   : > { %141 = sbr.rel (%p138_p2) target bundleno = 391 (0x187), region = 32  ;;  %605 = vmatprep.subr.bf16.mxu0 (!%p138_p2), %v1767_v1  ;;  %1625 = vmatprep.subr.bf16.mxu1 (!%p138_p2), %v1767_v1  ;;  %v1671_v4 = vld [vmem:[%s2128_s1 + $0x18] sm:$0xff] (!%p138_p2)   ;;  %v1672_v5 = vld [vmem:[%s2128_s1 + $0x20] sm:$0xff] (!%p138_p2)   ;;  %v1673_v7 = vld [vmem:[%s2128_s1 + $0x28] sm:$0xff] (!%p138_p2)  }
   0x7   : > { %606 = vmatpush1.bf16.msra.mxu0 (!%p138_p2), %v1668_v0  ;;  %1641 = vmatpush1.bf16.msra.mxu1 (!%p138_p2), %v1668_v0  ;;  %v1674_v9 = vld [vmem:[%s2128_s1 + $0x30] sm:$0xff] (!%p138_p2)   ;;  %v1675_v10 = vld [vmem:[%s2128_s1 + $0x38] sm:$0xff] (!%p138_p2)   ;;  %v1676_v11 = vld [vmem:[%s2128_s1 + $0x40] sm:$0xff] (!%p138_p2)  }
   0x8   : > { %607 = vmatprep.subr.bf16.mxu0 (!%p138_p2), %v1767_v1  ;;  %1626 = vmatprep.subr.bf16.mxu1 (!%p138_p2), %v1767_v1  ;;  %v1677_v12 = vld [vmem:[%s2128_s1 + $0x48] sm:$0xff] (!%p138_p2)   ;;  %v1678_v13 = vld [vmem:[%s2128_s1 + $0x50] sm:$0xff] (!%p138_p2)   ;;  %v1679_v14 = vld [vmem:[%s2128_s1 + $0x58] sm:$0xff] (!%p138_p2)  }
   0x9   : > { %v1680_v15 = vld [vmem:[%s2128_s1 + $0x60] sm:$0xff] (!%p138_p2)   ;;  %v1681_v16 = vld [vmem:[%s2128_s1 + $0x68] sm:$0xff] (!%p138_p2)   ;;  %v1682_v17 = vld [vmem:[%s2128_s1 + $0x70] sm:$0xff] (!%p138_p2)  }
   0xa   : > { %v1683_v18 = vld [vmem:[%s2128_s1 + $0x78] sm:$0xff] (!%p138_p2)  }
   0xb   : > { %608 = vmatpush1.bf16.msra.mxu0 (!%p138_p2), %v1669_v2  ;;  %1642 = vmatpush1.bf16.msra.mxu1 (!%p138_p2), %v1669_v2 }
   0xc   : > { %609 = vmatprep.subr.bf16.mxu0 (!%p138_p2), %v1767_v1  ;;  %1627 = vmatprep.subr.bf16.mxu1 (!%p138_p2), %v1767_v1 }
   0xd   : > { %s2132_s13 = smov (!%p161_p3, %s1301_s13), 1 }
   0xe   : > { %s1657_s22 = smul.u32 400, %s2132_s13 }
   0xf   : > { %610 = vmatpush1.bf16.msra.mxu0 %v1670_v3  ;;  %1643 = vmatpush1.bf16.msra.mxu1 %v1670_v3  ;;  %v255_v3 = vlaneseq }
  0x10   : > { %611 = vmatprep.subr.bf16.mxu0 %v1767_v1  ;;  %1628 = vmatprep.subr.bf16.mxu1 %v1767_v1  ;;  %s1825_s27 = scalar_lea.vmem %s2127_s0, %s1657_s22 }
  0x11   : > { %v1686_v6 = vld [vmem:[%s1825_s27 + $0x4] ss:$8 sps:$4 sm:$0xff]   ;;  %v1689_v8 = vld [vmem:[%s1825_s27 + $0xd4] ss:$8 sps:$4 sm:$0xff]   ;;  %v1684_v19 = vld [vmem:[%s1825_s27] ss:$8 sps:$4 sm:$0xff]  }
  0x12   : > { %637 = vmatprep.mubr.bf16.mxu0 %v1686_v6  ;;  %741 = vmatprep.mubr.bf16.mxu1 %v1689_v8  ;;  %v1687_v20 = vld [vmem:[%s1825_s27 + $0xd0] ss:$8 sps:$4 sm:$0xff]   ;;  %v1690_v21 = vld [vmem:[%s1825_s27 + $0x14] ss:$8 sps:$4 sm:$0xff]   ;;  %v1693_v22 = vld [vmem:[%s1825_s27 + $0xe4] ss:$8 sps:$4 sm:$0xff]  }
  0x13   : > { %612 = vmatpush1.bf16.msra.mxu0 %v1671_v4  ;;  %1644 = vmatpush1.bf16.msra.mxu1 %v1671_v4  ;;  %v1692_v23 = vld [vmem:[%s1825_s27 + $0x10] ss:$8 sps:$4 sm:$0xff]   ;;  %v1695_v24 = vld [vmem:[%s1825_s27 + $0xe0] ss:$8 sps:$4 sm:$0xff]   ;;  %v1696_v25 = vld [vmem:[%s1825_s27 + $0x24] ss:$8 sps:$4 sm:$0xff]  }
  0x14   : > { %613 = vmatprep.subr.bf16.mxu0 %v1767_v1  ;;  %1629 = vmatprep.subr.bf16.mxu1 %v1767_v1  ;;  %v1699_v26 = vld [vmem:[%s1825_s27 + $0xf4] ss:$8 sps:$4 sm:$0xff]   ;;  %v1698_v27 = vld [vmem:[%s1825_s27 + $0x20] ss:$8 sps:$4 sm:$0xff]   ;;  %v1701_v28 = vld [vmem:[%s1825_s27 + $0xf0] ss:$8 sps:$4 sm:$0xff]  }
  0x15   : > { %v1702_v29 = vld [vmem:[%s1825_s27 + $0x34] ss:$8 sps:$4 sm:$0xff]   ;;  %v1705_v30 = vld [vmem:[%s1825_s27 + $0x104] ss:$8 sps:$4 sm:$0xff]   ;;  %v1704_v31 = vld [vmem:[%s1825_s27 + $0x30] ss:$8 sps:$4 sm:$0xff]  }
  0x16   : > { %v1707_v32 = vld [vmem:[%s1825_s27 + $0x100] ss:$8 sps:$4 sm:$0xff]   ;;  %v1708_v33 = vld [vmem:[%s1825_s27 + $0x44] ss:$8 sps:$4 sm:$0xff]   ;;  %v1711_v34 = vld [vmem:[%s1825_s27 + $0x114] ss:$8 sps:$4 sm:$0xff]  }
  0x17   : > { %614 = vmatpush1.bf16.msra.mxu0 %v1672_v5  ;;  %1645 = vmatpush1.bf16.msra.mxu1 %v1672_v5  ;;  %v1710_v35 = vld [vmem:[%s1825_s27 + $0x40] ss:$8 sps:$4 sm:$0xff]   ;;  %v1713_v36 = vld [vmem:[%s1825_s27 + $0x110] ss:$8 sps:$4 sm:$0xff]   ;;  %v1714_v37 = vld [vmem:[%s1825_s27 + $0x54] ss:$8 sps:$4 sm:$0xff]  }
  0x18   : > { %615 = vmatprep.subr.bf16.mxu0 %v1767_v1  ;;  %1630 = vmatprep.subr.bf16.mxu1 %v1767_v1  ;;  %v1717_v38 = vld [vmem:[%s1825_s27 + $0x124] ss:$8 sps:$4 sm:$0xff]   ;;  %v1716_v39 = vld [vmem:[%s1825_s27 + $0x50] ss:$8 sps:$4 sm:$0xff]   ;;  %v1719_v40 = vld [vmem:[%s1825_s27 + $0x120] ss:$8 sps:$4 sm:$0xff]  }
  0x19   : > { %v1720_v41 = vld [vmem:[%s1825_s27 + $0x64] ss:$8 sps:$4 sm:$0xff]   ;;  %v1723_v42 = vld [vmem:[%s1825_s27 + $0x134] ss:$8 sps:$4 sm:$0xff]   ;;  %v1722_v43 = vld [vmem:[%s1825_s27 + $0x60] ss:$8 sps:$4 sm:$0xff]  }
  0x1a   : > { %v1725_v44 = vld [vmem:[%s1825_s27 + $0x130] ss:$8 sps:$4 sm:$0xff]   ;;  %v1726_v45 = vld [vmem:[%s1825_s27 + $0x74] ss:$8 sps:$4 sm:$0xff]   ;;  %v1729_v46 = vld [vmem:[%s1825_s27 + $0x144] ss:$8 sps:$4 sm:$0xff]  }
  0x1b   : > { %616 = vmatpush1.bf16.msra.mxu0 %v1673_v7  ;;  %1646 = vmatpush1.bf16.msra.mxu1 %v1673_v7  ;;  %v1728_v47 = vld [vmem:[%s1825_s27 + $0x70] ss:$8 sps:$4 sm:$0xff]   ;;  %v1731_v48 = vld [vmem:[%s1825_s27 + $0x140] ss:$8 sps:$4 sm:$0xff]   ;;  %v1732_v49 = vld [vmem:[%s1825_s27 + $0x84] ss:$8 sps:$4 sm:$0xff]  }
  0x1c   : > { %617 = vmatprep.subr.bf16.mxu0 %v1767_v1  ;;  %1631 = vmatprep.subr.bf16.mxu1 %v1767_v1  ;;  %v1735_v50 = vld [vmem:[%s1825_s27 + $0x154] ss:$8 sps:$4 sm:$0xff]   ;;  %v1734_v51 = vld [vmem:[%s1825_s27 + $0x80] ss:$8 sps:$4 sm:$0xff]   ;;  %v1737_v52 = vld [vmem:[%s1825_s27 + $0x150] ss:$8 sps:$4 sm:$0xff]  }
  0x1d   : > { %v1738_v53 = vld [vmem:[%s1825_s27 + $0x94] ss:$8 sps:$4 sm:$0xff]   ;;  %v1741_v54 = vld [vmem:[%s1825_s27 + $0x164] ss:$8 sps:$4 sm:$0xff]   ;;  %v1740_v55 = vld [vmem:[%s1825_s27 + $0x90] ss:$8 sps:$4 sm:$0xff]  }
  0x1e   : > { %v1743_v56 = vld [vmem:[%s1825_s27 + $0x160] ss:$8 sps:$4 sm:$0xff]   ;;  %v1744_v57 = vld [vmem:[%s1825_s27 + $0xa4] ss:$8 sps:$4 sm:$0xff]   ;;  %v1747_v58 = vld [vmem:[%s1825_s27 + $0x174] ss:$8 sps:$4 sm:$0xff]  }
  0x1f   : > { %618 = vmatpush1.bf16.msra.mxu0 %v1674_v9  ;;  %1647 = vmatpush1.bf16.msra.mxu1 %v1674_v9  ;;  %v1746_v59 = vld [vmem:[%s1825_s27 + $0xa0] ss:$8 sps:$4 sm:$0xff]   ;;  %v1749_v60 = vld [vmem:[%s1825_s27 + $0x170] ss:$8 sps:$4 sm:$0xff]   ;;  %v1750_v61 = vld [vmem:[%s1825_s27 + $0xb4] ss:$8 sps:$4 sm:$0xff]  }
  0x20   : > { %619 = vmatprep.subr.bf16.mxu0 %v1767_v1  ;;  %1632 = vmatprep.subr.bf16.mxu1 %v1767_v1  ;;  %v1753_v62 = vld [vmem:[%s1825_s27 + $0x184] ss:$8 sps:$4 sm:$0xff]   ;;  %v1752_v63 = vld [vmem:[%s1825_s27 + $0xb0] ss:$8 sps:$4 sm:$0xff]   ;;  %v1755_v0 = vld [vmem:[%s1825_s27 + $0x180] ss:$8 sps:$4 sm:$0xff]  }
  0x21   : > { %v1758_v2 = vld [vmem:[%s1825_s27 + $0xc0] ss:$8 sps:$4 sm:$0xff]   ;;  %v256_v4 = vshrl.u32 %v255_v3, 7 }
  0x22   : > { %v172_v6 = vld [vmem:[%s2129_s2] sm:$0x7] }
  0x23   : > { %620 = vmatpush1.bf16.msra.mxu0 %v1675_v10  ;;  %1648 = vmatpush1.bf16.msra.mxu1 %v1675_v10  ;;  %v257_v5 = vsub.s32 0, %v256_v4  ;;  %v890_v8 = vsub.s32 1, %v256_v4  ;;  %v944_v10 = vsub.s32 2, %v256_v4 }
  0x24   : > { %621 = vmatprep.subr.bf16.mxu0 %v1767_v1  ;;  %1633 = vmatprep.subr.bf16.mxu1 %v1767_v1 }
  0x25   : > { %v1937_v7 = vrot.slane %v172_v6, %v257_v5 }
  0x27   : > { %622 = vmatpush1.bf16.msra.mxu0 %v1676_v11  ;;  %1649 = vmatpush1.bf16.msra.mxu1 %v1676_v11 }
  0x28   : > { %623 = vmatprep.subr.bf16.mxu0 %v1767_v1  ;;  %1634 = vmatprep.subr.bf16.mxu1 %v1767_v1 }
  0x2b   : > { %624 = vmatpush1.bf16.msra.mxu0 %v1677_v12  ;;  %1650 = vmatpush1.bf16.msra.mxu1 %v1677_v12 }
  0x2c   : > { %625 = vmatprep.subr.bf16.mxu0 %v1767_v1  ;;  %1635 = vmatprep.subr.bf16.mxu1 %v1767_v1 }
  0x2f   : > { %626 = vmatpush1.bf16.msra.mxu0 %v1678_v13  ;;  %1651 = vmatpush1.bf16.msra.mxu1 %v1678_v13  ;;  %v1940_v13 = vrot.slane %v172_v6, %v890_v8 }
  0x30   : > { %627 = vmatprep.subr.bf16.mxu0 %v1767_v1  ;;  %1636 = vmatprep.subr.bf16.mxu1 %v1767_v1 }
  0x33   : > { %628 = vmatpush1.bf16.msra.mxu0 %v1679_v14  ;;  %1652 = vmatpush1.bf16.msra.mxu1 %v1679_v14 }
  0x34   : > { %629 = vmatprep.subr.bf16.mxu0 %v1767_v1  ;;  %1637 = vmatprep.subr.bf16.mxu1 %v1767_v1 }
  0x37   : > { %630 = vmatpush1.bf16.msra.mxu0 %v1680_v15  ;;  %1653 = vmatpush1.bf16.msra.mxu1 %v1680_v15 }
  0x38   : > { %631 = vmatprep.subr.bf16.mxu0 %v1767_v1  ;;  %1638 = vmatprep.subr.bf16.mxu1 %v1767_v1 }
  0x3b   : > { %632 = vmatpush1.bf16.msra.mxu0 %v1681_v16  ;;  %1654 = vmatpush1.bf16.msra.mxu1 %v1681_v16 }
  0x3c   : > { %633 = vmatprep.subr.bf16.mxu0 %v1767_v1  ;;  %1639 = vmatprep.subr.bf16.mxu1 %v1767_v1 }
  0x3f   : > { %634 = vmatpush1.bf16.msra.mxu0 %v1682_v17  ;;  %1655 = vmatpush1.bf16.msra.mxu1 %v1682_v17 }
  0x40   : > { %635 = vmatprep.subr.bf16.mxu0 %v1767_v1  ;;  %1640 = vmatprep.subr.bf16.mxu1 %v1767_v1  ;;  %v1756_v1 = vld [vmem:[%s1825_s27 + $0xc4] ss:$8 sps:$4 sm:$0xff]   ;;  %s1658_s27 = smul.u32 200, %s2132_s13 }
  0x42   : > { %s1961_s29 = scalar_lea.vmem %s2130_s3, %s1658_s27 }
  0x43   : > { %636 = vmatpush1.bf16.msra.mxu0 %v1683_v18  ;;  %1656 = vmatpush1.bf16.msra.mxu1 %v1683_v18 }
  0x46   : > { %638 = vmatmul.mubr.bf16.vlgmr.msra.gmra.mrb[0].mxu0 %v1684_v19  ;;  %742 = vmatmul.mubr.bf16.vlgmr.msra.gmra.mrb[0].mxu1 %v1687_v20 }
  0x47   : > { %645 = vmatprep.mubr.bf16.mxu0 %v1690_v21  ;;  %749 = vmatprep.mubr.bf16.mxu1 %v1693_v22 }
  0x4e   : > { %646 = vmatmul.mubr.bf16.gmra.mrb[4].mxu0 %v1692_v23  ;;  %750 = vmatmul.mubr.bf16.gmra.mrb[4].mxu1 %v1695_v24 }
  0x4f   : > { %653 = vmatprep.mubr.bf16.mxu0 %v1696_v25  ;;  %757 = vmatprep.mubr.bf16.mxu1 %v1699_v26  ;;  %v1945_v25 = vrot.slane %v172_v6, %v944_v10 }
  0x56   : > { %654 = vmatmul.mubr.bf16.gmra.mrb[8].mxu0 %v1698_v27  ;;  %758 = vmatmul.mubr.bf16.gmra.mrb[8].mxu1 %v1701_v28 }
  0x57   : > { %661 = vmatprep.mubr.bf16.mxu0 %v1702_v29  ;;  %765 = vmatprep.mubr.bf16.mxu1 %v1705_v30 }
  0x5e   : > { %662 = vmatmul.mubr.bf16.gmra.mrb[12].mxu0 %v1704_v31  ;;  %766 = vmatmul.mubr.bf16.gmra.mrb[12].mxu1 %v1707_v32 }
  0x5f   : > { %669 = vmatprep.mubr.bf16.mxu0 %v1708_v33  ;;  %773 = vmatprep.mubr.bf16.mxu1 %v1711_v34 }
  0x66   : > { %670 = vmatmul.mubr.bf16.gmra.mrb[16].mxu0 %v1710_v35  ;;  %774 = vmatmul.mubr.bf16.gmra.mrb[16].mxu1 %v1713_v36 }
  0x67   : > { %677 = vmatprep.mubr.bf16.mxu0 %v1714_v37  ;;  %781 = vmatprep.mubr.bf16.mxu1 %v1717_v38 }
  0x6e   : > { %678 = vmatmul.mubr.bf16.gmra.mrb[20].mxu0 %v1716_v39  ;;  %782 = vmatmul.mubr.bf16.gmra.mrb[20].mxu1 %v1719_v40 }
  0x6f   : > { %685 = vmatprep.mubr.bf16.mxu0 %v1720_v41  ;;  %789 = vmatprep.mubr.bf16.mxu1 %v1723_v42 }
  0x76   : > { %686 = vmatmul.mubr.bf16.gmra.mrb[24].mxu0 %v1722_v43  ;;  %790 = vmatmul.mubr.bf16.gmra.mrb[24].mxu1 %v1725_v44 }
  0x77   : > { %693 = vmatprep.mubr.bf16.mxu0 %v1726_v45  ;;  %797 = vmatprep.mubr.bf16.mxu1 %v1729_v46 }
  0x7e   : > { %694 = vmatmul.mubr.bf16.gmra.mrb[28].mxu0 %v1728_v47  ;;  %798 = vmatmul.mubr.bf16.gmra.mrb[28].mxu1 %v1731_v48 }
  0x7f   : > { %701 = vmatprep.mubr.bf16.mxu0 %v1732_v49  ;;  %805 = vmatprep.mubr.bf16.mxu1 %v1735_v50 }
  0x86   : > { %702 = vmatmul.mubr.bf16.gmra.mrb[32].mxu0 %v1734_v51  ;;  %806 = vmatmul.mubr.bf16.gmra.mrb[32].mxu1 %v1737_v52 }
  0x87   : > { %709 = vmatprep.mubr.bf16.mxu0 %v1738_v53  ;;  %813 = vmatprep.mubr.bf16.mxu1 %v1741_v54 }
  0x8e   : > { %710 = vmatmul.mubr.bf16.gmra.mrb[36].mxu0 %v1740_v55  ;;  %814 = vmatmul.mubr.bf16.gmra.mrb[36].mxu1 %v1743_v56 }
  0x8f   : > { %717 = vmatprep.mubr.bf16.mxu0 %v1744_v57  ;;  %821 = vmatprep.mubr.bf16.mxu1 %v1747_v58 }
  0x96   : > { %718 = vmatmul.mubr.bf16.gmra.mrb[40].mxu0 %v1746_v59  ;;  %822 = vmatmul.mubr.bf16.gmra.mrb[40].mxu1 %v1749_v60 }
  0x97   : > { %725 = vmatprep.mubr.bf16.mxu0 %v1750_v61  ;;  %829 = vmatprep.mubr.bf16.mxu1 %v1753_v62 }
  0x9e   : > { %726 = vmatmul.mubr.bf16.gmra.mrb[44].mxu0 %v1752_v63  ;;  %830 = vmatmul.mubr.bf16.gmra.mrb[44].mxu1 %v1755_v0 }
  0x9f   : > { %733 = vmatprep.mubr.bf16.mxu0 %v1756_v1 }
  0xa6   : > { %734 = vmatmul.mubr.bf16.gmra.mrb[48].mxu0 %v1758_v2 }
 0x119   : > { %v639_v9 = vpop.f32.mrb[0].mxu0  ;;  %v743_v11 = vpop.f32.mrb[0].mxu1 }
 0x11a   : > { %v640_v12 = vadd.f32 %v639_v9, %v1937_v7  ;;  %v641_v14 = vpop.f32.mrb[1].mxu0  ;;  %v744_v15 = vadd.f32 %v743_v11, %v1937_v7  ;;  %v745_v16 = vpop.f32.mrb[1].mxu1 }
 0x11b   : > { %v642_v17 = vpop.f32.mrb[2].mxu0  ;;  %v746_v18 = vpop.f32.mrb[2].mxu1 }
 0x11c   : > { %v838_v19 = vmax.f32 %v640_v12, 0.0  ;;  %v643_v20 = vadd.f32 %v642_v17, %v1937_v7  ;;  %v644_v21 = vpop.f32.mrb[3].mxu0  ;;  %v864_v22 = vmax.f32 %v744_v15, 0.0  ;;  %v747_v23 = vadd.f32 %v746_v18, %v1937_v7  ;;  %v748_v24 = vpop.f32.mrb[3].mxu1 }
 0x11e   : > { %v892_v26 = vmul.f32 %v1940_v13, %v838_v19  ;;  %v839_v27 = vmax.f32 %v643_v20, 0.0  ;;  %v918_v28 = vmul.f32 %v1940_v13, %v864_v22  ;;  %v865_v29 = vmax.f32 %v747_v23, 0.0 }
 0x120   : > { %v893_v30 = vmul.f32 %v1940_v13, %v839_v27  ;;  %v972_v31 = vadd.f32 %v1945_v25, %v918_v28  ;;  %v919_v32 = vmul.f32 %v1940_v13, %v865_v29  ;;  %v946_v33 = vadd.f32 %v1945_v25, %v892_v26 }
 0x121   : > { %v647_v34 = vpop.f32.mrb[4].mxu0  ;;  %v751_v35 = vpop.f32.mrb[4].mxu1 }
 0x122   : > { %v947_v36 = vadd.f32 %v1945_v25, %v893_v30  ;;  %v973_v37 = vadd.f32 %v1945_v25, %v919_v32  ;;  %v648_v38 = vadd.f32 %v647_v34, %v1937_v7  ;;  %v649_v39 = vpop.f32.mrb[5].mxu0  ;;  %v752_v40 = vadd.f32 %v751_v35, %v1937_v7  ;;  %v753_v41 = vpop.f32.mrb[5].mxu1 }
 0x123   : > { %v650_v42 = vpop.f32.mrb[6].mxu0  ;;  %v754_v43 = vpop.f32.mrb[6].mxu1 }
 0x124   : > { %v1479_v44 = vpack.c.bf16 %v947_v36, %v946_v33  ;;  %v1544_v45 = vpack.c.bf16 %v973_v37, %v972_v31  ;;  %v840_v46 = vmax.f32 %v648_v38, 0.0  ;;  %v651_v47 = vadd.f32 %v650_v42, %v1937_v7  ;;  %v652_v48 = vpop.f32.mrb[7].mxu0  ;;  %v756_v49 = vpop.f32.mrb[7].mxu1 }
 0x125   : > { %v866_v50 = vmax.f32 %v752_v40, 0.0  ;;  %v755_v51 = vadd.f32 %v754_v43, %v1937_v7 }
 0x126   : > { %1480 = vst [vmem:[%s1961_s29] sm:$0xff] %v1479_v44   ;;  %1613 = vst [vmem:[%s1961_s29 + $0x68] sm:$0xff] %v1544_v45   ;;  %v894_v52 = vmul.f32 %v1940_v13, %v840_v46  ;;  %v841_v53 = vmax.f32 %v651_v47, 0.0 }
 0x127   : > { %v920_v54 = vmul.f32 %v1940_v13, %v866_v50  ;;  %v867_v55 = vmax.f32 %v755_v51, 0.0 }
 0x128   : > { %v895_v56 = vmul.f32 %v1940_v13, %v841_v53  ;;  %v948_v61 = vadd.f32 %v1945_v25, %v894_v52 }
 0x129   : > { %v974_v57 = vadd.f32 %v1945_v25, %v920_v54  ;;  %v921_v58 = vmul.f32 %v1940_v13, %v867_v55  ;;  %v655_v59 = vpop.f32.mrb[8].mxu0  ;;  %v759_v60 = vpop.f32.mrb[8].mxu1 }
 0x12a   : > { %v949_v62 = vadd.f32 %v1945_v25, %v895_v56  ;;  %v656_v63 = vadd.f32 %v655_v59, %v1937_v7  ;;  %v657_v0 = vpop.f32.mrb[9].mxu0  ;;  %v760_v1 = vadd.f32 %v759_v60, %v1937_v7  ;;  %v761_v2 = vpop.f32.mrb[9].mxu1 }
 0x12b   : > { %v975_v3 = vadd.f32 %v1945_v25, %v921_v58  ;;  %v658_v4 = vpop.f32.mrb[10].mxu0  ;;  %v762_v5 = vpop.f32.mrb[10].mxu1 }
 0x12c   : > { %v1484_v6 = vpack.c.bf16 %v949_v62, %v948_v61  ;;  %v842_v8 = vmax.f32 %v656_v63, 0.0  ;;  %v659_v9 = vadd.f32 %v658_v4, %v1937_v7  ;;  %v660_v10 = vpop.f32.mrb[11].mxu0  ;;  %v868_v11 = vmax.f32 %v760_v1, 0.0  ;;  %v764_v12 = vpop.f32.mrb[11].mxu1 }
 0x12d   : > { %v1549_v14 = vpack.c.bf16 %v975_v3, %v974_v57  ;;  %v763_v15 = vadd.f32 %v762_v5, %v1937_v7 }
 0x12e   : > { %1601 = vst [vmem:[%s1961_s29 + $0x8] sm:$0xff] %v1484_v6   ;;  %v896_v16 = vmul.f32 %v1940_v13, %v842_v8  ;;  %v843_v17 = vmax.f32 %v659_v9, 0.0  ;;  %v922_v18 = vmul.f32 %v1940_v13, %v868_v11 }
 0x12f   : > { %1614 = vst [vmem:[%s1961_s29 + $0x70] sm:$0xff] %v1549_v14   ;;  %v869_v19 = vmax.f32 %v763_v15, 0.0 }
 0x130   : > { %v897_v20 = vmul.f32 %v1940_v13, %v843_v17  ;;  %v976_v21 = vadd.f32 %v1945_v25, %v922_v18  ;;  %v950_v26 = vadd.f32 %v1945_v25, %v896_v16 }
 0x131   : > { %v923_v22 = vmul.f32 %v1940_v13, %v869_v19  ;;  %v663_v23 = vpop.f32.mrb[12].mxu0  ;;  %v767_v24 = vpop.f32.mrb[12].mxu1 }
 0x132   : > { %v951_v27 = vadd.f32 %v1945_v25, %v897_v20  ;;  %v664_v28 = vadd.f32 %v663_v23, %v1937_v7  ;;  %v665_v29 = vpop.f32.mrb[13].mxu0  ;;  %v768_v30 = vadd.f32 %v767_v24, %v1937_v7  ;;  %v769_v31 = vpop.f32.mrb[13].mxu1 }
 0x133   : > { %v977_v32 = vadd.f32 %v1945_v25, %v923_v22  ;;  %v666_v33 = vpop.f32.mrb[14].mxu0  ;;  %v770_v34 = vpop.f32.mrb[14].mxu1 }
 0x134   : > { %v1489_v35 = vpack.c.bf16 %v951_v27, %v950_v26  ;;  %v844_v36 = vmax.f32 %v664_v28, 0.0  ;;  %v667_v37 = vadd.f32 %v666_v33, %v1937_v7  ;;  %v668_v38 = vpop.f32.mrb[15].mxu0  ;;  %v870_v39 = vmax.f32 %v768_v30, 0.0  ;;  %v772_v40 = vpop.f32.mrb[15].mxu1 }
 0x135   : > { %v1554_v41 = vpack.c.bf16 %v977_v32, %v976_v21  ;;  %v771_v42 = vadd.f32 %v770_v34, %v1937_v7 }
 0x136   : > { %1602 = vst [vmem:[%s1961_s29 + $0x10] sm:$0xff] %v1489_v35   ;;  %v898_v43 = vmul.f32 %v1940_v13, %v844_v36  ;;  %v845_v44 = vmax.f32 %v667_v37, 0.0  ;;  %v924_v45 = vmul.f32 %v1940_v13, %v870_v39 }
 0x137   : > { %1615 = vst [vmem:[%s1961_s29 + $0x78] sm:$0xff] %v1554_v41   ;;  %v871_v46 = vmax.f32 %v771_v42, 0.0 }
 0x138   : > { %v899_v47 = vmul.f32 %v1940_v13, %v845_v44  ;;  %v978_v48 = vadd.f32 %v1945_v25, %v924_v45  ;;  %v952_v52 = vadd.f32 %v1945_v25, %v898_v43 }
 0x139   : > { %v925_v49 = vmul.f32 %v1940_v13, %v871_v46  ;;  %v671_v50 = vpop.f32.mrb[16].mxu0  ;;  %v775_v51 = vpop.f32.mrb[16].mxu1 }
 0x13a   : > { %v953_v53 = vadd.f32 %v1945_v25, %v899_v47  ;;  %v672_v54 = vadd.f32 %v671_v50, %v1937_v7  ;;  %v673_v55 = vpop.f32.mrb[17].mxu0  ;;  %v776_v56 = vadd.f32 %v775_v51, %v1937_v7  ;;  %v777_v57 = vpop.f32.mrb[17].mxu1 }
 0x13b   : > { %v979_v58 = vadd.f32 %v1945_v25, %v925_v49  ;;  %v674_v59 = vpop.f32.mrb[18].mxu0  ;;  %v778_v60 = vpop.f32.mrb[18].mxu1 }
 0x13c   : > { %v1494_v61 = vpack.c.bf16 %v953_v53, %v952_v52  ;;  %v846_v62 = vmax.f32 %v672_v54, 0.0  ;;  %v675_v63 = vadd.f32 %v674_v59, %v1937_v7  ;;  %v676_v0 = vpop.f32.mrb[19].mxu0  ;;  %v872_v1 = vmax.f32 %v776_v56, 0.0  ;;  %v780_v2 = vpop.f32.mrb[19].mxu1 }
 0x13d   : > { %v1559_v3 = vpack.c.bf16 %v979_v58, %v978_v48  ;;  %v779_v4 = vadd.f32 %v778_v60, %v1937_v7 }
 0x13e   : > { %1603 = vst [vmem:[%s1961_s29 + $0x18] sm:$0xff] %v1494_v61   ;;  %v900_v5 = vmul.f32 %v1940_v13, %v846_v62  ;;  %v847_v6 = vmax.f32 %v675_v63, 0.0  ;;  %v926_v8 = vmul.f32 %v1940_v13, %v872_v1 }
 0x13f   : > { %1616 = vst [vmem:[%s1961_s29 + $0x80] sm:$0xff] %v1559_v3   ;;  %v873_v9 = vmax.f32 %v779_v4, 0.0 }
 0x140   : > { %v901_v10 = vmul.f32 %v1940_v13, %v847_v6  ;;  %v980_v11 = vadd.f32 %v1945_v25, %v926_v8  ;;  %v954_v16 = vadd.f32 %v1945_v25, %v900_v5 }
 0x141   : > { %v927_v12 = vmul.f32 %v1940_v13, %v873_v9  ;;  %v679_v14 = vpop.f32.mrb[20].mxu0  ;;  %v783_v15 = vpop.f32.mrb[20].mxu1 }
 0x142   : > { %v955_v17 = vadd.f32 %v1945_v25, %v901_v10  ;;  %v680_v18 = vadd.f32 %v679_v14, %v1937_v7  ;;  %v681_v19 = vpop.f32.mrb[21].mxu0  ;;  %v784_v20 = vadd.f32 %v783_v15, %v1937_v7  ;;  %v785_v21 = vpop.f32.mrb[21].mxu1 }
 0x143   : > { %v981_v22 = vadd.f32 %v1945_v25, %v927_v12  ;;  %v682_v23 = vpop.f32.mrb[22].mxu0  ;;  %v786_v24 = vpop.f32.mrb[22].mxu1 }
 0x144   : > { %v1499_v26 = vpack.c.bf16 %v955_v17, %v954_v16  ;;  %v848_v27 = vmax.f32 %v680_v18, 0.0  ;;  %v683_v28 = vadd.f32 %v682_v23, %v1937_v7  ;;  %v684_v29 = vpop.f32.mrb[23].mxu0  ;;  %v874_v30 = vmax.f32 %v784_v20, 0.0  ;;  %v788_v31 = vpop.f32.mrb[23].mxu1 }
 0x145   : > { %v1564_v32 = vpack.c.bf16 %v981_v22, %v980_v11  ;;  %v787_v33 = vadd.f32 %v786_v24, %v1937_v7 }
 0x146   : > { %1604 = vst [vmem:[%s1961_s29 + $0x20] sm:$0xff] %v1499_v26   ;;  %v902_v34 = vmul.f32 %v1940_v13, %v848_v27  ;;  %v849_v35 = vmax.f32 %v683_v28, 0.0  ;;  %v928_v36 = vmul.f32 %v1940_v13, %v874_v30 }
 0x147   : > { %1617 = vst [vmem:[%s1961_s29 + $0x88] sm:$0xff] %v1564_v32   ;;  %v875_v37 = vmax.f32 %v787_v33, 0.0 }
 0x148   : > { %v903_v38 = vmul.f32 %v1940_v13, %v849_v35  ;;  %v982_v39 = vadd.f32 %v1945_v25, %v928_v36  ;;  %v956_v43 = vadd.f32 %v1945_v25, %v902_v34 }
 0x149   : > { %v929_v40 = vmul.f32 %v1940_v13, %v875_v37  ;;  %v687_v41 = vpop.f32.mrb[24].mxu0  ;;  %v791_v42 = vpop.f32.mrb[24].mxu1 }
 0x14a   : > { %v957_v44 = vadd.f32 %v1945_v25, %v903_v38  ;;  %v688_v45 = vadd.f32 %v687_v41, %v1937_v7  ;;  %v689_v46 = vpop.f32.mrb[25].mxu0  ;;  %v792_v47 = vadd.f32 %v791_v42, %v1937_v7  ;;  %v793_v48 = vpop.f32.mrb[25].mxu1 }
 0x14b   : > { %v983_v49 = vadd.f32 %v1945_v25, %v929_v40  ;;  %v690_v50 = vpop.f32.mrb[26].mxu0  ;;  %v794_v51 = vpop.f32.mrb[26].mxu1 }
 0x14c   : > { %v1504_v52 = vpack.c.bf16 %v957_v44, %v956_v43  ;;  %v850_v53 = vmax.f32 %v688_v45, 0.0  ;;  %v691_v54 = vadd.f32 %v690_v50, %v1937_v7  ;;  %v692_v55 = vpop.f32.mrb[27].mxu0  ;;  %v876_v56 = vmax.f32 %v792_v47, 0.0  ;;  %v796_v57 = vpop.f32.mrb[27].mxu1 }
 0x14d   : > { %v1569_v58 = vpack.c.bf16 %v983_v49, %v982_v39  ;;  %v795_v59 = vadd.f32 %v794_v51, %v1937_v7 }
 0x14e   : > { %1605 = vst [vmem:[%s1961_s29 + $0x28] sm:$0xff] %v1504_v52   ;;  %v904_v60 = vmul.f32 %v1940_v13, %v850_v53  ;;  %v851_v61 = vmax.f32 %v691_v54, 0.0  ;;  %v930_v62 = vmul.f32 %v1940_v13, %v876_v56 }
 0x14f   : > { %1618 = vst [vmem:[%s1961_s29 + $0x90] sm:$0xff] %v1569_v58   ;;  %v877_v63 = vmax.f32 %v795_v59, 0.0 }
 0x150   : > { %v905_v0 = vmul.f32 %v1940_v13, %v851_v61  ;;  %v984_v1 = vadd.f32 %v1945_v25, %v930_v62  ;;  %v958_v5 = vadd.f32 %v1945_v25, %v904_v60 }
 0x151   : > { %v931_v2 = vmul.f32 %v1940_v13, %v877_v63  ;;  %v695_v3 = vpop.f32.mrb[28].mxu0  ;;  %v799_v4 = vpop.f32.mrb[28].mxu1 }
 0x152   : > { %v959_v6 = vadd.f32 %v1945_v25, %v905_v0  ;;  %v696_v8 = vadd.f32 %v695_v3, %v1937_v7  ;;  %v697_v9 = vpop.f32.mrb[29].mxu0  ;;  %v800_v10 = vadd.f32 %v799_v4, %v1937_v7  ;;  %v801_v11 = vpop.f32.mrb[29].mxu1 }
 0x153   : > { %v985_v12 = vadd.f32 %v1945_v25, %v931_v2  ;;  %v698_v14 = vpop.f32.mrb[30].mxu0  ;;  %v802_v15 = vpop.f32.mrb[30].mxu1 }
 0x154   : > { %v1509_v16 = vpack.c.bf16 %v959_v6, %v958_v5  ;;  %v852_v17 = vmax.f32 %v696_v8, 0.0  ;;  %v699_v18 = vadd.f32 %v698_v14, %v1937_v7  ;;  %v700_v19 = vpop.f32.mrb[31].mxu0  ;;  %v878_v20 = vmax.f32 %v800_v10, 0.0  ;;  %v804_v21 = vpop.f32.mrb[31].mxu1 }
 0x155   : > { %v1574_v22 = vpack.c.bf16 %v985_v12, %v984_v1  ;;  %v803_v23 = vadd.f32 %v802_v15, %v1937_v7 }
 0x156   : > { %1606 = vst [vmem:[%s1961_s29 + $0x30] sm:$0xff] %v1509_v16   ;;  %v906_v24 = vmul.f32 %v1940_v13, %v852_v17  ;;  %v853_v26 = vmax.f32 %v699_v18, 0.0  ;;  %v932_v27 = vmul.f32 %v1940_v13, %v878_v20 }
 0x157   : > { %1619 = vst [vmem:[%s1961_s29 + $0x98] sm:$0xff] %v1574_v22   ;;  %v879_v28 = vmax.f32 %v803_v23, 0.0 }
 0x158   : > { %v907_v29 = vmul.f32 %v1940_v13, %v853_v26  ;;  %v986_v30 = vadd.f32 %v1945_v25, %v932_v27  ;;  %v960_v34 = vadd.f32 %v1945_v25, %v906_v24 }
 0x159   : > { %v933_v31 = vmul.f32 %v1940_v13, %v879_v28  ;;  %v703_v32 = vpop.f32.mrb[32].mxu0  ;;  %v807_v33 = vpop.f32.mrb[32].mxu1 }
 0x15a   : > { %v961_v35 = vadd.f32 %v1945_v25, %v907_v29  ;;  %v704_v36 = vadd.f32 %v703_v32, %v1937_v7  ;;  %v705_v37 = vpop.f32.mrb[33].mxu0  ;;  %v808_v38 = vadd.f32 %v807_v33, %v1937_v7  ;;  %v809_v39 = vpop.f32.mrb[33].mxu1 }
 0x15b   : > { %v987_v40 = vadd.f32 %v1945_v25, %v933_v31  ;;  %v706_v41 = vpop.f32.mrb[34].mxu0  ;;  %v810_v42 = vpop.f32.mrb[34].mxu1 }
 0x15c   : > { %v1514_v43 = vpack.c.bf16 %v961_v35, %v960_v34  ;;  %v854_v44 = vmax.f32 %v704_v36, 0.0  ;;  %v707_v45 = vadd.f32 %v706_v41, %v1937_v7  ;;  %v708_v46 = vpop.f32.mrb[35].mxu0  ;;  %v880_v47 = vmax.f32 %v808_v38, 0.0  ;;  %v812_v48 = vpop.f32.mrb[35].mxu1 }
 0x15d   : > { %v1579_v49 = vpack.c.bf16 %v987_v40, %v986_v30  ;;  %v811_v50 = vadd.f32 %v810_v42, %v1937_v7 }
 0x15e   : > { %1607 = vst [vmem:[%s1961_s29 + $0x38] sm:$0xff] %v1514_v43   ;;  %v908_v51 = vmul.f32 %v1940_v13, %v854_v44  ;;  %v855_v52 = vmax.f32 %v707_v45, 0.0  ;;  %v934_v53 = vmul.f32 %v1940_v13, %v880_v47 }
 0x15f   : > { %1620 = vst [vmem:[%s1961_s29 + $0xa0] sm:$0xff] %v1579_v49   ;;  %v881_v54 = vmax.f32 %v811_v50, 0.0 }
 0x160   : > { %v909_v55 = vmul.f32 %v1940_v13, %v855_v52  ;;  %v988_v56 = vadd.f32 %v1945_v25, %v934_v53  ;;  %v962_v60 = vadd.f32 %v1945_v25, %v908_v51 }
 0x161   : > { %v935_v57 = vmul.f32 %v1940_v13, %v881_v54  ;;  %v711_v58 = vpop.f32.mrb[36].mxu0  ;;  %v815_v59 = vpop.f32.mrb[36].mxu1 }
 0x162   : > { %v963_v61 = vadd.f32 %v1945_v25, %v909_v55  ;;  %v712_v62 = vadd.f32 %v711_v58, %v1937_v7  ;;  %v713_v63 = vpop.f32.mrb[37].mxu0  ;;  %v816_v0 = vadd.f32 %v815_v59, %v1937_v7  ;;  %v817_v1 = vpop.f32.mrb[37].mxu1 }
 0x163   : > { %v989_v2 = vadd.f32 %v1945_v25, %v935_v57  ;;  %v714_v3 = vpop.f32.mrb[38].mxu0  ;;  %v818_v4 = vpop.f32.mrb[38].mxu1 }
 0x164   : > { %v1519_v5 = vpack.c.bf16 %v963_v61, %v962_v60  ;;  %v856_v6 = vmax.f32 %v712_v62, 0.0  ;;  %v715_v8 = vadd.f32 %v714_v3, %v1937_v7  ;;  %v716_v9 = vpop.f32.mrb[39].mxu0  ;;  %v882_v10 = vmax.f32 %v816_v0, 0.0  ;;  %v820_v11 = vpop.f32.mrb[39].mxu1 }
 0x165   : > { %v1584_v12 = vpack.c.bf16 %v989_v2, %v988_v56  ;;  %v819_v14 = vadd.f32 %v818_v4, %v1937_v7 }
 0x166   : > { %1608 = vst [vmem:[%s1961_s29 + $0x40] sm:$0xff] %v1519_v5   ;;  %v910_v15 = vmul.f32 %v1940_v13, %v856_v6  ;;  %v857_v16 = vmax.f32 %v715_v8, 0.0  ;;  %v936_v17 = vmul.f32 %v1940_v13, %v882_v10 }
 0x167   : > { %1621 = vst [vmem:[%s1961_s29 + $0xa8] sm:$0xff] %v1584_v12   ;;  %v883_v18 = vmax.f32 %v819_v14, 0.0 }
 0x168   : > { %v911_v19 = vmul.f32 %v1940_v13, %v857_v16  ;;  %v990_v20 = vadd.f32 %v1945_v25, %v936_v17  ;;  %v964_v24 = vadd.f32 %v1945_v25, %v910_v15 }
 0x169   : > { %v937_v21 = vmul.f32 %v1940_v13, %v883_v18  ;;  %v719_v22 = vpop.f32.mrb[40].mxu0  ;;  %v823_v23 = vpop.f32.mrb[40].mxu1 }
 0x16a   : > { %v965_v26 = vadd.f32 %v1945_v25, %v911_v19  ;;  %v720_v27 = vadd.f32 %v719_v22, %v1937_v7  ;;  %v721_v28 = vpop.f32.mrb[41].mxu0  ;;  %v824_v29 = vadd.f32 %v823_v23, %v1937_v7  ;;  %v825_v30 = vpop.f32.mrb[41].mxu1 }
 0x16b   : > { %v991_v31 = vadd.f32 %v1945_v25, %v937_v21  ;;  %v722_v32 = vpop.f32.mrb[42].mxu0  ;;  %v826_v33 = vpop.f32.mrb[42].mxu1 }
 0x16c   : > { %v1524_v34 = vpack.c.bf16 %v965_v26, %v964_v24  ;;  %v858_v35 = vmax.f32 %v720_v27, 0.0  ;;  %v723_v36 = vadd.f32 %v722_v32, %v1937_v7  ;;  %v724_v37 = vpop.f32.mrb[43].mxu0  ;;  %v884_v38 = vmax.f32 %v824_v29, 0.0  ;;  %v828_v39 = vpop.f32.mrb[43].mxu1 }
 0x16d   : > { %v1589_v40 = vpack.c.bf16 %v991_v31, %v990_v20  ;;  %v827_v41 = vadd.f32 %v826_v33, %v1937_v7 }
 0x16e   : > { %1609 = vst [vmem:[%s1961_s29 + $0x48] sm:$0xff] %v1524_v34   ;;  %v912_v42 = vmul.f32 %v1940_v13, %v858_v35  ;;  %v859_v43 = vmax.f32 %v723_v36, 0.0  ;;  %v938_v44 = vmul.f32 %v1940_v13, %v884_v38 }
 0x16f   : > { %1622 = vst [vmem:[%s1961_s29 + $0xb0] sm:$0xff] %v1589_v40   ;;  %v885_v45 = vmax.f32 %v827_v41, 0.0 }
 0x170   : > { %v913_v46 = vmul.f32 %v1940_v13, %v859_v43  ;;  %v992_v47 = vadd.f32 %v1945_v25, %v938_v44  ;;  %v966_v51 = vadd.f32 %v1945_v25, %v912_v42 }
 0x171   : > { %v939_v48 = vmul.f32 %v1940_v13, %v885_v45  ;;  %v727_v49 = vpop.f32.mrb[44].mxu0  ;;  %v831_v50 = vpop.f32.mrb[44].mxu1 }
 0x172   : > { %v967_v52 = vadd.f32 %v1945_v25, %v913_v46  ;;  %v728_v53 = vadd.f32 %v727_v49, %v1937_v7  ;;  %v729_v54 = vpop.f32.mrb[45].mxu0  ;;  %v832_v55 = vadd.f32 %v831_v50, %v1937_v7  ;;  %v833_v56 = vpop.f32.mrb[45].mxu1 }
 0x173   : > { %v993_v57 = vadd.f32 %v1945_v25, %v939_v48  ;;  %v730_v58 = vpop.f32.mrb[46].mxu0  ;;  %v834_v59 = vpop.f32.mrb[46].mxu1 }
 0x174   : > { %v1529_v60 = vpack.c.bf16 %v967_v52, %v966_v51  ;;  %v860_v61 = vmax.f32 %v728_v53, 0.0  ;;  %v731_v62 = vadd.f32 %v730_v58, %v1937_v7  ;;  %v732_v63 = vpop.f32.mrb[47].mxu0  ;;  %v886_v0 = vmax.f32 %v832_v55, 0.0  ;;  %v836_v1 = vpop.f32.mrb[47].mxu1 }
 0x175   : > { %v1594_v2 = vpack.c.bf16 %v993_v57, %v992_v47  ;;  %v835_v3 = vadd.f32 %v834_v59, %v1937_v7 }
 0x176   : > { %1610 = vst [vmem:[%s1961_s29 + $0x50] sm:$0xff] %v1529_v60   ;;  %v914_v4 = vmul.f32 %v1940_v13, %v860_v61  ;;  %v861_v5 = vmax.f32 %v731_v62, 0.0  ;;  %v940_v6 = vmul.f32 %v1940_v13, %v886_v0 }
 0x177   : > { %1623 = vst [vmem:[%s1961_s29 + $0xb8] sm:$0xff] %v1594_v2   ;;  %v887_v8 = vmax.f32 %v835_v3, 0.0 }
 0x178   : > { %v915_v9 = vmul.f32 %v1940_v13, %v861_v5  ;;  %v994_v10 = vadd.f32 %v1945_v25, %v940_v6  ;;  %v968_v14 = vadd.f32 %v1945_v25, %v914_v4 }
 0x179   : > { %v941_v11 = vmul.f32 %v1940_v13, %v887_v8  ;;  %v735_v12 = vpop.f32.mrb[48].mxu0 }
 0x17a   : > { %v969_v15 = vadd.f32 %v1945_v25, %v915_v9  ;;  %v736_v16 = vadd.f32 %v735_v12, %v1937_v7  ;;  %v737_v17 = vpop.f32.mrb[49].mxu0 }
 0x17b   : > { %v995_v18 = vadd.f32 %v1945_v25, %v941_v11  ;;  %v738_v19 = vpop.f32.mrb[50].mxu0 }
 0x17c   : > { %v1534_v20 = vpack.c.bf16 %v969_v15, %v968_v14  ;;  %v862_v21 = vmax.f32 %v736_v16, 0.0  ;;  %v739_v22 = vadd.f32 %v738_v19, %v1937_v7  ;;  %v740_v23 = vpop.f32.mrb[51].mxu0 }
 0x17d   : > { %v1599_v24 = vpack.c.bf16 %v995_v18, %v994_v10 }
 0x17e   : > { %1611 = vst [vmem:[%s1961_s29 + $0x58] sm:$0xff] %v1534_v20   ;;  %v916_v26 = vmul.f32 %v1940_v13, %v862_v21  ;;  %v863_v27 = vmax.f32 %v739_v22, 0.0 }
 0x17f   : > { %1624 = vst [vmem:[%s1961_s29 + $0xc0] sm:$0xff] %v1599_v24  }
 0x180   : > { %v917_v28 = vmul.f32 %v1940_v13, %v863_v27  ;;  %v970_v29 = vadd.f32 %v1945_v25, %v916_v26 }
 0x182   : > { %v971_v30 = vadd.f32 %v1945_v25, %v917_v28 }
 0x184   : > { %v1539_v31 = vpack.c.bf16 %v971_v30, %v970_v29 }
 0x186   : > { %1612 = vst [vmem:[%s1961_s29 + $0x60] sm:$0xff] %v1539_v31  }
 0x187 PF: > { %s13_s12 = sadd.s32 1, %s1765_s12  }
 0x188   : > { %p10_p4 = scmp.ge.s32.totalorder %s13_s12, 4  }
 0x18a   :  { %12 = sbr.rel (!%p10_p4) target bundleno = 1 (0x1), region = 62 }

// kernel: gaze_prediction_forward.7
= control target key start
LH: loop header
LB: loop body
LE: loop exit
PB: predicated region body
PF: predicated region fallthrough
CT: control target
= control target key end

     0   :  { %s1210_s12 = smov 0   ;;  %s1406_s0 = inlined_call_operand.vmem [shape: bf16[2,81,512], index: 0, kind: input, shape index: {}]   ;;  %s1407_s1 = inlined_call_operand.vmem [shape: bf16[512,128], index: 1, kind: input, shape index: {}]   ;;  %s1408_s2 = inlined_call_operand.vmem [shape: f32[3,128], index: 2, kind: input, shape index: {}]   ;;  %s1409_s3 = inlined_call_operand.vmem [shape: bf16[2,81,128], index: 3, kind: output, shape index: {}]  }
   0x1 LB: > { %s886_s13 = sadd.s32 4294967295, %s1188_s12   ;;  %p890_p0 = scmp.ge.s32.totalorder %s1188_s12, 1  ;;  %s1188_s12 = sphi %s1210_s12, %s13_s12  }
   0x2   : > { %p137_p1 = scmp.lt.s32.totalorder %s1188_s12, 3 }
   0x4   : > { %p138_p2 = pnand %p890_p0, %p137_p1 }
   0x5   : > { %v1116_v0 = vld [vmem:[%s1407_s1 + $0x40] sm:$0xff] (!%p138_p2)   ;;  %v1120_v4 = vld [vmem:[%s1407_s1 + $0x48] sm:$0xff] (!%p138_p2)   ;;  %v1124_v8 = vld [vmem:[%s1407_s1 + $0x50] sm:$0xff] (!%p138_p2)   ;;  %p161_p3 = scmp.lt.s32.totalorder (!%p138_p2), %s886_s13, 1  ;;  %v259_v58 = vlaneseq (!%p138_p2)  ;;  %vm825_vm0 = vcmask (!%p138_p2), 1040384  }
   0x6   : > { %141 = sbr.rel (%p138_p2) target bundleno = 308 (0x134), region = 32  ;;  %v1117_v1 = vld [vmem:[%s1407_s1 + $0xc0] sm:$0xff] (!%p138_p2)   ;;  %1002 = vmatprep.subr.bf16.mxu0 (!%p138_p2), %v1116_v0  ;;  %v1121_v5 = vld [vmem:[%s1407_s1 + $0xc8] sm:$0xff] (!%p138_p2)   ;;  %v1125_v9 = vld [vmem:[%s1407_s1 + $0xd0] sm:$0xff] (!%p138_p2)   ;;  %vm826_vm1 = vsmask.f32 (!%p138_p2), 256 }
   0x7   : > { %v1118_v2 = vld [vmem:[%s1407_s1] sm:$0xff] (!%p138_p2)   ;;  %1054 = vmatprep.subr.bf16.mxu1 (!%p138_p2), %v1117_v1  ;;  %v1122_v6 = vld [vmem:[%s1407_s1 + $0x8] sm:$0xff] (!%p138_p2)   ;;  %v1126_v10 = vld [vmem:[%s1407_s1 + $0x10] sm:$0xff] (!%p138_p2)   ;;  %v260_v59 = vshrl.u32 (!%p138_p2), %v259_v58, 7 }
   0x8   : > { %v1119_v3 = vld [vmem:[%s1407_s1 + $0x80] sm:$0xff] (!%p138_p2)   ;;  %1003 = vmatpush3.bf16.msra.mxu0 (!%p138_p2), %v1118_v2  ;;  %v1123_v7 = vld [vmem:[%s1407_s1 + $0x88] sm:$0xff] (!%p138_p2)   ;;  %v1127_v11 = vld [vmem:[%s1407_s1 + $0x90] sm:$0xff] (!%p138_p2)  }
   0x9   : > { %1055 = vmatpush3.bf16.msra.mxu1 (!%p138_p2), %v1119_v3  ;;  %1004 = vmatprep.subr.bf16.mxu0 (!%p138_p2), %v1120_v4  ;;  %v1128_v12 = vld [vmem:[%s1407_s1 + $0x58] sm:$0xff] (!%p138_p2)   ;;  %v1132_v16 = vld [vmem:[%s1407_s1 + $0x60] sm:$0xff] (!%p138_p2)   ;;  %v1136_v20 = vld [vmem:[%s1407_s1 + $0x68] sm:$0xff] (!%p138_p2)   ;;  %v261_v60 = vsub.s32 (!%p138_p2), 0, %v260_v59  ;;  %v742_v4 = vsub.s32 (!%p138_p2), 1, %v260_v59 }
   0xa   : > { %1056 = vmatprep.subr.bf16.mxu1 (!%p138_p2), %v1121_v5  ;;  %v1129_v13 = vld [vmem:[%s1407_s1 + $0xd8] sm:$0xff] (!%p138_p2)   ;;  %v1133_v17 = vld [vmem:[%s1407_s1 + $0xe0] sm:$0xff] (!%p138_p2)   ;;  %v1137_v21 = vld [vmem:[%s1407_s1 + $0xe8] sm:$0xff] (!%p138_p2)  }
   0xb   : > { %v1130_v14 = vld [vmem:[%s1407_s1 + $0x18] sm:$0xff] (!%p138_p2)   ;;  %v1134_v18 = vld [vmem:[%s1407_s1 + $0x20] sm:$0xff] (!%p138_p2)   ;;  %v1138_v22 = vld [vmem:[%s1407_s1 + $0x28] sm:$0xff] (!%p138_p2)  }
   0xc   : > { %1005 = vmatpush3.bf16.msra.mxu0 (!%p138_p2), %v1122_v6  ;;  %v1131_v15 = vld [vmem:[%s1407_s1 + $0x98] sm:$0xff] (!%p138_p2)   ;;  %v1135_v19 = vld [vmem:[%s1407_s1 + $0xa0] sm:$0xff] (!%p138_p2)   ;;  %v1139_v23 = vld [vmem:[%s1407_s1 + $0xa8] sm:$0xff] (!%p138_p2)  }
   0xd   : > { %1057 = vmatpush3.bf16.msra.mxu1 %v1123_v7  ;;  %1006 = vmatprep.subr.bf16.mxu0 %v1124_v8  ;;  %s1411_s13 = smov (!%p161_p3, %s886_s13), 1  ;;  %v1140_v24 = vld [vmem:[%s1407_s1 + $0x70] sm:$0xff]   ;;  %v1144_v28 = vld [vmem:[%s1407_s1 + $0x78] sm:$0xff]   ;;  %v172_v61 = vld [vmem:[%s1408_s2] sm:$0x7] }
   0xe   : > { %1058 = vmatprep.subr.bf16.mxu1 %v1125_v9  ;;  %v1141_v25 = vld [vmem:[%s1407_s1 + $0xf0] sm:$0xff]   ;;  %s1106_s16 = smul.u32 176, %s1411_s13  ;;  %v1145_v29 = vld [vmem:[%s1407_s1 + $0xf8] sm:$0xff]   ;;  %v1351_v63 = vrot.slane %v172_v61, %v261_v60  ;;  %vm827_vm2 = vmand %vm825_vm0, %vm826_vm1 }
   0xf   : > { %v1142_v26 = vld [vmem:[%s1407_s1 + $0x30] sm:$0xff]   ;;  %v1146_v30 = vld [vmem:[%s1407_s1 + $0x38] sm:$0xff]   ;;  %s1107_s7 = smul.u32 44, %s1411_s13 }
  0x10   : > { %1007 = vmatpush3.bf16.msra.mxu0 %v1126_v10  ;;  %v1143_v27 = vld [vmem:[%s1407_s1 + $0xb0] sm:$0xff]   ;;  %s1318_s27 = scalar_lea.vmem %s1406_s0, %s1106_s16  ;;  %v1147_v31 = vld [vmem:[%s1407_s1 + $0xb8] sm:$0xff]  }
  0x11   : > { %1059 = vmatpush3.bf16.msra.mxu1 %v1127_v11  ;;  %1008 = vmatprep.subr.bf16.mxu0 %v1128_v12  ;;  %v1148_v32 = vld [vmem:[%s1318_s27] ss:$16 sps:$4 sm:$0xff]   ;;  %v1150_v33 = vld [vmem:[%s1318_s27 + $0x4] ss:$16 sps:$4 sm:$0xff]   ;;  %v1151_v34 = vld [vmem:[%s1318_s27 + $0x8] ss:$16 sps:$4 sm:$0xff]   ;;  %s1369_s13 = scalar_lea.vmem %s1409_s3, %s1107_s7 }
  0x12   : > { %1060 = vmatprep.subr.bf16.mxu1 %v1129_v13  ;;  %v1153_v35 = vld [vmem:[%s1318_s27 + $0xc] ss:$16 sps:$4 sm:$0xff]   ;;  %601 = vmatprep.mubr.bf16.mxu0 %v1150_v33  ;;  %v1154_v36 = vld [vmem:[%s1318_s27 + $0x24] ss:$16 sps:$4 sm:$0xff]   ;;  %v1158_v38 = vld [vmem:[%s1318_s27 + $0x20] ss:$16 sps:$4 sm:$0xff]  }
  0x13   : > { %681 = vmatprep.mubr.bf16.mxu1 %v1153_v35  ;;  %v1156_v37 = vld [vmem:[%s1318_s27 + $0x2c] ss:$16 sps:$4 sm:$0xff]   ;;  %v1159_v39 = vld [vmem:[%s1318_s27 + $0x28] ss:$16 sps:$4 sm:$0xff]   ;;  %v1160_v40 = vld [vmem:[%s1318_s27 + $0x44] ss:$16 sps:$4 sm:$0xff]  }
  0x14   : > { %1009 = vmatpush3.bf16.msra.mxu0 %v1130_v14  ;;  %v1162_v41 = vld [vmem:[%s1318_s27 + $0x4c] ss:$16 sps:$4 sm:$0xff]   ;;  %v1164_v42 = vld [vmem:[%s1318_s27 + $0x40] ss:$16 sps:$4 sm:$0xff]   ;;  %v1165_v43 = vld [vmem:[%s1318_s27 + $0x48] ss:$16 sps:$4 sm:$0xff]   ;;  %v1354_v14 = vrot.slane %v172_v61, %v742_v4 }
  0x15   : > { %1061 = vmatpush3.bf16.msra.mxu1 %v1131_v15  ;;  %1010 = vmatprep.subr.bf16.mxu0 %v1132_v16  ;;  %v1166_v44 = vld [vmem:[%s1318_s27 + $0x64] ss:$16 sps:$4 sm:$0xff]   ;;  %v1168_v45 = vld [vmem:[%s1318_s27 + $0x6c] ss:$16 sps:$4 sm:$0xff]   ;;  %v1170_v46 = vld [vmem:[%s1318_s27 + $0x60] ss:$16 sps:$4 sm:$0xff]  }
  0x16   : > { %1062 = vmatprep.subr.bf16.mxu1 %v1133_v17  ;;  %v1171_v47 = vld [vmem:[%s1318_s27 + $0x68] ss:$16 sps:$4 sm:$0xff]   ;;  %v1172_v48 = vld [vmem:[%s1318_s27 + $0x84] ss:$16 sps:$4 sm:$0xff]   ;;  %v1174_v49 = vld [vmem:[%s1318_s27 + $0x8c] ss:$16 sps:$4 sm:$0xff]  }
  0x17   : > { %v193_v50 = vld [vmem:[%s1318_s27 + $0xa0] sm:$0x11]  ;;  %v194_v51 = vld [vmem:[%s1318_s27 + $0xa8] sm:$0x11]  ;;  %v757_v15 = vsub.s32 2, %v260_v59 }
  0x18   : > { %1011 = vmatpush3.bf16.msra.mxu0 %v1134_v18  ;;  %v1176_v52 = vld [vmem:[%s1318_s27 + $0x80] ss:$16 sps:$4 sm:$0xff]   ;;  %v1177_v53 = vld [vmem:[%s1318_s27 + $0x88] ss:$16 sps:$4 sm:$0xff]   ;;  %v914_v54 = vcombine.high %v193_v50, %v193_v50  ;;  %v916_v55 = vcombine.high %v194_v51, %v194_v51  ;;  %v913_v56 = vcombine.low %v193_v50, %v193_v50  ;;  %v915_v57 = vcombine.low %v194_v51, %v194_v51 }
  0x19   : > { %1063 = vmatpush3.bf16.msra.mxu1 %v1135_v19  ;;  %1012 = vmatprep.subr.bf16.mxu0 %v1136_v20 }
  0x1a   : > { %1064 = vmatprep.subr.bf16.mxu1 %v1137_v21 }
  0x1c   : > { %1013 = vmatpush3.bf16.msra.mxu0 %v1138_v22 }
  0x1d   : > { %1065 = vmatpush3.bf16.msra.mxu1 %v1139_v23  ;;  %1014 = vmatprep.subr.bf16.mxu0 %v1140_v24  ;;  %v1358_v23 = vrot.slane %v172_v61, %v757_v15 }
  0x1e   : > { %1066 = vmatprep.subr.bf16.mxu1 %v1141_v25 }
  0x20   : > { %1015 = vmatpush3.bf16.msra.mxu0 %v1142_v26 }
  0x21   : > { %1067 = vmatpush3.bf16.msra.mxu1 %v1143_v27  ;;  %1016 = vmatprep.subr.bf16.mxu0 %v1144_v28 }
  0x22   : > { %1068 = vmatprep.subr.bf16.mxu1 %v1145_v29 }
  0x24   : > { %1017 = vmatpush3.bf16.msra.mxu0 %v1146_v30 }
  0x25   : > { %1069 = vmatpush3.bf16.msra.mxu1 %v1147_v31 }
  0x27   : > { %602 = vmatmul.mubr.bf16.vlgmr.msra.gmra.mrb[0].mxu0 %v1148_v32 }
  0x28   : > { %682 = vmatmul.mubr.bf16.vlgmr.msra.gmra.mrb[0].mxu1 %v1151_v34  ;;  %609 = vmatprep.mubr.bf16.mxu0 %v1154_v36 }
  0x29   : > { %689 = vmatprep.mubr.bf16.mxu1 %v1156_v37 }
  0x2f   : > { %610 = vmatmul.mubr.bf16.gmra.mrb[4].mxu0 %v1158_v38 }
  0x30   : > { %690 = vmatmul.mubr.bf16.gmra.mrb[4].mxu1 %v1159_v39  ;;  %617 = vmatprep.mubr.bf16.mxu0 %v1160_v40 }
  0x31   : > { %697 = vmatprep.mubr.bf16.mxu1 %v1162_v41 }
  0x37   : > { %618 = vmatmul.mubr.bf16.gmra.mrb[8].mxu0 %v1164_v42 }
  0x38   : > { %698 = vmatmul.mubr.bf16.gmra.mrb[8].mxu1 %v1165_v43  ;;  %625 = vmatprep.mubr.bf16.mxu0 %v1166_v44 }
  0x39   : > { %705 = vmatprep.mubr.bf16.mxu1 %v1168_v45 }
  0x3f   : > { %626 = vmatmul.mubr.bf16.gmra.mrb[12].mxu0 %v1170_v46 }
  0x40   : > { %706 = vmatmul.mubr.bf16.gmra.mrb[12].mxu1 %v1171_v47  ;;  %633 = vmatprep.mubr.bf16.mxu0 %v1172_v48 }
  0x41   : > { %713 = vmatprep.mubr.bf16.mxu1 %v1174_v49 }
  0x47   : > { %634 = vmatmul.mubr.bf16.gmra.mrb[16].mxu0 %v1176_v52 }
  0x48   : > { %714 = vmatmul.mubr.bf16.gmra.mrb[16].mxu1 %v1177_v53  ;;  %641 = vmatprep.mubr.bf16.mxu0 %v914_v54 }
  0x49   : > { %721 = vmatprep.mubr.bf16.mxu1 %v916_v55 }
  0x4f   : > { %642 = vmatmul.mubr.bf16.gmra.mrb[20].mxu0 %v913_v56 }
  0x50   : > { %722 = vmatmul.mubr.bf16.gmra.mrb[20].mxu1 %v915_v57 }
  0xfa   : > { %v1018_v62 = vpop.f32.mrb[0].mxu0 }
  0xfb   : > { %v1070_v0 = vpop.f32.mrb[0].mxu1  ;;  %v1019_v1 = vpop.f32.mrb[1].mxu0 }
  0xfc   : > { %v1020_v2 = vadd.f32 %v1019_v1, %v1018_v62  ;;  %v1071_v3 = vpop.f32.mrb[1].mxu1  ;;  %v1021_v5 = vpop.f32.mrb[2].mxu0 }
  0xfd   : > { %v1072_v6 = vadd.f32 %v1071_v3, %v1070_v0  ;;  %v1073_v7 = vpop.f32.mrb[2].mxu1  ;;  %v1022_v8 = vpop.f32.mrb[3].mxu0 }
  0xfe   : > { %v604_v9 = vadd.f32 %v1020_v2, %v1351_v63  ;;  %v1023_v10 = vadd.f32 %v1022_v8, %v1021_v5  ;;  %v1074_v11 = vpop.f32.mrb[3].mxu1 }
  0xff   : > { %v1075_v12 = vadd.f32 %v1074_v11, %v1073_v7 }
 0x100   : > { %v684_v13 = vadd.f32 %v1072_v6, %v604_v9  ;;  %v607_v16 = vadd.f32 %v1023_v10, %v1351_v63 }
 0x102   : > { %v729_v17 = vmax.f32 %v684_v13, 0.0  ;;  %v687_v18 = vadd.f32 %v1075_v12, %v607_v16  ;;  %v1024_v19 = vpop.f32.mrb[4].mxu0 }
 0x103   : > { %v1076_v20 = vpop.f32.mrb[4].mxu1  ;;  %v1025_v21 = vpop.f32.mrb[5].mxu0 }
 0x104   : > { %v744_v22 = vmul.f32 %v1354_v14, %v729_v17  ;;  %v730_v24 = vmax.f32 %v687_v18, 0.0  ;;  %v1026_v25 = vadd.f32 %v1025_v21, %v1024_v19  ;;  %v1077_v26 = vpop.f32.mrb[5].mxu1  ;;  %v1027_v27 = vpop.f32.mrb[6].mxu0 }
 0x105   : > { %v1078_v28 = vadd.f32 %v1077_v26, %v1076_v20  ;;  %v1079_v29 = vpop.f32.mrb[6].mxu1  ;;  %v1028_v30 = vpop.f32.mrb[7].mxu0 }
 0x106   : > { %v745_v31 = vmul.f32 %v1354_v14, %v730_v24  ;;  %v612_v32 = vadd.f32 %v1026_v25, %v1351_v63  ;;  %v1029_v33 = vadd.f32 %v1028_v30, %v1027_v27  ;;  %v1080_v34 = vpop.f32.mrb[7].mxu1  ;;  %v759_v36 = vadd.f32 %v1358_v23, %v744_v22 }
 0x107   : > { %v1081_v35 = vadd.f32 %v1080_v34, %v1079_v29 }
 0x108   : > { %v760_v37 = vadd.f32 %v1358_v23, %v745_v31  ;;  %v692_v38 = vadd.f32 %v1078_v28, %v612_v32  ;;  %v615_v39 = vadd.f32 %v1029_v33, %v1351_v63 }
 0x10a   : > { %v976_v40 = vpack.c.bf16 %v760_v37, %v759_v36  ;;  %v731_v41 = vmax.f32 %v692_v38, 0.0  ;;  %v695_v42 = vadd.f32 %v1081_v35, %v615_v39  ;;  %v1030_v43 = vpop.f32.mrb[8].mxu0 }
 0x10b   : > { %v1082_v44 = vpop.f32.mrb[8].mxu1  ;;  %v1031_v45 = vpop.f32.mrb[9].mxu0 }
 0x10c   : > { %977 = vst [vmem:[%s1369_s13] sm:$0xff] %v976_v40   ;;  %v746_v46 = vmul.f32 %v1354_v14, %v731_v41  ;;  %v732_v47 = vmax.f32 %v695_v42, 0.0  ;;  %v1032_v48 = vadd.f32 %v1031_v45, %v1030_v43  ;;  %v1083_v49 = vpop.f32.mrb[9].mxu1  ;;  %v1033_v50 = vpop.f32.mrb[10].mxu0 }
 0x10d   : > { %v1084_v51 = vadd.f32 %v1083_v49, %v1082_v44  ;;  %v1085_v52 = vpop.f32.mrb[10].mxu1  ;;  %v1034_v53 = vpop.f32.mrb[11].mxu0 }
 0x10e   : > { %v747_v54 = vmul.f32 %v1354_v14, %v732_v47  ;;  %v620_v55 = vadd.f32 %v1032_v48, %v1351_v63  ;;  %v1035_v56 = vadd.f32 %v1034_v53, %v1033_v50  ;;  %v1086_v57 = vpop.f32.mrb[11].mxu1  ;;  %v761_v59 = vadd.f32 %v1358_v23, %v746_v46 }
 0x10f   : > { %v1087_v58 = vadd.f32 %v1086_v57, %v1085_v52 }
 0x110   : > { %v762_v60 = vadd.f32 %v1358_v23, %v747_v54  ;;  %v700_v61 = vadd.f32 %v1084_v51, %v620_v55  ;;  %v623_v62 = vadd.f32 %v1035_v56, %v1351_v63 }
 0x112   : > { %v981_v0 = vpack.c.bf16 %v762_v60, %v761_v59  ;;  %v733_v1 = vmax.f32 %v700_v61, 0.0  ;;  %v703_v2 = vadd.f32 %v1087_v58, %v623_v62  ;;  %v1036_v3 = vpop.f32.mrb[12].mxu0 }
 0x113   : > { %v1088_v4 = vpop.f32.mrb[12].mxu1  ;;  %v1037_v5 = vpop.f32.mrb[13].mxu0 }
 0x114   : > { %998 = vst [vmem:[%s1369_s13 + $0x8] sm:$0xff] %v981_v0   ;;  %v748_v6 = vmul.f32 %v1354_v14, %v733_v1  ;;  %v734_v7 = vmax.f32 %v703_v2, 0.0  ;;  %v1038_v8 = vadd.f32 %v1037_v5, %v1036_v3  ;;  %v1089_v9 = vpop.f32.mrb[13].mxu1  ;;  %v1039_v10 = vpop.f32.mrb[14].mxu0 }
 0x115   : > { %v1090_v11 = vadd.f32 %v1089_v9, %v1088_v4  ;;  %v1091_v12 = vpop.f32.mrb[14].mxu1  ;;  %v1040_v13 = vpop.f32.mrb[15].mxu0  ;;  %v828_v9 = vld [vmem:[%s1369_s13 + $0x28] sm:$0x1] }
 0x116   : > { %v749_v15 = vmul.f32 %v1354_v14, %v734_v7  ;;  %v628_v16 = vadd.f32 %v1038_v8, %v1351_v63  ;;  %v1041_v17 = vadd.f32 %v1040_v13, %v1039_v10  ;;  %v1092_v18 = vpop.f32.mrb[15].mxu1  ;;  %v763_v20 = vadd.f32 %v1358_v23, %v748_v6 }
 0x117   : > { %v1093_v19 = vadd.f32 %v1092_v18, %v1091_v12 }
 0x118   : > { %v764_v21 = vadd.f32 %v1358_v23, %v749_v15  ;;  %v708_v22 = vadd.f32 %v1090_v11, %v628_v16  ;;  %v631_v24 = vadd.f32 %v1041_v17, %v1351_v63 }
 0x11a   : > { %v986_v25 = vpack.c.bf16 %v764_v21, %v763_v20  ;;  %v735_v26 = vmax.f32 %v708_v22, 0.0  ;;  %v711_v27 = vadd.f32 %v1093_v19, %v631_v24  ;;  %v1042_v28 = vpop.f32.mrb[16].mxu0 }
 0x11b   : > { %v1094_v29 = vpop.f32.mrb[16].mxu1  ;;  %v1043_v30 = vpop.f32.mrb[17].mxu0 }
 0x11c   : > { %999 = vst [vmem:[%s1369_s13 + $0x10] sm:$0xff] %v986_v25   ;;  %v750_v31 = vmul.f32 %v1354_v14, %v735_v26  ;;  %v736_v32 = vmax.f32 %v711_v27, 0.0  ;;  %v1044_v33 = vadd.f32 %v1043_v30, %v1042_v28  ;;  %v1095_v34 = vpop.f32.mrb[17].mxu1  ;;  %v1045_v35 = vpop.f32.mrb[18].mxu0 }
 0x11d   : > { %v1096_v36 = vadd.f32 %v1095_v34, %v1094_v29  ;;  %v1097_v37 = vpop.f32.mrb[18].mxu1  ;;  %v1046_v38 = vpop.f32.mrb[19].mxu0 }
 0x11e   : > { %v751_v39 = vmul.f32 %v1354_v14, %v736_v32  ;;  %v636_v40 = vadd.f32 %v1044_v33, %v1351_v63  ;;  %v1047_v41 = vadd.f32 %v1046_v38, %v1045_v35  ;;  %v1098_v42 = vpop.f32.mrb[19].mxu1  ;;  %v765_v44 = vadd.f32 %v1358_v23, %v750_v31 }
 0x11f   : > { %v1099_v43 = vadd.f32 %v1098_v42, %v1097_v37 }
 0x120   : > { %v766_v45 = vadd.f32 %v1358_v23, %v751_v39  ;;  %v716_v46 = vadd.f32 %v1096_v36, %v636_v40  ;;  %v639_v47 = vadd.f32 %v1047_v41, %v1351_v63 }
 0x122   : > { %v991_v48 = vpack.c.bf16 %v766_v45, %v765_v44  ;;  %v737_v49 = vmax.f32 %v716_v46, 0.0  ;;  %v719_v50 = vadd.f32 %v1099_v43, %v639_v47  ;;  %v1048_v51 = vpop.f32.mrb[20].mxu0 }
 0x123   : > { %v1100_v52 = vpop.f32.mrb[20].mxu1  ;;  %v1049_v53 = vpop.f32.mrb[21].mxu0 }
 0x124   : > { %1000 = vst [vmem:[%s1369_s13 + $0x18] sm:$0xff] %v991_v48   ;;  %v752_v54 = vmul.f32 %v1354_v14, %v737_v49  ;;  %v738_v55 = vmax.f32 %v719_v50, 0.0  ;;  %v1050_v56 = vadd.f32 %v1049_v53, %v1048_v51  ;;  %v1101_v57 = vpop.f32.mrb[21].mxu1  ;;  %v1051_v58 = vpop.f32.mrb[22].mxu0 }
 0x125   : > { %v1102_v59 = vadd.f32 %v1101_v57, %v1100_v52  ;;  %v1103_v60 = vpop.f32.mrb[22].mxu1  ;;  %v1052_v61 = vpop.f32.mrb[23].mxu0 }
 0x126   : > { %v753_v62 = vmul.f32 %v1354_v14, %v738_v55  ;;  %v644_v0 = vadd.f32 %v1050_v56, %v1351_v63  ;;  %v1104_v1 = vpop.f32.mrb[23].mxu1  ;;  %v767_v2 = vadd.f32 %v1358_v23, %v752_v54 }
 0x128   : > { %v768_v3 = vadd.f32 %v1358_v23, %v753_v62  ;;  %v724_v4 = vadd.f32 %v1102_v59, %v644_v0 }
 0x12a   : > { %v996_v5 = vpack.c.bf16 %v768_v3, %v767_v2  ;;  %v739_v6 = vmax.f32 %v724_v4, 0.0 }
 0x12c   : > { %1001 = vst [vmem:[%s1369_s13 + $0x20] sm:$0xff] %v996_v5   ;;  %v754_v7 = vmul.f32 %v1354_v14, %v739_v6 }
 0x12e   : > { %v769_v8 = vadd.f32 %v1358_v23, %v754_v7 }
 0x130   : > { %v972_v10 = vpack.c.bf16 %v769_v8, %v769_v8 }
 0x132   : > { %v829_v63 = vsel %vm827_vm2, %v972_v10, %v828_v9 }
 0x133   : > { %830 = vst [vmem:[%s1369_s13 + $0x28] sm:$0x1] %v829_v63 }
 0x134 PF: > { %s13_s12 = sadd.s32 1, %s1188_s12  }
 0x135   : > { %p10_p4 = scmp.ge.s32.totalorder %s13_s12, 4  }
 0x137   :  { %12 = sbr.rel (!%p10_p4) target bundleno = 1 (0x1), region = 62 }

// kernel: gaze_prediction_forward.8
= control target key start
LH: loop header
LB: loop body
LE: loop exit
PB: predicated region body
PF: predicated region fallthrough
CT: control target
= control target key end

     0   :  { %s1267_s12 = smov 0   ;;  %s1449_s0 = inlined_call_operand.vmem [shape: bf16[2,49,640], index: 0, kind: input, shape index: {}]   ;;  %s1450_s1 = inlined_call_operand.vmem [shape: bf16[640,128], index: 1, kind: input, shape index: {}]   ;;  %s1451_s2 = inlined_call_operand.vmem [shape: f32[3,128], index: 2, kind: input, shape index: {}]   ;;  %s1452_s3 = inlined_call_operand.vmem [shape: bf16[2,49,128], index: 3, kind: output, shape index: {}]  }
   0x1 LB: > { %s931_s13 = sadd.s32 4294967295, %s1245_s12   ;;  %p935_p0 = scmp.ge.s32.totalorder %s1245_s12, 1  ;;  %s1245_s12 = sphi %s1267_s12, %s13_s12  }
   0x2   : > { %p137_p1 = scmp.lt.s32.totalorder %s1245_s12, 3 }
   0x4   : > { %p138_p2 = pnand %p935_p0, %p137_p1 }
   0x5   : > { %v1173_v0 = vld [vmem:[%s1450_s1 + $0x40] sm:$0xff] (!%p138_p2)   ;;  %v1177_v4 = vld [vmem:[%s1450_s1 + $0x48] sm:$0xff] (!%p138_p2)   ;;  %v1181_v8 = vld [vmem:[%s1450_s1 + $0x50] sm:$0xff] (!%p138_p2)   ;;  %p161_p3 = scmp.lt.s32.totalorder (!%p138_p2), %s931_s13, 1  ;;  %v274_v62 = vlaneseq (!%p138_p2)  ;;  %vm870_vm0 = vcmask (!%p138_p2), 1040384  }
   0x6   : > { %141 = sbr.rel (%p138_p2) target bundleno = 299 (0x12b), region = 32  ;;  %v1174_v1 = vld [vmem:[%s1450_s1 + $0xc0] sm:$0xff] (!%p138_p2)   ;;  %1031 = vmatprep.subr.bf16.mxu0 (!%p138_p2), %v1173_v0  ;;  %v1178_v5 = vld [vmem:[%s1450_s1 + $0xc8] sm:$0xff] (!%p138_p2)   ;;  %v1182_v9 = vld [vmem:[%s1450_s1 + $0xd0] sm:$0xff] (!%p138_p2)   ;;  %vm871_vm1 = vsmask.f32 (!%p138_p2), 256 }
   0x7   : > { %v1175_v2 = vld [vmem:[%s1450_s1] sm:$0xff] (!%p138_p2)   ;;  %1071 = vmatprep.subr.bf16.mxu1 (!%p138_p2), %v1174_v1  ;;  %v1179_v6 = vld [vmem:[%s1450_s1 + $0x8] sm:$0xff] (!%p138_p2)   ;;  %v1183_v10 = vld [vmem:[%s1450_s1 + $0x10] sm:$0xff] (!%p138_p2)   ;;  %v1425_v63 = vshrl.u32 (!%p138_p2), %v274_v62, 7 }
   0x8   : > { %v1176_v3 = vld [vmem:[%s1450_s1 + $0x80] sm:$0xff] (!%p138_p2)   ;;  %1032 = vmatpush3.bf16.msra.mxu0 (!%p138_p2), %v1175_v2  ;;  %v1180_v7 = vld [vmem:[%s1450_s1 + $0x88] sm:$0xff] (!%p138_p2)   ;;  %v1184_v11 = vld [vmem:[%s1450_s1 + $0x90] sm:$0xff] (!%p138_p2)  }
   0x9   : > { %1072 = vmatpush3.bf16.msra.mxu1 (!%p138_p2), %v1176_v3  ;;  %1033 = vmatprep.subr.bf16.mxu0 (!%p138_p2), %v1177_v4  ;;  %v1185_v12 = vld [vmem:[%s1450_s1 + $0x58] sm:$0xff] (!%p138_p2)   ;;  %v1189_v16 = vld [vmem:[%s1450_s1 + $0x60] sm:$0xff] (!%p138_p2)   ;;  %v1193_v20 = vld [vmem:[%s1450_s1 + $0x68] sm:$0xff] (!%p138_p2)   ;;  %v276_v0 = vsub.s32 (!%p138_p2), 0, %v1425_v63  ;;  %v815_v62 = vsub.s32 (!%p138_p2), 1, %v1425_v63 }
   0xa   : > { %1073 = vmatprep.subr.bf16.mxu1 (!%p138_p2), %v1178_v5  ;;  %v1186_v13 = vld [vmem:[%s1450_s1 + $0xd8] sm:$0xff] (!%p138_p2)   ;;  %v1190_v17 = vld [vmem:[%s1450_s1 + $0xe0] sm:$0xff] (!%p138_p2)   ;;  %v1194_v21 = vld [vmem:[%s1450_s1 + $0xe8] sm:$0xff] (!%p138_p2)  }
   0xb   : > { %v1187_v14 = vld [vmem:[%s1450_s1 + $0x18] sm:$0xff] (!%p138_p2)   ;;  %v1191_v18 = vld [vmem:[%s1450_s1 + $0x20] sm:$0xff] (!%p138_p2)   ;;  %v1195_v22 = vld [vmem:[%s1450_s1 + $0x28] sm:$0xff] (!%p138_p2)  }
   0xc   : > { %1034 = vmatpush3.bf16.msra.mxu0 (!%p138_p2), %v1179_v6  ;;  %v1188_v15 = vld [vmem:[%s1450_s1 + $0x98] sm:$0xff] (!%p138_p2)   ;;  %v1192_v19 = vld [vmem:[%s1450_s1 + $0xa0] sm:$0xff] (!%p138_p2)   ;;  %v1196_v23 = vld [vmem:[%s1450_s1 + $0xa8] sm:$0xff] (!%p138_p2)  }
   0xd   : > { %1074 = vmatpush3.bf16.msra.mxu1 %v1180_v7  ;;  %1035 = vmatprep.subr.bf16.mxu0 %v1181_v8  ;;  %s1454_s13 = smov (!%p161_p3, %s931_s13), 1  ;;  %v1197_v24 = vld [vmem:[%s1450_s1 + $0x70] sm:$0xff]   ;;  %v1201_v28 = vld [vmem:[%s1450_s1 + $0x78] sm:$0xff]   ;;  %v1211_v36 = vld [vmem:[%s1450_s1 + $0x100] sm:$0xff]  }
   0xe   : > { %1075 = vmatprep.subr.bf16.mxu1 %v1182_v9  ;;  %v1198_v25 = vld [vmem:[%s1450_s1 + $0xf0] sm:$0xff]   ;;  %s1163_s16 = smul.u32 140, %s1454_s13  ;;  %v1202_v29 = vld [vmem:[%s1450_s1 + $0xf8] sm:$0xff]   ;;  %v1212_v37 = vld [vmem:[%s1450_s1 + $0x108] sm:$0xff]  }
   0xf   : > { %v1199_v26 = vld [vmem:[%s1450_s1 + $0x30] sm:$0xff]   ;;  %v1203_v30 = vld [vmem:[%s1450_s1 + $0x38] sm:$0xff]   ;;  %v1227_v46 = vld [vmem:[%s1450_s1 + $0x120] sm:$0xff]   ;;  %s1164_s25 = smul.u32 28, %s1454_s13 }
  0x10   : > { %1036 = vmatpush3.bf16.msra.mxu0 %v1183_v10  ;;  %v1200_v27 = vld [vmem:[%s1450_s1 + $0xb0] sm:$0xff]   ;;  %s1375_s27 = scalar_lea.vmem %s1449_s0, %s1163_s16  ;;  %v1204_v31 = vld [vmem:[%s1450_s1 + $0xb8] sm:$0xff]   ;;  %v1228_v53 = vld [vmem:[%s1450_s1 + $0x128] sm:$0xff]  }
  0x11   : > { %1076 = vmatpush3.bf16.msra.mxu1 %v1184_v11  ;;  %1037 = vmatprep.subr.bf16.mxu0 %v1185_v12  ;;  %v1205_v32 = vld [vmem:[%s1375_s27] ss:$20 sps:$4 sm:$0xff]   ;;  %v1207_v33 = vld [vmem:[%s1375_s27 + $0x4] ss:$20 sps:$4 sm:$0xff]   ;;  %v1208_v34 = vld [vmem:[%s1375_s27 + $0x8] ss:$20 sps:$4 sm:$0xff]  }
  0x12   : > { %1077 = vmatprep.subr.bf16.mxu1 %v1186_v13  ;;  %v1210_v35 = vld [vmem:[%s1375_s27 + $0xc] ss:$20 sps:$4 sm:$0xff]   ;;  %646 = vmatprep.mubr.bf16.mxu0 %v1207_v33  ;;  %v1215_v39 = vld [vmem:[%s1375_s27 + $0x34] ss:$20 sps:$4 sm:$0xff]   ;;  %v1218_v42 = vld [vmem:[%s1375_s27 + $0x30] ss:$20 sps:$4 sm:$0xff]  }
  0x13   : > { %710 = vmatprep.mubr.bf16.mxu1 %v1210_v35  ;;  %v1213_v38 = vld [vmem:[%s1375_s27 + $0x2c] ss:$20 sps:$4 sm:$0xff]   ;;  %v1217_v40 = vld [vmem:[%s1375_s27 + $0x28] ss:$20 sps:$4 sm:$0xff]   ;;  %v1219_v41 = vld [vmem:[%s1450_s1 + $0x110] sm:$0xff]  }
  0x14   : > { %1038 = vmatpush3.bf16.msra.mxu0 %v1187_v14  ;;  %v1221_v43 = vld [vmem:[%s1375_s27 + $0x54] ss:$20 sps:$4 sm:$0xff]   ;;  %v1220_v44 = vld [vmem:[%s1450_s1 + $0x118] sm:$0xff]   ;;  %v192_v48 = vld [vmem:[%s1375_s27 + $0x80] sm:$0x11] }
  0x15   : > { %1078 = vmatpush3.bf16.msra.mxu1 %v1188_v15  ;;  %1039 = vmatprep.subr.bf16.mxu0 %v1189_v16  ;;  %v1223_v45 = vld [vmem:[%s1375_s27 + $0x5c] ss:$20 sps:$4 sm:$0xff]   ;;  %v1226_v50 = vld [vmem:[%s1375_s27 + $0x58] ss:$20 sps:$4 sm:$0xff]   ;;  %v956_v52 = vcombine.high %v192_v48, %v192_v48  ;;  %v955_v56 = vcombine.low %v192_v48, %v192_v48  ;;  %v1236_v58 = vld [vmem:[%s1375_s27 + $0x60] ss:$20 sps:$4 sm:$0xff]  }
  0x16   : > { %1079 = vmatprep.subr.bf16.mxu1 %v1190_v17  ;;  %v191_v47 = vld [vmem:[%s1375_s27 + $0x78] sm:$0x11]  ;;  %v1225_v49 = vld [vmem:[%s1375_s27 + $0x50] ss:$20 sps:$4 sm:$0xff]   ;;  %v1431_v1 = vld [vmem:[%s1451_s2] sm:$0x7] }
  0x17   : > { %v954_v51 = vcombine.high %v191_v47, %v191_v47  ;;  %v1233_v54 = vld [vmem:[%s1450_s1 + $0x130] sm:$0xff]   ;;  %v953_v55 = vcombine.low %v191_v47, %v191_v47  ;;  %v1234_v59 = vld [vmem:[%s1450_s1 + $0x138] sm:$0xff]   ;;  %v1238_v61 = vld [vmem:[%s1375_s27 + $0x88] ss:$0 sps:$4 sm:$0x11]   ;;  %v277_v3 = vrot.slane %v1431_v1, %v276_v0 }
  0x18   : > { %1040 = vmatpush3.bf16.msra.mxu0 %v1191_v18  ;;  %v1235_v57 = vld [vmem:[%s1375_s27 + $0x10] ss:$20 sps:$4 sm:$0xff]   ;;  %v1237_v60 = vld [vmem:[%s1375_s27 + $0x38] ss:$20 sps:$4 sm:$0xff]   ;;  %s170_s27 = scalar_lea.vmem %s1452_s3, %s1164_s25  ;;  %vm872_vm2 = vmand %vm870_vm0, %vm871_vm1 }
  0x19   : > { %1080 = vmatpush3.bf16.msra.mxu1 %v1192_v19  ;;  %1041 = vmatprep.subr.bf16.mxu0 %v1193_v20 }
  0x1a   : > { %1081 = vmatprep.subr.bf16.mxu1 %v1194_v21 }
  0x1c   : > { %1042 = vmatpush3.bf16.msra.mxu0 %v1195_v22 }
  0x1d   : > { %1082 = vmatpush3.bf16.msra.mxu1 %v1196_v23  ;;  %1043 = vmatprep.subr.bf16.mxu0 %v1197_v24 }
  0x1e   : > { %1083 = vmatprep.subr.bf16.mxu1 %v1198_v25 }
  0x20   : > { %1044 = vmatpush3.bf16.msra.mxu0 %v1199_v26 }
  0x21   : > { %1084 = vmatpush3.bf16.msra.mxu1 %v1200_v27  ;;  %1045 = vmatprep.subr.bf16.mxu0 %v1201_v28 }
  0x22   : > { %1085 = vmatprep.subr.bf16.mxu1 %v1202_v29 }
  0x24   : > { %1046 = vmatpush3.bf16.msra.mxu0 %v1203_v30 }
  0x25   : > { %1086 = vmatpush3.bf16.msra.mxu1 %v1204_v31  ;;  %1123 = vmatprep.subr.bf16.mxu0 %v1211_v36 }
  0x26   : > { %1147 = vmatprep.subr.bf16.mxu1 %v1211_v36 }
  0x27   : > { %647 = vmatmul.mubr.bf16.vlgmr.msra.gmra.mrb[0].mxu0 %v1205_v32 }
  0x28   : > { %711 = vmatmul.mubr.bf16.vlgmr.msra.gmra.mrb[0].mxu1 %v1208_v34  ;;  %1124 = vmatpush3.bf16.msra.mxu0 %v1211_v36 }
  0x29   : > { %1155 = vmatpush3.bf16.msra.mxu1 %v1211_v36  ;;  %1125 = vmatprep.subr.bf16.mxu0 %v1212_v37 }
  0x2a   : > { %1148 = vmatprep.subr.bf16.mxu1 %v1212_v37  ;;  %654 = vmatprep.mubr.bf16.mxu0 %v1213_v38 }
  0x2b   : > { %718 = vmatprep.mubr.bf16.mxu1 %v1215_v39 }
  0x2c   : > { %1126 = vmatpush3.bf16.msra.mxu0 %v1212_v37 }
  0x2d   : > { %1156 = vmatpush3.bf16.msra.mxu1 %v1212_v37  ;;  %1127 = vmatprep.subr.bf16.mxu0 %v1219_v41 }
  0x2e   : > { %1149 = vmatprep.subr.bf16.mxu1 %v1219_v41 }
  0x2f   : > { %655 = vmatmul.mubr.bf16.gmra.mrb[4].mxu0 %v1217_v40 }
  0x30   : > { %719 = vmatmul.mubr.bf16.gmra.mrb[4].mxu1 %v1218_v42  ;;  %662 = vmatprep.mubr.bf16.mxu0 %v1221_v43 }
  0x31   : > { %1128 = vmatpush3.bf16.msra.mxu0 %v1219_v41  ;;  %726 = vmatprep.mubr.bf16.mxu1 %v1223_v45 }
  0x32   : > { %1157 = vmatpush3.bf16.msra.mxu1 %v1219_v41  ;;  %1129 = vmatprep.subr.bf16.mxu0 %v1220_v44 }
  0x33   : > { %1150 = vmatprep.subr.bf16.mxu1 %v1220_v44 }
  0x35   : > { %1130 = vmatpush3.bf16.msra.mxu0 %v1220_v44 }
  0x36   : > { %1158 = vmatpush3.bf16.msra.mxu1 %v1220_v44  ;;  %1131 = vmatprep.subr.bf16.mxu0 %v1227_v46 }
  0x37   : > { %663 = vmatmul.mubr.bf16.gmra.mrb[8].mxu0 %v1225_v49  ;;  %1151 = vmatprep.subr.bf16.mxu1 %v1227_v46 }
  0x38   : > { %727 = vmatmul.mubr.bf16.gmra.mrb[8].mxu1 %v1226_v50  ;;  %670 = vmatprep.mubr.bf16.mxu0 %v954_v51 }
  0x39   : > { %1132 = vmatpush3.bf16.msra.mxu0 %v1227_v46  ;;  %734 = vmatprep.mubr.bf16.mxu1 %v956_v52 }
  0x3a   : > { %1159 = vmatpush3.bf16.msra.mxu1 %v1227_v46  ;;  %1133 = vmatprep.subr.bf16.mxu0 %v1228_v53 }
  0x3b   : > { %1152 = vmatprep.subr.bf16.mxu1 %v1228_v53 }
  0x3d   : > { %1134 = vmatpush3.bf16.msra.mxu0 %v1228_v53 }
  0x3e   : > { %1160 = vmatpush3.bf16.msra.mxu1 %v1228_v53  ;;  %1135 = vmatprep.subr.bf16.mxu0 %v1233_v54 }
  0x3f   : > { %671 = vmatmul.mubr.bf16.gmra.mrb[12].mxu0 %v953_v55  ;;  %1153 = vmatprep.subr.bf16.mxu1 %v1233_v54 }
  0x40   : > { %735 = vmatmul.mubr.bf16.gmra.mrb[12].mxu1 %v955_v56  ;;  %1139 = vmatprep.mubr.bf16.mxu0 %v1235_v57 }
  0x41   : > { %1136 = vmatpush3.bf16.msra.mxu0 %v1233_v54  ;;  %1143 = vmatprep.mubr.bf16.mxu1 %v1236_v58 }
  0x42   : > { %1161 = vmatpush3.bf16.msra.mxu1 %v1233_v54  ;;  %1137 = vmatprep.subr.bf16.mxu0 %v1234_v59 }
  0x43   : > { %1154 = vmatprep.subr.bf16.mxu1 %v1234_v59 }
  0x45   : > { %1138 = vmatpush3.bf16.msra.mxu0 %v1234_v59 }
  0x46   : > { %1162 = vmatpush3.bf16.msra.mxu1 %v1234_v59 }
  0x48   : > { %1140 = vmatmul.mubr.bf16.vlgmr.msra.gmra.mrb[16].mxu0 %v1237_v60 }
  0x49   : > { %1144 = vmatmul.mubr.bf16.vlgmr.msra.gmra.mrb[16].mxu1 %v1238_v61 }
  0xfa   : > { %v1047_v2 = vpop.f32.mrb[0].mxu0 }
  0xfb   : > { %v1087_v4 = vpop.f32.mrb[0].mxu1  ;;  %v1048_v5 = vpop.f32.mrb[1].mxu0 }
  0xfc   : > { %v1049_v6 = vadd.f32 %v1048_v5, %v1047_v2  ;;  %v1088_v7 = vpop.f32.mrb[1].mxu1  ;;  %v1050_v8 = vpop.f32.mrb[2].mxu0  ;;  %v826_v2 = vsub.s32 2, %v1425_v63 }
  0xfd   : > { %v1089_v9 = vadd.f32 %v1088_v7, %v1087_v4  ;;  %v1090_v10 = vpop.f32.mrb[2].mxu1  ;;  %v1051_v11 = vpop.f32.mrb[3].mxu0 }
  0xfe   : > { %v649_v12 = vadd.f32 %v1049_v6, %v277_v3  ;;  %v1052_v13 = vadd.f32 %v1051_v11, %v1050_v8  ;;  %v1091_v14 = vpop.f32.mrb[3].mxu1  ;;  %v816_v6 = vrot.slane %v1431_v1, %v815_v62 }
  0xff   : > { %v1092_v15 = vadd.f32 %v1091_v14, %v1090_v10 }
 0x100   : > { %v652_v16 = vadd.f32 %v1052_v13, %v277_v3  ;;  %v713_v17 = vadd.f32 %v1089_v9, %v649_v12 }
 0x102   : > { %v1053_v18 = vpop.f32.mrb[4].mxu0  ;;  %v1434_v19 = vadd.f32 %v1092_v15, %v652_v16 }
 0x103   : > { %v1093_v20 = vpop.f32.mrb[4].mxu1  ;;  %v1054_v21 = vpop.f32.mrb[5].mxu0 }
 0x104   : > { %v1055_v22 = vadd.f32 %v1054_v21, %v1053_v18  ;;  %v1094_v23 = vpop.f32.mrb[5].mxu1  ;;  %v1056_v24 = vpop.f32.mrb[6].mxu0 }
 0x105   : > { %v1095_v25 = vadd.f32 %v1094_v23, %v1093_v20  ;;  %v1096_v26 = vpop.f32.mrb[6].mxu1  ;;  %v1057_v27 = vpop.f32.mrb[7].mxu0 }
 0x106   : > { %v657_v28 = vadd.f32 %v1055_v22, %v277_v3  ;;  %v1058_v29 = vadd.f32 %v1057_v27, %v1056_v24  ;;  %v1097_v30 = vpop.f32.mrb[7].mxu1 }
 0x107   : > { %v1098_v31 = vadd.f32 %v1097_v30, %v1096_v26 }
 0x108   : > { %v660_v32 = vadd.f32 %v1058_v29, %v277_v3  ;;  %v721_v33 = vadd.f32 %v1095_v25, %v657_v28 }
 0x10a   : > { %v1059_v34 = vpop.f32.mrb[8].mxu0  ;;  %v724_v35 = vadd.f32 %v1098_v31, %v660_v32 }
 0x10b   : > { %v1099_v36 = vpop.f32.mrb[8].mxu1  ;;  %v1060_v37 = vpop.f32.mrb[9].mxu0 }
 0x10c   : > { %v1061_v38 = vadd.f32 %v1060_v37, %v1059_v34  ;;  %v1100_v39 = vpop.f32.mrb[9].mxu1  ;;  %v1062_v40 = vpop.f32.mrb[10].mxu0 }
 0x10d   : > { %v1101_v41 = vadd.f32 %v1100_v39, %v1099_v36  ;;  %v1102_v42 = vpop.f32.mrb[10].mxu1  ;;  %v1063_v43 = vpop.f32.mrb[11].mxu0 }
 0x10e   : > { %v665_v44 = vadd.f32 %v1061_v38, %v277_v3  ;;  %v1064_v45 = vadd.f32 %v1063_v43, %v1062_v40  ;;  %v1103_v46 = vpop.f32.mrb[11].mxu1 }
 0x10f   : > { %v1104_v47 = vadd.f32 %v1103_v46, %v1102_v42 }
 0x110   : > { %v668_v48 = vadd.f32 %v1064_v45, %v277_v3  ;;  %v729_v49 = vadd.f32 %v1101_v41, %v665_v44 }
 0x112   : > { %v1065_v50 = vpop.f32.mrb[12].mxu0  ;;  %v732_v51 = vadd.f32 %v1104_v47, %v668_v48 }
 0x113   : > { %v1105_v52 = vpop.f32.mrb[12].mxu1  ;;  %v1066_v53 = vpop.f32.mrb[13].mxu0 }
 0x114   : > { %v1067_v54 = vadd.f32 %v1066_v53, %v1065_v50  ;;  %v1106_v55 = vpop.f32.mrb[13].mxu1  ;;  %v1068_v56 = vpop.f32.mrb[14].mxu0 }
 0x115   : > { %v1107_v57 = vadd.f32 %v1106_v55, %v1105_v52  ;;  %v1108_v58 = vpop.f32.mrb[14].mxu1  ;;  %v1069_v59 = vpop.f32.mrb[15].mxu0 }
 0x116   : > { %v673_v60 = vadd.f32 %v1067_v54, %v277_v3  ;;  %v1109_v61 = vpop.f32.mrb[15].mxu1  ;;  %v827_v3 = vrot.slane %v1431_v1, %v826_v2 }
 0x118   : > { %v737_v0 = vadd.f32 %v1107_v57, %v673_v60 }
 0x11b   : > { %v1141_v4 = vpop.f32.mrb[16].mxu0 }
 0x11c   : > { %v785_v5 = vadd.f32 %v1141_v4, %v721_v33  ;;  %v1145_v7 = vpop.f32.mrb[16].mxu1  ;;  %v776_v8 = vpop.f32.mrb[17].mxu0 }
 0x11d   : > { %v801_v9 = vadd.f32 %v1145_v7, %v737_v0  ;;  %v777_v10 = vadd.f32 %v776_v8, %v713_v17  ;;  %v792_v11 = vpop.f32.mrb[17].mxu1  ;;  %v1142_v12 = vpop.f32.mrb[18].mxu0 }
 0x11e   : > { %v808_v13 = vmax.f32 %v785_v5, 0.0  ;;  %v793_v14 = vadd.f32 %v792_v11, %v729_v49  ;;  %v788_v15 = vadd.f32 %v1142_v12, %v724_v35  ;;  %v1146_v16 = vpop.f32.mrb[18].mxu1  ;;  %v779_v18 = vpop.f32.mrb[19].mxu0 }
 0x11f   : > { %v812_v20 = vmax.f32 %v801_v9, 0.0  ;;  %v806_v63 = vmax.f32 %v777_v10, 0.0  ;;  %v780_v21 = vadd.f32 %v779_v18, %v1434_v19  ;;  %v795_v22 = vpop.f32.mrb[19].mxu1  ;;  %v873_v19 = vld [vmem:[%s170_s27 + $0x18] sm:$0x1] }
 0x120   : > { %v819_v23 = vmul.f32 %v816_v6, %v808_v13  ;;  %v810_v24 = vmax.f32 %v793_v14, 0.0  ;;  %v809_v25 = vmax.f32 %v788_v15, 0.0  ;;  %v796_v26 = vadd.f32 %v795_v22, %v732_v51 }
 0x121   : > { %v823_v17 = vmul.f32 %v816_v6, %v812_v20  ;;  %v817_v1 = vmul.f32 %v816_v6, %v806_v63  ;;  %v807_v27 = vmax.f32 %v780_v21, 0.0 }
 0x122   : > { %v821_v28 = vmul.f32 %v816_v6, %v810_v24  ;;  %v820_v29 = vmul.f32 %v816_v6, %v809_v25  ;;  %v811_v30 = vmax.f32 %v796_v26, 0.0  ;;  %v830_v33 = vadd.f32 %v827_v3, %v819_v23 }
 0x123   : > { %v834_v31 = vadd.f32 %v827_v3, %v823_v17  ;;  %v818_v32 = vmul.f32 %v816_v6, %v807_v27  ;;  %v828_v37 = vadd.f32 %v827_v3, %v817_v1 }
 0x124   : > { %v831_v34 = vadd.f32 %v827_v3, %v820_v29  ;;  %v822_v35 = vmul.f32 %v816_v6, %v811_v30  ;;  %v832_v39 = vadd.f32 %v827_v3, %v821_v28 }
 0x125   : > { %v1013_v36 = vpack.c.bf16 %v834_v31, %v834_v31  ;;  %v829_v38 = vadd.f32 %v827_v3, %v818_v32 }
 0x126   : > { %v1022_v40 = vpack.c.bf16 %v831_v34, %v830_v33  ;;  %v833_v41 = vadd.f32 %v827_v3, %v822_v35 }
 0x127   : > { %v874_v42 = vsel %vm872_vm2, %v1013_v36, %v873_v19  ;;  %v1017_v43 = vpack.c.bf16 %v829_v38, %v828_v37 }
 0x128   : > { %875 = vst [vmem:[%s170_s27 + $0x18] sm:$0x1] %v874_v42  ;;  %1029 = vst [vmem:[%s170_s27 + $0x8] sm:$0xff] %v1022_v40   ;;  %v1027_v44 = vpack.c.bf16 %v833_v41, %v832_v39 }
 0x129   : > { %1018 = vst [vmem:[%s170_s27] sm:$0xff] %v1017_v43  }
 0x12a   : > { %1030 = vst [vmem:[%s170_s27 + $0x10] sm:$0xff] %v1027_v44  }
 0x12b PF: > { %s13_s12 = sadd.s32 1, %s1245_s12  }
 0x12c   : > { %p10_p4 = scmp.ge.s32.totalorder %s13_s12, 4  }
 0x12e   :  { %12 = sbr.rel (!%p10_p4) target bundleno = 1 (0x1), region = 62 }

// kernel: gaze_prediction_forward.9
= control target key start
LH: loop header
LB: loop body
LE: loop exit
PB: predicated region body
PF: predicated region fallthrough
CT: control target
= control target key end

     0   :  { %s1485_s12 = smov 0   ;;  %s1729_s0 = inlined_call_operand.vmem [shape: bf16[2,81,640], index: 0, kind: input, shape index: {}]   ;;  %s1730_s1 = inlined_call_operand.vmem [shape: bf16[640,128], index: 1, kind: input, shape index: {}]   ;;  %s1731_s2 = inlined_call_operand.vmem [shape: f32[3,128], index: 2, kind: input, shape index: {}]   ;;  %s1732_s3 = inlined_call_operand.vmem [shape: bf16[2,81,128], index: 3, kind: output, shape index: {}]  }
   0x1 LB: > { %s1075_s13 = sadd.s32 4294967295, %s1463_s12   ;;  %p1079_p0 = scmp.ge.s32.totalorder %s1463_s12, 1  ;;  %s1463_s12 = sphi %s1485_s12, %s13_s12  }
   0x2   : > { %p137_p1 = scmp.lt.s32.totalorder %s1463_s12, 3 }
   0x4   : > { %p138_p2 = pnand %p1079_p0, %p137_p1 }
   0x5   : > { %v1377_v0 = vld [vmem:[%s1730_s1 + $0x40] sm:$0xff] (!%p138_p2)   ;;  %v1381_v4 = vld [vmem:[%s1730_s1 + $0x48] sm:$0xff] (!%p138_p2)   ;;  %v1385_v8 = vld [vmem:[%s1730_s1 + $0x50] sm:$0xff] (!%p138_p2)   ;;  %p161_p3 = scmp.lt.s32.totalorder (!%p138_p2), %s1075_s13, 1  ;;  %vm1014_vm0 = vcmask (!%p138_p2), 1040384  }
   0x6   : > { %141 = sbr.rel (%p138_p2) target bundleno = 322 (0x142), region = 32  ;;  %v1378_v1 = vld [vmem:[%s1730_s1 + $0xc0] sm:$0xff] (!%p138_p2)   ;;  %1205 = vmatprep.subr.bf16.mxu0 (!%p138_p2), %v1377_v0  ;;  %v1382_v5 = vld [vmem:[%s1730_s1 + $0xc8] sm:$0xff] (!%p138_p2)   ;;  %v1386_v9 = vld [vmem:[%s1730_s1 + $0xd0] sm:$0xff] (!%p138_p2)   ;;  %vm1015_vm1 = vsmask.f32 (!%p138_p2), 256 }
   0x7   : > { %v1379_v2 = vld [vmem:[%s1730_s1] sm:$0xff] (!%p138_p2)   ;;  %1257 = vmatprep.subr.bf16.mxu1 (!%p138_p2), %v1378_v1  ;;  %v1383_v6 = vld [vmem:[%s1730_s1 + $0x8] sm:$0xff] (!%p138_p2)   ;;  %v1387_v10 = vld [vmem:[%s1730_s1 + $0x10] sm:$0xff] (!%p138_p2)  }
   0x8   : > { %v1380_v3 = vld [vmem:[%s1730_s1 + $0x80] sm:$0xff] (!%p138_p2)   ;;  %1206 = vmatpush3.bf16.msra.mxu0 (!%p138_p2), %v1379_v2  ;;  %v1384_v7 = vld [vmem:[%s1730_s1 + $0x88] sm:$0xff] (!%p138_p2)   ;;  %v1388_v11 = vld [vmem:[%s1730_s1 + $0x90] sm:$0xff] (!%p138_p2)  }
   0x9   : > { %1258 = vmatpush3.bf16.msra.mxu1 (!%p138_p2), %v1380_v3  ;;  %1207 = vmatprep.subr.bf16.mxu0 (!%p138_p2), %v1381_v4  ;;  %v1389_v12 = vld [vmem:[%s1730_s1 + $0x58] sm:$0xff] (!%p138_p2)   ;;  %v1393_v16 = vld [vmem:[%s1730_s1 + $0x60] sm:$0xff] (!%p138_p2)   ;;  %v1397_v20 = vld [vmem:[%s1730_s1 + $0x68] sm:$0xff] (!%p138_p2)  }
   0xa   : > { %1259 = vmatprep.subr.bf16.mxu1 (!%p138_p2), %v1382_v5  ;;  %v1390_v13 = vld [vmem:[%s1730_s1 + $0xd8] sm:$0xff] (!%p138_p2)   ;;  %v1394_v17 = vld [vmem:[%s1730_s1 + $0xe0] sm:$0xff] (!%p138_p2)   ;;  %v1398_v21 = vld [vmem:[%s1730_s1 + $0xe8] sm:$0xff] (!%p138_p2)  }
   0xb   : > { %v1391_v14 = vld [vmem:[%s1730_s1 + $0x18] sm:$0xff] (!%p138_p2)   ;;  %v1395_v18 = vld [vmem:[%s1730_s1 + $0x20] sm:$0xff] (!%p138_p2)   ;;  %v1399_v22 = vld [vmem:[%s1730_s1 + $0x28] sm:$0xff] (!%p138_p2)  }
   0xc   : > { %1208 = vmatpush3.bf16.msra.mxu0 (!%p138_p2), %v1383_v6  ;;  %v1392_v15 = vld [vmem:[%s1730_s1 + $0x98] sm:$0xff] (!%p138_p2)   ;;  %v1396_v19 = vld [vmem:[%s1730_s1 + $0xa0] sm:$0xff] (!%p138_p2)   ;;  %v1400_v23 = vld [vmem:[%s1730_s1 + $0xa8] sm:$0xff] (!%p138_p2)  }
   0xd   : > { %1260 = vmatpush3.bf16.msra.mxu1 %v1384_v7  ;;  %1209 = vmatprep.subr.bf16.mxu0 %v1385_v8  ;;  %s1734_s13 = smov (!%p161_p3, %s1075_s13), 1  ;;  %v1401_v24 = vld [vmem:[%s1730_s1 + $0x70] sm:$0xff]   ;;  %v1405_v28 = vld [vmem:[%s1730_s1 + $0x78] sm:$0xff]   ;;  %v1415_v36 = vld [vmem:[%s1730_s1 + $0x100] sm:$0xff]   ;;  %v286_v8 = vlaneseq }
   0xe   : > { %1261 = vmatprep.subr.bf16.mxu1 %v1386_v9  ;;  %v1402_v25 = vld [vmem:[%s1730_s1 + $0xf0] sm:$0xff]   ;;  %s1367_s16 = smul.u32 220, %s1734_s13  ;;  %v1406_v29 = vld [vmem:[%s1730_s1 + $0xf8] sm:$0xff]   ;;  %v1416_v37 = vld [vmem:[%s1730_s1 + $0x108] sm:$0xff]  }
   0xf   : > { %v1403_v26 = vld [vmem:[%s1730_s1 + $0x30] sm:$0xff]   ;;  %v1407_v30 = vld [vmem:[%s1730_s1 + $0x38] sm:$0xff]   ;;  %v1437_v47 = vld [vmem:[%s1730_s1 + $0x120] sm:$0xff]   ;;  %v1653_v9 = vshrl.u32 %v286_v8, 7  ;;  %s1368_s25 = smul.u32 44, %s1734_s13 }
  0x10   : > { %1210 = vmatpush3.bf16.msra.mxu0 %v1387_v10  ;;  %v1404_v27 = vld [vmem:[%s1730_s1 + $0xb0] sm:$0xff]   ;;  %s1593_s27 = scalar_lea.vmem %s1729_s0, %s1367_s16  ;;  %v1408_v31 = vld [vmem:[%s1730_s1 + $0xb8] sm:$0xff]   ;;  %v1438_v51 = vld [vmem:[%s1730_s1 + $0x128] sm:$0xff]  }
  0x11   : > { %1262 = vmatpush3.bf16.msra.mxu1 %v1388_v11  ;;  %1211 = vmatprep.subr.bf16.mxu0 %v1389_v12  ;;  %v1409_v32 = vld [vmem:[%s1593_s27] ss:$20 sps:$4 sm:$0xff]   ;;  %v1411_v33 = vld [vmem:[%s1593_s27 + $0x4] ss:$20 sps:$4 sm:$0xff]   ;;  %v1412_v34 = vld [vmem:[%s1593_s27 + $0x8] ss:$20 sps:$4 sm:$0xff]  }
  0x12   : > { %1263 = vmatprep.subr.bf16.mxu1 %v1390_v13  ;;  %v1414_v35 = vld [vmem:[%s1593_s27 + $0xc] ss:$20 sps:$4 sm:$0xff]   ;;  %710 = vmatprep.mubr.bf16.mxu0 %v1411_v33  ;;  %v1419_v39 = vld [vmem:[%s1593_s27 + $0x34] ss:$20 sps:$4 sm:$0xff]   ;;  %v1422_v41 = vld [vmem:[%s1593_s27 + $0x30] ss:$20 sps:$4 sm:$0xff]  }
  0x13   : > { %790 = vmatprep.mubr.bf16.mxu1 %v1414_v35  ;;  %v1417_v38 = vld [vmem:[%s1593_s27 + $0x2c] ss:$20 sps:$4 sm:$0xff]   ;;  %v1421_v40 = vld [vmem:[%s1593_s27 + $0x28] ss:$20 sps:$4 sm:$0xff]   ;;  %v1423_v42 = vld [vmem:[%s1730_s1 + $0x110] sm:$0xff]   ;;  %v288_v10 = vsub.s32 0, %v1653_v9 }
  0x14   : > { %1212 = vmatpush3.bf16.msra.mxu0 %v1391_v14  ;;  %v1424_v43 = vld [vmem:[%s1593_s27 + $0x54] ss:$20 sps:$4 sm:$0xff]   ;;  %v1426_v44 = vld [vmem:[%s1593_s27 + $0x5c] ss:$20 sps:$4 sm:$0xff]   ;;  %v1429_v48 = vld [vmem:[%s1593_s27 + $0x58] ss:$20 sps:$4 sm:$0xff]  }
  0x15   : > { %1264 = vmatpush3.bf16.msra.mxu1 %v1392_v15  ;;  %1213 = vmatprep.subr.bf16.mxu0 %v1393_v16  ;;  %v1430_v45 = vld [vmem:[%s1730_s1 + $0x118] sm:$0xff]   ;;  %v1428_v46 = vld [vmem:[%s1593_s27 + $0x50] ss:$20 sps:$4 sm:$0xff]   ;;  %v1436_v54 = vld [vmem:[%s1593_s27 + $0x80] ss:$20 sps:$4 sm:$0xff]  }
  0x16   : > { %1265 = vmatprep.subr.bf16.mxu1 %v1394_v17  ;;  %v1431_v49 = vld [vmem:[%s1593_s27 + $0x7c] ss:$20 sps:$4 sm:$0xff]   ;;  %v1433_v50 = vld [vmem:[%s1593_s27 + $0x84] ss:$20 sps:$4 sm:$0xff]   ;;  %v1441_v56 = vld [vmem:[%s1593_s27 + $0xac] ss:$20 sps:$4 sm:$0xff]  }
  0x17   : > { %v1435_v52 = vld [vmem:[%s1593_s27 + $0x78] ss:$20 sps:$4 sm:$0xff]   ;;  %v1445_v53 = vld [vmem:[%s1730_s1 + $0x130] sm:$0xff]   ;;  %v1444_v61 = vld [vmem:[%s1593_s27 + $0xa8] ss:$20 sps:$4 sm:$0xff]  }
  0x18   : > { %1214 = vmatpush3.bf16.msra.mxu0 %v1395_v18  ;;  %v1439_v55 = vld [vmem:[%s1593_s27 + $0xa4] ss:$20 sps:$4 sm:$0xff]   ;;  %v203_v58 = vld [vmem:[%s1593_s27 + $0xc8] sm:$0x11]  ;;  %v204_v59 = vld [vmem:[%s1593_s27 + $0xd0] sm:$0x11] }
  0x19   : > { %1266 = vmatpush3.bf16.msra.mxu1 %v1396_v19  ;;  %1215 = vmatprep.subr.bf16.mxu0 %v1397_v20  ;;  %v1450_v57 = vld [vmem:[%s1730_s1 + $0x138] sm:$0xff]   ;;  %v1443_v60 = vld [vmem:[%s1593_s27 + $0xa0] ss:$20 sps:$4 sm:$0xff]   ;;  %v1108_v62 = vcombine.high %v203_v58, %v203_v58  ;;  %v1110_v63 = vcombine.high %v204_v59, %v204_v59  ;;  %v1107_v0 = vcombine.low %v203_v58, %v203_v58  ;;  %v1451_v2 = vld [vmem:[%s1593_s27 + $0x10] ss:$20 sps:$4 sm:$0xff]  }
  0x1a   : > { %1267 = vmatprep.subr.bf16.mxu1 %v1398_v21  ;;  %v1109_v1 = vcombine.low %v204_v59, %v204_v59  ;;  %v1452_v3 = vld [vmem:[%s1593_s27 + $0x60] ss:$20 sps:$4 sm:$0xff]   ;;  %v1453_v4 = vld [vmem:[%s1593_s27 + $0x38] ss:$20 sps:$4 sm:$0xff]   ;;  %v1454_v5 = vld [vmem:[%s1593_s27 + $0x88] ss:$20 sps:$4 sm:$0xff]  }
  0x1b   : > { %v1455_v6 = vld [vmem:[%s1593_s27 + $0xb0] ss:$20 sps:$4 sm:$0xff]   ;;  %v1456_v7 = vld [vmem:[%s1593_s27 + $0xd8] ss:$0 sps:$4 sm:$0x11]   ;;  %s1712_s27 = scalar_lea.vmem %s1732_s3, %s1368_s25  ;;  %vm1016_vm2 = vmand %vm1014_vm0, %vm1015_vm1 }
  0x1c   : > { %1216 = vmatpush3.bf16.msra.mxu0 %v1399_v22  ;;  %v1659_v11 = vld [vmem:[%s1731_s2] sm:$0x7] }
  0x1d   : > { %1268 = vmatpush3.bf16.msra.mxu1 %v1400_v23  ;;  %1217 = vmatprep.subr.bf16.mxu0 %v1401_v24  ;;  %v1662_v13 = vrot.slane %v1659_v11, %v288_v10 }
  0x1e   : > { %1269 = vmatprep.subr.bf16.mxu1 %v1402_v25 }
  0x20   : > { %1218 = vmatpush3.bf16.msra.mxu0 %v1403_v26 }
  0x21   : > { %1270 = vmatpush3.bf16.msra.mxu1 %v1404_v27  ;;  %1219 = vmatprep.subr.bf16.mxu0 %v1405_v28 }
  0x22   : > { %1271 = vmatprep.subr.bf16.mxu1 %v1406_v29 }
  0x24   : > { %1220 = vmatpush3.bf16.msra.mxu0 %v1407_v30 }
  0x25   : > { %1272 = vmatpush3.bf16.msra.mxu1 %v1408_v31  ;;  %1323 = vmatprep.subr.bf16.mxu0 %v1415_v36 }
  0x26   : > { %1351 = vmatprep.subr.bf16.mxu1 %v1415_v36 }
  0x27   : > { %711 = vmatmul.mubr.bf16.vlgmr.msra.gmra.mrb[0].mxu0 %v1409_v32 }
  0x28   : > { %791 = vmatmul.mubr.bf16.vlgmr.msra.gmra.mrb[0].mxu1 %v1412_v34  ;;  %718 = vmatprep.mubr.bf16.mxu0 %v1417_v38 }
  0x29   : > { %1359 = vmatpush3.bf16.msra.mxu1 %v1415_v36  ;;  %798 = vmatprep.mubr.bf16.mxu1 %v1419_v39 }
  0x2a   : > { %1352 = vmatprep.subr.bf16.mxu1 %v1416_v37  ;;  %1324 = vmatpush3.bf16.msra.mxu0 %v1415_v36 }
  0x2b   : > { %1325 = vmatprep.subr.bf16.mxu0 %v1416_v37 }
  0x2d   : > { %1360 = vmatpush3.bf16.msra.mxu1 %v1416_v37 }
  0x2e   : > { %1353 = vmatprep.subr.bf16.mxu1 %v1423_v42  ;;  %1326 = vmatpush3.bf16.msra.mxu0 %v1416_v37 }
  0x2f   : > { %719 = vmatmul.mubr.bf16.gmra.mrb[4].mxu0 %v1421_v40  ;;  %1327 = vmatprep.subr.bf16.mxu0 %v1423_v42 }
  0x30   : > { %799 = vmatmul.mubr.bf16.gmra.mrb[4].mxu1 %v1422_v41  ;;  %726 = vmatprep.mubr.bf16.mxu0 %v1424_v43 }
  0x31   : > { %1361 = vmatpush3.bf16.msra.mxu1 %v1423_v42  ;;  %806 = vmatprep.mubr.bf16.mxu1 %v1426_v44 }
  0x32   : > { %1354 = vmatprep.subr.bf16.mxu1 %v1430_v45  ;;  %1328 = vmatpush3.bf16.msra.mxu0 %v1423_v42 }
  0x33   : > { %1329 = vmatprep.subr.bf16.mxu0 %v1430_v45 }
  0x35   : > { %1362 = vmatpush3.bf16.msra.mxu1 %v1430_v45 }
  0x36   : > { %1355 = vmatprep.subr.bf16.mxu1 %v1437_v47  ;;  %1330 = vmatpush3.bf16.msra.mxu0 %v1430_v45 }
  0x37   : > { %727 = vmatmul.mubr.bf16.gmra.mrb[8].mxu0 %v1428_v46  ;;  %1331 = vmatprep.subr.bf16.mxu0 %v1437_v47 }
  0x38   : > { %807 = vmatmul.mubr.bf16.gmra.mrb[8].mxu1 %v1429_v48  ;;  %734 = vmatprep.mubr.bf16.mxu0 %v1431_v49 }
  0x39   : > { %814 = vmatprep.mubr.bf16.mxu1 %v1433_v50  ;;  %1363 = vmatpush3.bf16.msra.mxu1 %v1437_v47 }
  0x3a   : > { %1356 = vmatprep.subr.bf16.mxu1 %v1438_v51  ;;  %1332 = vmatpush3.bf16.msra.mxu0 %v1437_v47 }
  0x3b   : > { %1333 = vmatprep.subr.bf16.mxu0 %v1438_v51 }
  0x3d   : > { %1364 = vmatpush3.bf16.msra.mxu1 %v1438_v51 }
  0x3e   : > { %1357 = vmatprep.subr.bf16.mxu1 %v1445_v53  ;;  %1334 = vmatpush3.bf16.msra.mxu0 %v1438_v51 }
  0x3f   : > { %735 = vmatmul.mubr.bf16.gmra.mrb[12].mxu0 %v1435_v52  ;;  %1335 = vmatprep.subr.bf16.mxu0 %v1445_v53 }
  0x40   : > { %815 = vmatmul.mubr.bf16.gmra.mrb[12].mxu1 %v1436_v54  ;;  %742 = vmatprep.mubr.bf16.mxu0 %v1439_v55 }
  0x41   : > { %822 = vmatprep.mubr.bf16.mxu1 %v1441_v56  ;;  %1365 = vmatpush3.bf16.msra.mxu1 %v1445_v53 }
  0x42   : > { %1358 = vmatprep.subr.bf16.mxu1 %v1450_v57  ;;  %1336 = vmatpush3.bf16.msra.mxu0 %v1445_v53 }
  0x43   : > { %1337 = vmatprep.subr.bf16.mxu0 %v1450_v57 }
  0x45   : > { %1366 = vmatpush3.bf16.msra.mxu1 %v1450_v57 }
  0x46   : > { %1338 = vmatpush3.bf16.msra.mxu0 %v1450_v57 }
  0x47   : > { %743 = vmatmul.mubr.bf16.gmra.mrb[16].mxu0 %v1443_v60 }
  0x48   : > { %823 = vmatmul.mubr.bf16.gmra.mrb[16].mxu1 %v1444_v61  ;;  %750 = vmatprep.mubr.bf16.mxu0 %v1108_v62 }
  0x49   : > { %830 = vmatprep.mubr.bf16.mxu1 %v1110_v63 }
  0x4f   : > { %751 = vmatmul.mubr.bf16.gmra.mrb[20].mxu0 %v1107_v0 }
  0x50   : > { %831 = vmatmul.mubr.bf16.gmra.mrb[20].mxu1 %v1109_v1  ;;  %1339 = vmatprep.mubr.bf16.mxu0 %v1451_v2 }
  0x51   : > { %1343 = vmatprep.mubr.bf16.mxu1 %v1452_v3 }
  0x57   : > { %1340 = vmatmul.mubr.bf16.vlgmr.msra.gmra.mrb[24].mxu0 %v1453_v4 }
  0x58   : > { %1344 = vmatmul.mubr.bf16.vlgmr.msra.gmra.mrb[24].mxu1 %v1454_v5 }
  0x59   : > { %1347 = vmatprep.mubr.bf16.mxu1 %v1455_v6 }
  0x60   : > { %1348 = vmatmul.mubr.bf16.gmra.mrb[28].mxu1 %v1456_v7 }
  0xfa   : > { %v1221_v12 = vpop.f32.mrb[0].mxu0 }
  0xfb   : > { %v1273_v14 = vpop.f32.mrb[0].mxu1  ;;  %v1222_v15 = vpop.f32.mrb[1].mxu0 }
  0xfc   : > { %v1223_v16 = vadd.f32 %v1222_v15, %v1221_v12  ;;  %v1274_v17 = vpop.f32.mrb[1].mxu1  ;;  %v1224_v18 = vpop.f32.mrb[2].mxu0 }
  0xfd   : > { %v1275_v19 = vadd.f32 %v1274_v17, %v1273_v14  ;;  %v1276_v20 = vpop.f32.mrb[2].mxu1  ;;  %v1225_v21 = vpop.f32.mrb[3].mxu0 }
  0xfe   : > { %v713_v22 = vadd.f32 %v1223_v16, %v1662_v13  ;;  %v1226_v23 = vadd.f32 %v1225_v21, %v1224_v18  ;;  %v1277_v24 = vpop.f32.mrb[3].mxu1 }
  0xff   : > { %v1278_v25 = vadd.f32 %v1277_v24, %v1276_v20 }
 0x100   : > { %v716_v26 = vadd.f32 %v1226_v23, %v1662_v13  ;;  %v1666_v27 = vadd.f32 %v1275_v19, %v713_v22 }
 0x102   : > { %v1227_v28 = vpop.f32.mrb[4].mxu0  ;;  %v1668_v29 = vadd.f32 %v1278_v25, %v716_v26 }
 0x103   : > { %v1279_v30 = vpop.f32.mrb[4].mxu1  ;;  %v1228_v31 = vpop.f32.mrb[5].mxu0 }
 0x104   : > { %v1229_v32 = vadd.f32 %v1228_v31, %v1227_v28  ;;  %v1280_v33 = vpop.f32.mrb[5].mxu1  ;;  %v1230_v34 = vpop.f32.mrb[6].mxu0 }
 0x105   : > { %v1281_v35 = vadd.f32 %v1280_v33, %v1279_v30  ;;  %v1282_v36 = vpop.f32.mrb[6].mxu1  ;;  %v1231_v37 = vpop.f32.mrb[7].mxu0 }
 0x106   : > { %v721_v38 = vadd.f32 %v1229_v32, %v1662_v13  ;;  %v1232_v39 = vadd.f32 %v1231_v37, %v1230_v34  ;;  %v1283_v40 = vpop.f32.mrb[7].mxu1 }
 0x107   : > { %v1284_v41 = vadd.f32 %v1283_v40, %v1282_v36 }
 0x108   : > { %v724_v42 = vadd.f32 %v1232_v39, %v1662_v13  ;;  %v1672_v43 = vadd.f32 %v1281_v35, %v721_v38 }
 0x10a   : > { %v1233_v44 = vpop.f32.mrb[8].mxu0  ;;  %v1674_v45 = vadd.f32 %v1284_v41, %v724_v42 }
 0x10b   : > { %v1285_v46 = vpop.f32.mrb[8].mxu1  ;;  %v1234_v47 = vpop.f32.mrb[9].mxu0 }
 0x10c   : > { %v1235_v48 = vadd.f32 %v1234_v47, %v1233_v44  ;;  %v1286_v49 = vpop.f32.mrb[9].mxu1  ;;  %v1236_v50 = vpop.f32.mrb[10].mxu0  ;;  %v931_v47 = vsub.s32 1, %v1653_v9 }
 0x10d   : > { %v1287_v51 = vadd.f32 %v1286_v49, %v1285_v46  ;;  %v1288_v52 = vpop.f32.mrb[10].mxu1  ;;  %v1237_v53 = vpop.f32.mrb[11].mxu0  ;;  %v946_v49 = vsub.s32 2, %v1653_v9 }
 0x10e   : > { %v729_v54 = vadd.f32 %v1235_v48, %v1662_v13  ;;  %v1238_v55 = vadd.f32 %v1237_v53, %v1236_v50  ;;  %v1289_v56 = vpop.f32.mrb[11].mxu1 }
 0x10f   : > { %v1290_v57 = vadd.f32 %v1289_v56, %v1288_v52  ;;  %v1693_v52 = vrot.slane %v1659_v11, %v931_v47 }
 0x110   : > { %v732_v58 = vadd.f32 %v1238_v55, %v1662_v13  ;;  %v809_v59 = vadd.f32 %v1287_v51, %v729_v54 }
 0x112   : > { %v1239_v60 = vpop.f32.mrb[12].mxu0  ;;  %v1678_v61 = vadd.f32 %v1290_v57, %v732_v58 }
 0x113   : > { %v1291_v62 = vpop.f32.mrb[12].mxu1  ;;  %v1240_v63 = vpop.f32.mrb[13].mxu0 }
 0x114   : > { %v1241_v0 = vadd.f32 %v1240_v63, %v1239_v60  ;;  %v1292_v1 = vpop.f32.mrb[13].mxu1  ;;  %v1242_v2 = vpop.f32.mrb[14].mxu0  ;;  %v947_v60 = vrot.slane %v1659_v11, %v946_v49 }
 0x115   : > { %v1293_v3 = vadd.f32 %v1292_v1, %v1291_v62  ;;  %v1294_v4 = vpop.f32.mrb[14].mxu1  ;;  %v1243_v5 = vpop.f32.mrb[15].mxu0 }
 0x116   : > { %v737_v6 = vadd.f32 %v1241_v0, %v1662_v13  ;;  %v1244_v7 = vadd.f32 %v1243_v5, %v1242_v2  ;;  %v1295_v8 = vpop.f32.mrb[15].mxu1 }
 0x117   : > { %v1296_v10 = vadd.f32 %v1295_v8, %v1294_v4 }
 0x118   : > { %v740_v12 = vadd.f32 %v1244_v7, %v1662_v13  ;;  %v817_v14 = vadd.f32 %v1293_v3, %v737_v6 }
 0x11a   : > { %v1245_v15 = vpop.f32.mrb[16].mxu0  ;;  %v820_v16 = vadd.f32 %v1296_v10, %v740_v12 }
 0x11b   : > { %v1297_v17 = vpop.f32.mrb[16].mxu1  ;;  %v1246_v18 = vpop.f32.mrb[17].mxu0 }
 0x11c   : > { %v1247_v19 = vadd.f32 %v1246_v18, %v1245_v15  ;;  %v1298_v20 = vpop.f32.mrb[17].mxu1  ;;  %v1248_v21 = vpop.f32.mrb[18].mxu0 }
 0x11d   : > { %v1299_v22 = vadd.f32 %v1298_v20, %v1297_v17  ;;  %v1300_v23 = vpop.f32.mrb[18].mxu1  ;;  %v1249_v24 = vpop.f32.mrb[19].mxu0 }
 0x11e   : > { %v745_v25 = vadd.f32 %v1247_v19, %v1662_v13  ;;  %v1250_v26 = vadd.f32 %v1249_v24, %v1248_v21  ;;  %v1301_v28 = vpop.f32.mrb[19].mxu1 }
 0x11f   : > { %v1302_v30 = vadd.f32 %v1301_v28, %v1300_v23 }
 0x120   : > { %v748_v31 = vadd.f32 %v1250_v26, %v1662_v13  ;;  %v1684_v32 = vadd.f32 %v1299_v22, %v745_v25 }
 0x122   : > { %v1251_v33 = vpop.f32.mrb[20].mxu0  ;;  %v1686_v34 = vadd.f32 %v1302_v30, %v748_v31 }
 0x123   : > { %v1303_v35 = vpop.f32.mrb[20].mxu1  ;;  %v1252_v36 = vpop.f32.mrb[21].mxu0 }
 0x124   : > { %v1253_v37 = vadd.f32 %v1252_v36, %v1251_v33  ;;  %v1304_v38 = vpop.f32.mrb[21].mxu1  ;;  %v1254_v39 = vpop.f32.mrb[22].mxu0 }
 0x125   : > { %v1305_v40 = vadd.f32 %v1304_v38, %v1303_v35  ;;  %v1306_v41 = vpop.f32.mrb[22].mxu1  ;;  %v1255_v42 = vpop.f32.mrb[23].mxu0 }
 0x126   : > { %v753_v44 = vadd.f32 %v1253_v37, %v1662_v13  ;;  %v1307_v46 = vpop.f32.mrb[23].mxu1 }
 0x127   : > { %v1017_v46 = vld [vmem:[%s1712_s27 + $0x28] sm:$0x1] }
 0x128   : > { %v833_v48 = vadd.f32 %v1305_v40, %v753_v44 }
 0x12a   : > { %v1341_v50 = vpop.f32.mrb[24].mxu0 }
 0x12b   : > { %v881_v51 = vadd.f32 %v1341_v50, %v1672_v43  ;;  %v1345_v53 = vpop.f32.mrb[24].mxu1  ;;  %v872_v54 = vpop.f32.mrb[25].mxu0 }
 0x12c   : > { %v897_v55 = vadd.f32 %v1345_v53, %v817_v14  ;;  %v873_v56 = vadd.f32 %v872_v54, %v1666_v27  ;;  %v888_v57 = vpop.f32.mrb[25].mxu1  ;;  %v1342_v58 = vpop.f32.mrb[26].mxu0 }
 0x12d   : > { %v920_v13 = vmax.f32 %v881_v51, 0.0  ;;  %v889_v62 = vadd.f32 %v888_v57, %v809_v59  ;;  %v884_v9 = vadd.f32 %v1342_v58, %v1674_v45  ;;  %v1346_v63 = vpop.f32.mrb[26].mxu1  ;;  %v875_v0 = vpop.f32.mrb[27].mxu0 }
 0x12e   : > { %v924_v43 = vmax.f32 %v897_v55, 0.0  ;;  %v918_v1 = vmax.f32 %v873_v56, 0.0  ;;  %v900_v2 = vadd.f32 %v1346_v63, %v820_v16  ;;  %v876_v3 = vadd.f32 %v875_v0, %v1668_v29  ;;  %v891_v4 = vpop.f32.mrb[27].mxu1 }
 0x12f   : > { %v935_v5 = vmul.f32 %v1693_v52, %v920_v13  ;;  %v922_v27 = vmax.f32 %v889_v62, 0.0  ;;  %v921_v6 = vmax.f32 %v884_v9, 0.0  ;;  %v892_v7 = vadd.f32 %v891_v4, %v1678_v61 }
 0x130   : > { %v939_v11 = vmul.f32 %v1693_v52, %v924_v43  ;;  %v933_v59 = vmul.f32 %v1693_v52, %v918_v1  ;;  %v925_v45 = vmax.f32 %v900_v2, 0.0  ;;  %v919_v8 = vmax.f32 %v876_v3, 0.0 }
 0x131   : > { %v937_v10 = vmul.f32 %v1693_v52, %v922_v27  ;;  %v936_v12 = vmul.f32 %v1693_v52, %v921_v6  ;;  %v923_v14 = vmax.f32 %v892_v7, 0.0  ;;  %v950_v16 = vadd.f32 %v947_v60, %v935_v5 }
 0x132   : > { %v940_v29 = vmul.f32 %v1693_v52, %v925_v45  ;;  %v934_v15 = vmul.f32 %v1693_v52, %v919_v8  ;;  %v954_v17 = vadd.f32 %v947_v60, %v939_v11  ;;  %v948_v20 = vadd.f32 %v947_v60, %v933_v59 }
 0x133   : > { %v951_v18 = vadd.f32 %v947_v60, %v936_v12  ;;  %v938_v61 = vmul.f32 %v1693_v52, %v923_v14  ;;  %v1349_v19 = vpop.f32.mrb[28].mxu1  ;;  %v952_v25 = vadd.f32 %v947_v60, %v937_v10 }
 0x134   : > { %v955_v21 = vadd.f32 %v947_v60, %v940_v29  ;;  %v949_v22 = vadd.f32 %v947_v60, %v934_v15  ;;  %v913_v23 = vadd.f32 %v1349_v19, %v833_v48  ;;  %v904_v24 = vpop.f32.mrb[29].mxu1 }
 0x135   : > { %v1184_v26 = vpack.c.bf16 %v951_v18, %v950_v16  ;;  %v953_v28 = vadd.f32 %v947_v60, %v938_v61  ;;  %v905_v30 = vadd.f32 %v904_v24, %v1684_v32  ;;  %v1350_v31 = vpop.f32.mrb[30].mxu1 }
 0x136   : > { %v1194_v33 = vpack.c.bf16 %v955_v21, %v954_v17  ;;  %v1179_v35 = vpack.c.bf16 %v949_v22, %v948_v20  ;;  %v928_v36 = vmax.f32 %v913_v23, 0.0  ;;  %v907_v37 = vpop.f32.mrb[31].mxu1 }
 0x137   : > { %1201 = vst [vmem:[%s1712_s27 + $0x8] sm:$0xff] %v1184_v26   ;;  %v1189_v38 = vpack.c.bf16 %v953_v28, %v952_v25  ;;  %v926_v39 = vmax.f32 %v905_v30, 0.0  ;;  %v908_v40 = vadd.f32 %v907_v37, %v1686_v34 }
 0x138   : > { %1203 = vst [vmem:[%s1712_s27 + $0x18] sm:$0xff] %v1194_v33   ;;  %1180 = vst [vmem:[%s1712_s27] sm:$0xff] %v1179_v35   ;;  %v943_v41 = vmul.f32 %v1693_v52, %v928_v36 }
 0x139   : > { %1202 = vst [vmem:[%s1712_s27 + $0x10] sm:$0xff] %v1189_v38   ;;  %v941_v32 = vmul.f32 %v1693_v52, %v926_v39  ;;  %v927_v42 = vmax.f32 %v908_v40, 0.0 }
 0x13a   : > { %v958_v44 = vadd.f32 %v947_v60, %v943_v41 }
 0x13b   : > { %v942_v47 = vmul.f32 %v1693_v52, %v927_v42  ;;  %v956_v49 = vadd.f32 %v947_v60, %v941_v32 }
 0x13c   : > { %v1175_v48 = vpack.c.bf16 %v958_v44, %v958_v44 }
 0x13d   : > { %v957_v34 = vadd.f32 %v947_v60, %v942_v47 }
 0x13e   : > { %v1018_v50 = vsel %vm1016_vm2, %v1175_v48, %v1017_v46 }
 0x13f   : > { %1019 = vst [vmem:[%s1712_s27 + $0x28] sm:$0x1] %v1018_v50  ;;  %v1199_v51 = vpack.c.bf16 %v957_v34, %v956_v49 }
 0x141   : > { %1204 = vst [vmem:[%s1712_s27 + $0x20] sm:$0xff] %v1199_v51  }
 0x142 PF: > { %s13_s12 = sadd.s32 1, %s1463_s12  }
 0x143   : > { %p10_p4 = scmp.ge.s32.totalorder %s13_s12, 4  }
 0x145   :  { %12 = sbr.rel (!%p10_p4) target bundleno = 1 (0x1), region = 62 }

// kernel: gaze_prediction_forward.10
= control target key start
LH: loop header
LB: loop body
LE: loop exit
PB: predicated region body
PF: predicated region fallthrough
CT: control target
= control target key end

     0   :  { %s889_s12 = smov 0   ;;  %s1030_s0 = inlined_call_operand.vmem [shape: bf16[2,100,256], index: 0, kind: input, shape index: {}]   ;;  %s1031_s1 = inlined_call_operand.vmem [shape: bf16[256,128], index: 1, kind: input, shape index: {}]   ;;  %s1032_s2 = inlined_call_operand.vmem [shape: f32[3,128], index: 2, kind: input, shape index: {}]   ;;  %s1033_s3 = inlined_call_operand.vmem [shape: bf16[2,100,128], index: 3, kind: output, shape index: {}]  }
   0x1 LB: > { %s641_s13 = sadd.s32 4294967295, %s867_s12   ;;  %p645_p0 = scmp.ge.s32.totalorder %s867_s12, 1  ;;  %s867_s12 = sphi %s889_s12, %s13_s12  }
   0x2   : > { %p137_p1 = scmp.lt.s32.totalorder %s867_s12, 3 }
   0x4   : > { %p138_p2 = pnand %p645_p0, %p137_p1 }
   0x5   : > { %v825_v0 = vld [vmem:[%s1031_s1 + $0x40] sm:$0xff] (!%p138_p2)   ;;  %v827_v2 = vld [vmem:[%s1031_s1 + $0x48] sm:$0xff] (!%p138_p2)   ;;  %p161_p3 = scmp.lt.s32.totalorder (!%p138_p2), %s641_s13, 1  ;;  %v829_v4 = vld [vmem:[%s1031_s1 + $0x50] sm:$0xff] (!%p138_p2)   ;;  %v218_v31 = vlaneseq (!%p138_p2) }
   0x6   : > { %141 = sbr.rel (%p138_p2) target bundleno = 290 (0x122), region = 32  ;;  %v826_v1 = vld [vmem:[%s1031_s1] sm:$0xff] (!%p138_p2)   ;;  %741 = vmatprep.subr.bf16.mxu0 (!%p138_p2), %v825_v0  ;;  %799 = vmatprep.subr.bf16.mxu1 (!%p138_p2), %v825_v0  ;;  %v828_v3 = vld [vmem:[%s1031_s1 + $0x8] sm:$0xff] (!%p138_p2)   ;;  %v830_v5 = vld [vmem:[%s1031_s1 + $0x10] sm:$0xff] (!%p138_p2)  }
   0x7   : > { %742 = vmatpush3.bf16.msra.mxu0 (!%p138_p2), %v826_v1  ;;  %807 = vmatpush3.bf16.msra.mxu1 (!%p138_p2), %v826_v1  ;;  %v831_v6 = vld [vmem:[%s1031_s1 + $0x58] sm:$0xff] (!%p138_p2)   ;;  %v833_v8 = vld [vmem:[%s1031_s1 + $0x60] sm:$0xff] (!%p138_p2)   ;;  %v835_v10 = vld [vmem:[%s1031_s1 + $0x68] sm:$0xff] (!%p138_p2)   ;;  %v219_v32 = vshrl.u32 (!%p138_p2), %v218_v31, 7 }
   0x8   : > { %743 = vmatprep.subr.bf16.mxu0 (!%p138_p2), %v827_v2  ;;  %800 = vmatprep.subr.bf16.mxu1 (!%p138_p2), %v827_v2  ;;  %v832_v7 = vld [vmem:[%s1031_s1 + $0x18] sm:$0xff] (!%p138_p2)   ;;  %v834_v9 = vld [vmem:[%s1031_s1 + $0x20] sm:$0xff] (!%p138_p2)   ;;  %v836_v13 = vld [vmem:[%s1031_s1 + $0x28] sm:$0xff] (!%p138_p2)  }
   0x9   : > { %v837_v14 = vld [vmem:[%s1031_s1 + $0x70] sm:$0xff] (!%p138_p2)   ;;  %v839_v16 = vld [vmem:[%s1031_s1 + $0x78] sm:$0xff] (!%p138_p2)   ;;  %v220_v33 = vsub.s32 (!%p138_p2), 0, %v219_v32  ;;  %v172_v34 = vld [vmem:[%s1032_s2] sm:$0x7] (!%p138_p2)  ;;  %v488_v35 = vsub.s32 (!%p138_p2), 1, %v219_v32 }
   0xa   : > { %v838_v15 = vld [vmem:[%s1031_s1 + $0x30] sm:$0xff] (!%p138_p2)   ;;  %v840_v17 = vld [vmem:[%s1031_s1 + $0x38] sm:$0xff] (!%p138_p2)   ;;  %v505_v46 = vsub.s32 (!%p138_p2), 2, %v219_v32 }
   0xb   : > { %744 = vmatpush3.bf16.msra.mxu0 (!%p138_p2), %v828_v3  ;;  %808 = vmatpush3.bf16.msra.mxu1 (!%p138_p2), %v828_v3  ;;  %v969_v37 = vrot.slane (!%p138_p2), %v172_v34, %v220_v33  ;;  %v971_v45 = vrot.slane (!%p138_p2), %v172_v34, %v488_v35 }
   0xc   : > { %745 = vmatprep.subr.bf16.mxu0 (!%p138_p2), %v829_v4  ;;  %801 = vmatprep.subr.bf16.mxu1 (!%p138_p2), %v829_v4  ;;  %v977_v57 = vrot.slane (!%p138_p2), %v172_v34, %v505_v46 }
   0xd   : > { %s1035_s13 = smov (!%p161_p3, %s641_s13), 1 }
   0xe   : > { %s815_s28 = smul.u32 104, %s1035_s13 }
   0xf   : > { %746 = vmatpush3.bf16.msra.mxu0 %v830_v5  ;;  %809 = vmatpush3.bf16.msra.mxu1 %v830_v5  ;;  %s816_s27 = smul.u32 52, %s1035_s13 }
  0x10   : > { %747 = vmatprep.subr.bf16.mxu0 %v831_v6  ;;  %802 = vmatprep.subr.bf16.mxu1 %v831_v6  ;;  %s930_s8 = scalar_lea.vmem %s1030_s0, %s815_s28 }
  0x11   : > { %v843_v11 = vld [vmem:[%s930_s8 + $0x4] ss:$8 sps:$4 sm:$0xff]   ;;  %v841_v18 = vld [vmem:[%s930_s8] ss:$8 sps:$4 sm:$0xff]   ;;  %v847_v20 = vld [vmem:[%s930_s8 + $0x14] ss:$8 sps:$4 sm:$0xff]   ;;  %s991_s29 = scalar_lea.vmem %s1033_s3, %s816_s27 }
  0x12   : > { %v846_v12 = vld [vmem:[%s930_s8 + $0x44] ss:$8 sps:$4 sm:$0xff]   ;;  %417 = vmatprep.mubr.bf16.mxu0 %v843_v11  ;;  %v844_v19 = vld [vmem:[%s930_s8 + $0x40] ss:$8 sps:$4 sm:$0xff]   ;;  %v850_v21 = vld [vmem:[%s930_s8 + $0x54] ss:$8 sps:$4 sm:$0xff]  }
  0x13   : > { %748 = vmatpush3.bf16.msra.mxu0 %v832_v7  ;;  %810 = vmatpush3.bf16.msra.mxu1 %v832_v7  ;;  %v185_v22 = vld [vmem:[%s930_s8 + $0x60] sm:$0x33]  ;;  %v849_v23 = vld [vmem:[%s930_s8 + $0x10] ss:$8 sps:$4 sm:$0xff]   ;;  %v857_v29 = vld [vmem:[%s930_s8 + $0x34] ss:$8 sps:$4 sm:$0xff]  }
  0x14   : > { %749 = vmatprep.subr.bf16.mxu0 %v833_v8  ;;  %803 = vmatprep.subr.bf16.mxu1 %v833_v8  ;;  %v854_v24 = vld [vmem:[%s930_s8 + $0x50] ss:$8 sps:$4 sm:$0xff]   ;;  %v852_v25 = vld [vmem:[%s930_s8 + $0x24] ss:$8 sps:$4 sm:$0xff]   ;;  %v661_v26 = vcombine.high %v185_v22, %v185_v22  ;;  %v855_v27 = vld [vmem:[%s930_s8 + $0x20] ss:$8 sps:$4 sm:$0xff]   ;;  %v660_v28 = vcombine.low %v185_v22, %v185_v22 }
  0x15   : > { %449 = vmatprep.mubr.bf16.mxu1 %v846_v12  ;;  %v860_v30 = vld [vmem:[%s930_s8 + $0x30] ss:$8 sps:$4 sm:$0xff]  }
  0x17   : > { %750 = vmatpush3.bf16.msra.mxu0 %v834_v9  ;;  %811 = vmatpush3.bf16.msra.mxu1 %v834_v9 }
  0x18   : > { %751 = vmatprep.subr.bf16.mxu0 %v835_v10  ;;  %804 = vmatprep.subr.bf16.mxu1 %v835_v10 }
  0x1b   : > { %752 = vmatpush3.bf16.msra.mxu0 %v836_v13  ;;  %812 = vmatpush3.bf16.msra.mxu1 %v836_v13 }
  0x1c   : > { %753 = vmatprep.subr.bf16.mxu0 %v837_v14  ;;  %805 = vmatprep.subr.bf16.mxu1 %v837_v14 }
  0x1f   : > { %754 = vmatpush3.bf16.msra.mxu0 %v838_v15  ;;  %813 = vmatpush3.bf16.msra.mxu1 %v838_v15 }
  0x20   : > { %755 = vmatprep.subr.bf16.mxu0 %v839_v16  ;;  %806 = vmatprep.subr.bf16.mxu1 %v839_v16 }
  0x23   : > { %756 = vmatpush3.bf16.msra.mxu0 %v840_v17  ;;  %814 = vmatpush3.bf16.msra.mxu1 %v840_v17 }
  0x26   : > { %418 = vmatmul.mubr.bf16.vlgmr.msra.gmra.mrb[0].mxu0 %v841_v18  ;;  %450 = vmatmul.mubr.bf16.vlgmr.msra.gmra.mrb[0].mxu1 %v844_v19 }
  0x27   : > { %425 = vmatprep.mubr.bf16.mxu0 %v847_v20  ;;  %457 = vmatprep.mubr.bf16.mxu1 %v850_v21 }
  0x2e   : > { %426 = vmatmul.mubr.bf16.gmra.mrb[4].mxu0 %v849_v23  ;;  %458 = vmatmul.mubr.bf16.gmra.mrb[4].mxu1 %v854_v24 }
  0x2f   : > { %433 = vmatprep.mubr.bf16.mxu0 %v852_v25  ;;  %465 = vmatprep.mubr.bf16.mxu1 %v661_v26 }
  0x36   : > { %434 = vmatmul.mubr.bf16.gmra.mrb[8].mxu0 %v855_v27  ;;  %466 = vmatmul.mubr.bf16.gmra.mrb[8].mxu1 %v660_v28 }
  0x37   : > { %441 = vmatprep.mubr.bf16.mxu0 %v857_v29 }
  0x3e   : > { %442 = vmatmul.mubr.bf16.gmra.mrb[12].mxu0 %v860_v30 }
  0xf9   : > { %v757_v36 = vpop.f32.mrb[0].mxu0  ;;  %v781_v38 = vpop.f32.mrb[0].mxu1 }
  0xfa   : > { %v758_v39 = vpop.f32.mrb[1].mxu0  ;;  %v782_v40 = vpop.f32.mrb[1].mxu1 }
  0xfb   : > { %v759_v41 = vadd.f32 %v758_v39, %v757_v36  ;;  %v760_v42 = vpop.f32.mrb[2].mxu0  ;;  %v783_v43 = vadd.f32 %v782_v40, %v781_v38  ;;  %v784_v44 = vpop.f32.mrb[2].mxu1 }
  0xfc   : > { %v761_v47 = vpop.f32.mrb[3].mxu0  ;;  %v785_v48 = vpop.f32.mrb[3].mxu1 }
  0xfd   : > { %v420_v49 = vadd.f32 %v759_v41, %v969_v37  ;;  %v762_v50 = vadd.f32 %v761_v47, %v760_v42  ;;  %v452_v51 = vadd.f32 %v783_v43, %v969_v37  ;;  %v786_v52 = vadd.f32 %v785_v48, %v784_v44 }
  0xff   : > { %v473_v53 = vmax.f32 %v420_v49, 0.0  ;;  %v423_v54 = vadd.f32 %v762_v50, %v969_v37  ;;  %v481_v55 = vmax.f32 %v452_v51, 0.0  ;;  %v455_v56 = vadd.f32 %v786_v52, %v969_v37 }
 0x101   : > { %v490_v58 = vmul.f32 %v971_v45, %v473_v53  ;;  %v474_v59 = vmax.f32 %v423_v54, 0.0  ;;  %v763_v60 = vpop.f32.mrb[4].mxu0  ;;  %v498_v61 = vmul.f32 %v971_v45, %v481_v55  ;;  %v482_v62 = vmax.f32 %v455_v56, 0.0  ;;  %v787_v63 = vpop.f32.mrb[4].mxu1 }
 0x102   : > { %v764_v0 = vpop.f32.mrb[5].mxu0  ;;  %v788_v1 = vpop.f32.mrb[5].mxu1 }
 0x103   : > { %v491_v2 = vmul.f32 %v971_v45, %v474_v59  ;;  %v765_v3 = vadd.f32 %v764_v0, %v763_v60  ;;  %v766_v4 = vpop.f32.mrb[6].mxu0  ;;  %v790_v5 = vpop.f32.mrb[6].mxu1  ;;  %v507_v6 = vadd.f32 %v977_v57, %v490_v58  ;;  %v515_v7 = vadd.f32 %v977_v57, %v498_v61 }
 0x104   : > { %v499_v8 = vmul.f32 %v971_v45, %v482_v62  ;;  %v767_v9 = vpop.f32.mrb[7].mxu0  ;;  %v789_v10 = vadd.f32 %v788_v1, %v787_v63  ;;  %v791_v11 = vpop.f32.mrb[7].mxu1 }
 0x105   : > { %v508_v12 = vadd.f32 %v977_v57, %v491_v2  ;;  %v428_v13 = vadd.f32 %v765_v3, %v969_v37  ;;  %v768_v14 = vadd.f32 %v767_v9, %v766_v4  ;;  %v792_v15 = vadd.f32 %v791_v11, %v790_v5 }
 0x106   : > { %v516_v16 = vadd.f32 %v977_v57, %v499_v8  ;;  %v460_v17 = vadd.f32 %v789_v10, %v969_v37 }
 0x107   : > { %v709_v18 = vpack.c.bf16 %v508_v12, %v507_v6  ;;  %v475_v19 = vmax.f32 %v428_v13, 0.0  ;;  %v431_v20 = vadd.f32 %v768_v14, %v969_v37  ;;  %v463_v21 = vadd.f32 %v792_v15, %v969_v37 }
 0x108   : > { %v729_v22 = vpack.c.bf16 %v516_v16, %v515_v7  ;;  %v483_v23 = vmax.f32 %v460_v17, 0.0 }
 0x109   : > { %710 = vst [vmem:[%s991_s29] sm:$0xff] %v709_v18   ;;  %v492_v24 = vmul.f32 %v971_v45, %v475_v19  ;;  %v476_v25 = vmax.f32 %v431_v20, 0.0  ;;  %v769_v26 = vpop.f32.mrb[8].mxu0  ;;  %v484_v27 = vmax.f32 %v463_v21, 0.0  ;;  %v793_v28 = vpop.f32.mrb[8].mxu1 }
 0x10a   : > { %739 = vst [vmem:[%s991_s29 + $0x20] sm:$0xff] %v729_v22   ;;  %v500_v29 = vmul.f32 %v971_v45, %v483_v23  ;;  %v770_v30 = vpop.f32.mrb[9].mxu0  ;;  %v794_v31 = vpop.f32.mrb[9].mxu1 }
 0x10b   : > { %v493_v32 = vmul.f32 %v971_v45, %v476_v25  ;;  %v771_v33 = vadd.f32 %v770_v30, %v769_v26  ;;  %v772_v34 = vpop.f32.mrb[10].mxu0  ;;  %v501_v35 = vmul.f32 %v971_v45, %v484_v27  ;;  %v796_v36 = vpop.f32.mrb[10].mxu1  ;;  %v509_v38 = vadd.f32 %v977_v57, %v492_v24 }
 0x10c   : > { %v517_v39 = vadd.f32 %v977_v57, %v500_v29  ;;  %v773_v40 = vpop.f32.mrb[11].mxu0  ;;  %v795_v41 = vadd.f32 %v794_v31, %v793_v28  ;;  %v797_v42 = vpop.f32.mrb[11].mxu1 }
 0x10d   : > { %v510_v43 = vadd.f32 %v977_v57, %v493_v32  ;;  %v436_v44 = vadd.f32 %v771_v33, %v969_v37  ;;  %v518_v46 = vadd.f32 %v977_v57, %v501_v35  ;;  %v774_v47 = vadd.f32 %v773_v40, %v772_v34 }
 0x10e   : > { %v468_v48 = vadd.f32 %v795_v41, %v969_v37 }
 0x10f   : > { %v714_v49 = vpack.c.bf16 %v510_v43, %v509_v38  ;;  %v477_v50 = vmax.f32 %v436_v44, 0.0  ;;  %v734_v51 = vpack.c.bf16 %v518_v46, %v517_v39  ;;  %v439_v52 = vadd.f32 %v774_v47, %v969_v37 }
 0x110   : > { %v485_v53 = vmax.f32 %v468_v48, 0.0 }
 0x111   : > { %736 = vst [vmem:[%s991_s29 + $0x8] sm:$0xff] %v714_v49   ;;  %v494_v54 = vmul.f32 %v971_v45, %v477_v50  ;;  %740 = vst [vmem:[%s991_s29 + $0x28] sm:$0xff] %v734_v51   ;;  %v478_v55 = vmax.f32 %v439_v52, 0.0  ;;  %v775_v56 = vpop.f32.mrb[12].mxu0 }
 0x112   : > { %v502_v58 = vmul.f32 %v971_v45, %v485_v53  ;;  %v776_v59 = vpop.f32.mrb[13].mxu0 }
 0x113   : > { %v495_v60 = vmul.f32 %v971_v45, %v478_v55  ;;  %v777_v61 = vadd.f32 %v776_v59, %v775_v56  ;;  %v778_v62 = vpop.f32.mrb[14].mxu0  ;;  %v511_v1 = vadd.f32 %v977_v57, %v494_v54 }
 0x114   : > { %v519_v63 = vadd.f32 %v977_v57, %v502_v58  ;;  %v779_v0 = vpop.f32.mrb[15].mxu0 }
 0x115   : > { %v512_v2 = vadd.f32 %v977_v57, %v495_v60  ;;  %v444_v3 = vadd.f32 %v777_v61, %v969_v37  ;;  %v780_v4 = vadd.f32 %v779_v0, %v778_v62 }
 0x116   : > { %v705_v5 = vpack.c.bf16 %v519_v63, %v519_v63 }
 0x117   : > { %v719_v6 = vpack.c.bf16 %v512_v2, %v511_v1  ;;  %v479_v7 = vmax.f32 %v444_v3, 0.0  ;;  %v447_v8 = vadd.f32 %v780_v4, %v969_v37 }
 0x118   : > { %585 = vst [vmem:[%s991_s29 + $0x30] sm:$0x3] %v705_v5 }
 0x119   : > { %737 = vst [vmem:[%s991_s29 + $0x10] sm:$0xff] %v719_v6   ;;  %v496_v9 = vmul.f32 %v971_v45, %v479_v7  ;;  %v480_v10 = vmax.f32 %v447_v8, 0.0 }
 0x11b   : > { %v497_v11 = vmul.f32 %v971_v45, %v480_v10  ;;  %v513_v12 = vadd.f32 %v977_v57, %v496_v9 }
 0x11d   : > { %v514_v13 = vadd.f32 %v977_v57, %v497_v11 }
 0x11f   : > { %v724_v14 = vpack.c.bf16 %v514_v13, %v513_v12 }
 0x121   : > { %738 = vst [vmem:[%s991_s29 + $0x18] sm:$0xff] %v724_v14  }
 0x122 PF: > { %s13_s12 = sadd.s32 1, %s867_s12  }
 0x123   : > { %p10_p4 = scmp.ge.s32.totalorder %s13_s12, 4  }
 0x125   :  { %12 = sbr.rel (!%p10_p4) target bundleno = 1 (0x1), region = 62 }

// kernel: gaze_prediction_forward.11
= control target key start
LH: loop header
LB: loop body
LE: loop exit
PB: predicated region body
PF: predicated region fallthrough
CT: control target
= control target key end

     0   :  { %s1885_s12 = smov 0   ;;  %s2943_s0 = inlined_call_operand.vmem [shape: bf16[2,441,128], index: 0, kind: input, shape index: {}]   ;;  %s2944_s1 = inlined_call_operand.vmem [shape: bf16[128,128], index: 1, kind: input, shape index: {}]   ;;  %s2945_s2 = inlined_call_operand.vmem [shape: f32[1,128], index: 2, kind: input, shape index: {}]   ;;  %s2946_s3 = inlined_call_operand.vmem [shape: f32[2,441,128], index: 3, kind: output, shape index: {}]  }
   0x1 LB: > { %s1527_s13 = sadd.s32 4294967295, %s1863_s12   ;;  %p1531_p0 = scmp.ge.s32.totalorder %s1863_s12, 1  ;;  %s1863_s12 = sphi %s1885_s12, %s13_s12  }
   0x2   : > { %p137_p1 = scmp.lt.s32.totalorder %s1863_s12, 3 }
   0x4   : > { %p138_p2 = pnand %p1531_p0, %p137_p1 }
   0x6   : > { %141 = sbr.rel (%p138_p2) target bundleno = 857 (0x359), region = 32 }
   0xd   : > { %v1707_v0 = vld [vmem:[%s2944_s1] sm:$0xff]   ;;  %p161_p3 = scmp.lt.s32.totalorder %s1527_s13, 1  ;;  %v1708_v1 = vld [vmem:[%s2944_s1 + $0x8] sm:$0xff]   ;;  %v1709_v2 = vld [vmem:[%s2944_s1 + $0x10] sm:$0xff]   ;;  %v724_v36 = vlaneseq  ;;  %vm893_vm1 = vcmask 1040384  }
   0xe   : > { %1609 = vmatprep.subr.bf16.mxu0 %v1707_v0  ;;  %1681 = vmatprep.subr.bf16.mxu1 %v1707_v0  ;;  %v1710_v3 = vld [vmem:[%s2944_s1 + $0x18] sm:$0xff]   ;;  %v1711_v6 = vld [vmem:[%s2944_s1 + $0x20] sm:$0xff]   ;;  %v1712_v7 = vld [vmem:[%s2944_s1 + $0x28] sm:$0xff]  }
   0xf   : > { %s3156_s13 = smov (!%p161_p3, %s1527_s13), 1  ;;  %1610 = vmatpush3.bf16.msra.mxu0 %v1707_v0  ;;  %1689 = vmatpush3.bf16.msra.mxu1 %v1707_v0  ;;  %v1713_v8 = vld [vmem:[%s2944_s1 + $0x30] sm:$0xff]   ;;  %v1714_v9 = vld [vmem:[%s2944_s1 + $0x38] sm:$0xff]   ;;  %v1953_v37 = vand.u32 127, %v724_v36  ;;  %v1958_v38 = vld [vmem:[%s2945_s2] ss:$0 sm:$0xff] }
  0x10   : > { %1611 = vmatprep.subr.bf16.mxu0 %v1708_v1  ;;  %1682 = vmatprep.subr.bf16.mxu1 %v1708_v1  ;;  %s1697_s20 = smul.u32 224, %s3156_s13 }
  0x11   : > { %3017 = vst [vmem:[#allocation2_spill] sm:$0xff] %v1953_v37  ;;  %vm726_vm0 = vcmp.lt.s32.totalorder %v1953_v37, 16  ;;  %s1698_s9 = smul.u32 448, %s3156_s13 }
  0x12   : > { %s1908_s23 = scalar_lea.vmem %s2943_s0, %s1697_s20 }
  0x13   : > { %1612 = vmatpush3.bf16.msra.mxu0 %v1708_v1  ;;  %1690 = vmatpush3.bf16.msra.mxu1 %v1708_v1  ;;  %v1715_v4 = vld [vmem:[%s1908_s23] sm:$0xff]   ;;  %v1716_v5 = vld [vmem:[%s1908_s23 + $0x70] sm:$0xff]   ;;  %v1717_v10 = vld [vmem:[%s1908_s23 + $0x8] sm:$0xff]   ;;  %s2770_s14 = scalar_lea.vmem %s2946_s3, %s1698_s9 }
  0x14   : > { %1613 = vmatprep.subr.bf16.mxu0 %v1709_v2  ;;  %1683 = vmatprep.subr.bf16.mxu1 %v1709_v2  ;;  %v1718_v11 = vld [vmem:[%s1908_s23 + $0x78] sm:$0xff]   ;;  %v1719_v12 = vld [vmem:[%s1908_s23 + $0x10] sm:$0xff]   ;;  %v1721_v13 = vld [vmem:[%s1908_s23 + $0x80] sm:$0xff]  }
  0x15   : > { %1625 = vmatprep.mubr.bf16.mxu0 %v1715_v4  ;;  %1653 = vmatprep.mubr.bf16.mxu1 %v1716_v5  ;;  %v1720_v14 = vld [vmem:[%s1908_s23 + $0x18] sm:$0xff]   ;;  %v1722_v15 = vld [vmem:[%s1908_s23 + $0x88] sm:$0xff]   ;;  %v1723_v16 = vld [vmem:[%s1908_s23 + $0x20] sm:$0xff]  }
  0x16   : > { %v1725_v17 = vld [vmem:[%s1908_s23 + $0x90] sm:$0xff]   ;;  %v1724_v18 = vld [vmem:[%s1908_s23 + $0x28] sm:$0xff]   ;;  %v1726_v19 = vld [vmem:[%s1908_s23 + $0x98] sm:$0xff]  }
  0x17   : > { %1614 = vmatpush3.bf16.msra.mxu0 %v1709_v2  ;;  %1691 = vmatpush3.bf16.msra.mxu1 %v1709_v2  ;;  %v1727_v20 = vld [vmem:[%s1908_s23 + $0x30] sm:$0xff]   ;;  %v1729_v21 = vld [vmem:[%s1908_s23 + $0xa0] sm:$0xff]   ;;  %v1728_v22 = vld [vmem:[%s1908_s23 + $0x38] sm:$0xff]  }
  0x18   : > { %1615 = vmatprep.subr.bf16.mxu0 %v1710_v3  ;;  %1684 = vmatprep.subr.bf16.mxu1 %v1710_v3  ;;  %v1730_v23 = vld [vmem:[%s1908_s23 + $0xa8] sm:$0xff]   ;;  %v1731_v24 = vld [vmem:[%s1908_s23 + $0x40] sm:$0xff]   ;;  %v1733_v25 = vld [vmem:[%s1908_s23 + $0xb0] sm:$0xff]  }
  0x19   : > { %v1732_v26 = vld [vmem:[%s1908_s23 + $0x48] sm:$0xff]   ;;  %v1734_v27 = vld [vmem:[%s1908_s23 + $0xb8] sm:$0xff]   ;;  %v1735_v28 = vld [vmem:[%s1908_s23 + $0x50] sm:$0xff]  }
  0x1a   : > { %v1739_v29 = vld [vmem:[%s1908_s23 + $0xc0] sm:$0xff]   ;;  %v1736_v30 = vld [vmem:[%s1908_s23 + $0x58] sm:$0xff]   ;;  %v1740_v31 = vld [vmem:[%s1908_s23 + $0xc8] sm:$0xff]  }
  0x1b   : > { %1616 = vmatpush3.bf16.msra.mxu0 %v1710_v3  ;;  %1692 = vmatpush3.bf16.msra.mxu1 %v1710_v3  ;;  %v1737_v32 = vld [vmem:[%s1908_s23 + $0x60] sm:$0xff]   ;;  %v1741_v33 = vld [vmem:[%s1908_s23 + $0xd0] sm:$0xff]   ;;  %v1738_v34 = vld [vmem:[%s1908_s23 + $0x68] sm:$0xff]  }
  0x1c   : > { %1617 = vmatprep.subr.bf16.mxu0 %v1711_v6  ;;  %1685 = vmatprep.subr.bf16.mxu1 %v1711_v6  ;;  %v1742_v35 = vld [vmem:[%s1908_s23 + $0xd8] sm:$0x1f]  }
  0x1f   : > { %1618 = vmatpush3.bf16.msra.mxu0 %v1711_v6  ;;  %1693 = vmatpush3.bf16.msra.mxu1 %v1711_v6 }
  0x20   : > { %1619 = vmatprep.subr.bf16.mxu0 %v1712_v7  ;;  %1686 = vmatprep.subr.bf16.mxu1 %v1712_v7 }
  0x23   : > { %1620 = vmatpush3.bf16.msra.mxu0 %v1712_v7  ;;  %1694 = vmatpush3.bf16.msra.mxu1 %v1712_v7 }
  0x24   : > { %1621 = vmatprep.subr.bf16.mxu0 %v1713_v8  ;;  %1687 = vmatprep.subr.bf16.mxu1 %v1713_v8 }
  0x27   : > { %1622 = vmatpush3.bf16.msra.mxu0 %v1713_v8  ;;  %1695 = vmatpush3.bf16.msra.mxu1 %v1713_v8 }
  0x28   : > { %1623 = vmatprep.subr.bf16.mxu0 %v1714_v9  ;;  %1688 = vmatprep.subr.bf16.mxu1 %v1714_v9 }
  0x2b   : > { %1624 = vmatpush3.bf16.msra.mxu0 %v1714_v9  ;;  %1696 = vmatpush3.bf16.msra.mxu1 %v1714_v9 }
  0x2e   : > { %1626 = vmatmul.mubr.bf16.vlgmr.msra.gmra.mrb[0].mxu0 %v1717_v10  ;;  %1654 = vmatmul.mubr.bf16.vlgmr.msra.gmra.mrb[0].mxu1 %v1718_v11 }
  0x2f   : > { %1629 = vmatprep.mubr.bf16.mxu0 %v1719_v12  ;;  %1657 = vmatprep.mubr.bf16.mxu1 %v1721_v13 }
  0x36   : > { %1630 = vmatmul.mubr.bf16.gmra.mrb[4].mxu0 %v1720_v14  ;;  %1658 = vmatmul.mubr.bf16.gmra.mrb[4].mxu1 %v1722_v15 }
  0x37   : > { %1633 = vmatprep.mubr.bf16.mxu0 %v1723_v16  ;;  %1661 = vmatprep.mubr.bf16.mxu1 %v1725_v17 }
  0x3e   : > { %1634 = vmatmul.mubr.bf16.gmra.mrb[8].mxu0 %v1724_v18  ;;  %1662 = vmatmul.mubr.bf16.gmra.mrb[8].mxu1 %v1726_v19 }
  0x3f   : > { %1637 = vmatprep.mubr.bf16.mxu0 %v1727_v20  ;;  %1665 = vmatprep.mubr.bf16.mxu1 %v1729_v21 }
  0x46   : > { %1638 = vmatmul.mubr.bf16.gmra.mrb[12].mxu0 %v1728_v22  ;;  %1666 = vmatmul.mubr.bf16.gmra.mrb[12].mxu1 %v1730_v23 }
  0x47   : > { %1641 = vmatprep.mubr.bf16.mxu0 %v1731_v24  ;;  %1669 = vmatprep.mubr.bf16.mxu1 %v1733_v25 }
  0x4e   : > { %1642 = vmatmul.mubr.bf16.gmra.mrb[16].mxu0 %v1732_v26  ;;  %1670 = vmatmul.mubr.bf16.gmra.mrb[16].mxu1 %v1734_v27 }
  0x4f   : > { %1645 = vmatprep.mubr.bf16.mxu0 %v1735_v28  ;;  %1673 = vmatprep.mubr.bf16.mxu1 %v1739_v29 }
  0x56   : > { %1646 = vmatmul.mubr.bf16.gmra.mrb[20].mxu0 %v1736_v30  ;;  %1674 = vmatmul.mubr.bf16.gmra.mrb[20].mxu1 %v1740_v31 }
  0x57   : > { %1649 = vmatprep.mubr.bf16.mxu0 %v1737_v32  ;;  %1677 = vmatprep.mubr.bf16.mxu1 %v1741_v33 }
  0x5e   : > { %1650 = vmatmul.mubr.bf16.gmra.mrb[24].mxu0 %v1738_v34  ;;  %1678 = vmatmul.mubr.bf16.gmra.mrb[24].mxu1 %v1742_v35 }
 0x101   : > { %v1627_v39 = vpop.f32.mrb[0].mxu0  ;;  %v1655_v40 = vpop.f32.mrb[0].mxu1 }
 0x102   : > { %v1962_v41 = vadd.f32 %v1627_v39, %v1958_v38  ;;  %v1965_v42 = vadd.f32 %v1655_v40, %v1958_v38  ;;  %v501_v43 = vpop.f32.mrb[1].mxu0  ;;  %v613_v44 = vpop.f32.mrb[1].mxu1 }
 0x103   : > { %v1628_v45 = vpop.f32.mrb[2].mxu0  ;;  %v1656_v46 = vpop.f32.mrb[2].mxu1  ;;  %v1968_v47 = vadd.f32 %v1958_v38, %v501_v43  ;;  %v1980_v53 = vadd.f32 %v1958_v38, %v613_v44 }
 0x104   : > { %3018 = vst [vmem:[#allocation3_spill] sm:$0xff] %v1965_v42  ;;  %v1971_v48 = vadd.f32 %v1628_v45, %v1958_v38  ;;  %v504_v49 = vpop.f32.mrb[3].mxu0  ;;  %v616_v50 = vpop.f32.mrb[3].mxu1  ;;  %v757_v51 = vsel %vm726_vm0, %v1965_v42, -1e+30  ;;  %v1983_v54 = vadd.f32 %v1656_v46, %v1958_v38 }
 0x105   : > { %v729_v52 = vsel %vm726_vm0, %v1962_v41, -1e+30  ;;  %843 = vmax.xlane.f32.xlu0 %v757_v51  ;;  %3019 = vst [vmem:[#allocation4_spill] sm:$0xff] %v1980_v53  ;;  %v727_v56 = vsel %vm726_vm0, %v1968_v47, -1e+30  ;;  %v1992_v63 = vadd.f32 %v1958_v38, %v504_v49  ;;  %v1995_v0 = vadd.f32 %v1958_v38, %v616_v50 }
 0x106   : > { %787 = vmax.xlane.f32.xlu1 %v729_v52  ;;  %3020 = vst [vmem:[#allocation5_spill] sm:$0xff] %v1983_v54  ;;  %v730_v55 = vsel %vm726_vm0, %v1971_v48, -1e+30  ;;  %v758_v1 = vsel %vm726_vm0, %v1983_v54, -1e+30 }
 0x107   : > { %3021 = vst [vmem:[#allocation6_spill] sm:$0xff] %v1995_v0  ;;  %v755_v2 = vsel %vm726_vm0, %v1980_v53, -1e+30  ;;  %v756_v7 = vsel %vm726_vm0, %v1995_v0, -1e+30 }
 0x108   : > { %v728_v8 = vsel %vm726_vm0, %v1992_v63, -1e+30 }
 0x109   : > { %783 = vmax.xlane.f32.xlu0 %v727_v56  ;;  %v1631_v57 = vpop.f32.mrb[4].mxu0  ;;  %v1659_v58 = vpop.f32.mrb[4].mxu1 }
 0x10a   : > { %789 = vmax.xlane.f32.xlu1 %v730_v55  ;;  %v517_v59 = vpop.f32.mrb[5].mxu0  ;;  %v629_v60 = vpop.f32.mrb[5].mxu1  ;;  %v2004_v5 = vadd.f32 %v1631_v57, %v1958_v38  ;;  %v2018_v15 = vadd.f32 %v1659_v58, %v1958_v38 }
 0x10b   : > { %v1632_v61 = vpop.f32.mrb[6].mxu0  ;;  %v1660_v62 = vpop.f32.mrb[6].mxu1  ;;  %v2032_v21 = vadd.f32 %v1958_v38, %v517_v59  ;;  %v2056_v31 = vadd.f32 %v1958_v38, %v629_v60 }
 0x10c   : > { %v520_v3 = vpop.f32.mrb[7].mxu0  ;;  %v632_v4 = vpop.f32.mrb[7].mxu1  ;;  %3022 = vst [vmem:[#allocation7_spill] sm:$0xff] %v2004_v5  ;;  %v2007_v6 = vadd.f32 %v1632_v61, %v1958_v38  ;;  %3024 = vst [vmem:[#allocation9_spill] sm:$0xff] %v2018_v15  ;;  %v2021_v16 = vadd.f32 %v1660_v62, %v1958_v38  ;;  %v733_v18 = vsel %vm726_vm0, %v2004_v5, -1e+30 }
 0x10d   : > { %839 = vmax.xlane.f32.xlu0 %v755_v2  ;;  %3026 = vst [vmem:[#allocation11_spill] sm:$0xff] %v2032_v21  ;;  %v2035_v22 = vadd.f32 %v1958_v38, %v520_v3  ;;  %v761_v24 = vsel %vm726_vm0, %v2018_v15, -1e+30  ;;  %3028 = vst [vmem:[#allocation13_spill] sm:$0xff] %v2056_v31  ;;  %v2059_v32 = vadd.f32 %v1958_v38, %v632_v4  ;;  %v731_v34 = vsel %vm726_vm0, %v2032_v21, -1e+30 }
 0x10e   : > { %845 = vmax.xlane.f32.xlu1 %v758_v1  ;;  %3023 = vst [vmem:[#allocation8_spill] sm:$0xff] %v2007_v6  ;;  %3025 = vst [vmem:[#allocation10_spill] sm:$0xff] %v2021_v16  ;;  %v734_v17 = vsel %vm726_vm0, %v2007_v6, -1e+30  ;;  %v762_v23 = vsel %vm726_vm0, %v2021_v16, -1e+30 }
 0x10f   : > { %3027 = vst [vmem:[#allocation12_spill] sm:$0xff] %v2035_v22  ;;  %3029 = vst [vmem:[#allocation14_spill] sm:$0xff] %v2059_v32  ;;  %v732_v33 = vsel %vm726_vm0, %v2035_v22, -1e+30  ;;  %v760_v43 = vsel %vm726_vm0, %v2059_v32, -1e+30 }
 0x110   : > { %v759_v44 = vsel %vm726_vm0, %v2056_v31, -1e+30 }
 0x111   : > { %785 = vmax.xlane.f32.xlu0 %v728_v8  ;;  %v1635_v9 = vpop.f32.mrb[8].mxu0  ;;  %v1663_v10 = vpop.f32.mrb[8].mxu1 }
 0x112   : > { %841 = vmax.xlane.f32.xlu1 %v756_v7  ;;  %v533_v11 = vpop.f32.mrb[9].mxu0  ;;  %v2015_v12 = vpop.f32.mrb[9].mxu1  ;;  %v2072_v39 = vadd.f32 %v1635_v9, %v1958_v38  ;;  %v2090_v55 = vadd.f32 %v1663_v10, %v1958_v38 }
 0x113   : > { %v1636_v13 = vpop.f32.mrb[10].mxu0  ;;  %v1664_v14 = vpop.f32.mrb[10].mxu1  ;;  %v2120_v9 = vadd.f32 %v1958_v38, %v533_v11 }
 0x114   : > { %v536_v19 = vpop.f32.mrb[11].mxu0  ;;  %v2029_v20 = vpop.f32.mrb[11].mxu1  ;;  %3030 = vst [vmem:[#allocation15_spill] sm:$0xff] %v2072_v39  ;;  %v2075_v40 = vadd.f32 %v1636_v13, %v1958_v38  ;;  %3034 = vst [vmem:[#allocation19_spill] sm:$0xff] %v2090_v55  ;;  %v2093_v56 = vadd.f32 %v1664_v14, %v1958_v38  ;;  %v737_v62 = vsel %vm726_vm0, %v2072_v39, -1e+30 }
 0x115   : > { %795 = vmax.xlane.f32.xlu0 %v733_v18  ;;  %3042 = vst [vmem:[#allocation27_spill] sm:$0xff] %v2120_v9  ;;  %v2123_v10 = vadd.f32 %v1958_v38, %v536_v19  ;;  %v765_v14 = vsel %vm726_vm0, %v2090_v55, -1e+30 }
 0x116   : > { %797 = vmax.xlane.f32.xlu1 %v734_v17  ;;  %3031 = vst [vmem:[#allocation16_spill] sm:$0xff] %v2075_v40  ;;  %3035 = vst [vmem:[#allocation20_spill] sm:$0xff] %v2093_v56  ;;  %v738_v61 = vsel %vm726_vm0, %v2075_v40, -1e+30  ;;  %v766_v13 = vsel %vm726_vm0, %v2093_v56, -1e+30 }
 0x117   : > { %3043 = vst [vmem:[#allocation28_spill] sm:$0xff] %v2123_v10 }
 0x119   : > { %851 = vmax.xlane.f32.xlu0 %v761_v24  ;;  %v2043_v25 = vpop.f32.mrb[12].mxu0  ;;  %v2045_v26 = vpop.f32.mrb[12].mxu1 }
 0x11a   : > { %853 = vmax.xlane.f32.xlu1 %v762_v23  ;;  %v2047_v27 = vpop.f32.mrb[13].mxu0  ;;  %v2049_v28 = vpop.f32.mrb[13].mxu1 }
 0x11b   : > { %v2051_v29 = vpop.f32.mrb[14].mxu0  ;;  %v2053_v30 = vpop.f32.mrb[14].mxu1  ;;  %v2223_v55 = vadd.f32 %v1958_v38, %v2047_v27 }
 0x11c   : > { %v2067_v35 = vpop.f32.mrb[15].mxu0  ;;  %v2069_v36 = vpop.f32.mrb[15].mxu1 }
 0x11d   : > { %791 = vmax.xlane.f32.xlu0 %v731_v34  ;;  %v2143_v34 = vadd.f32 %v1958_v38, %v2029_v20  ;;  %3066 = vst [vmem:[#allocation51_spill] sm:$0xff] %v2223_v55  ;;  %v2241_v27 = vadd.f32 %v1958_v38, %v2069_v36 }
 0x11e   : > { %793 = vmax.xlane.f32.xlu1 %v732_v33  ;;  %v2139_v33 = vadd.f32 %v1958_v38, %v2015_v12  ;;  %v735_v12 = vsel %vm726_vm0, %v2120_v9, -1e+30 }
 0x11f   : > { %3047 = vst [vmem:[#allocation32_spill] sm:$0xff] %v2143_v34  ;;  %3069 = vst [vmem:[#allocation54_spill] sm:$0xff] %v2241_v27 }
 0x120   : > { %3046 = vst [vmem:[#allocation31_spill] sm:$0xff] %v2139_v33 }
 0x121   : > { %847 = vmax.xlane.f32.xlu0 %v759_v44  ;;  %v1643_v45 = vpop.f32.mrb[16].mxu0  ;;  %v1671_v46 = vpop.f32.mrb[16].mxu1 }
 0x122   : > { %849 = vmax.xlane.f32.xlu1 %v760_v43  ;;  %v2084_v49 = vadd.f32 %v1643_v45, %v1958_v38  ;;  %v565_v50 = vpop.f32.mrb[17].mxu0  ;;  %v2087_v51 = vadd.f32 %v1671_v46, %v1958_v38  ;;  %v677_v52 = vpop.f32.mrb[17].mxu1 }
 0x123   : > { %v2096_v57 = vadd.f32 %v1958_v38, %v565_v50  ;;  %v1644_v58 = vpop.f32.mrb[18].mxu0  ;;  %v2099_v59 = vadd.f32 %v1958_v38, %v677_v52  ;;  %v1672_v60 = vpop.f32.mrb[18].mxu1  ;;  %v736_v50 = vsel %vm726_vm0, %v2123_v10, -1e+30 }
 0x124   : > { %3032 = vst [vmem:[#allocation17_spill] sm:$0xff] %v2084_v49  ;;  %3033 = vst [vmem:[#allocation18_spill] sm:$0xff] %v2087_v51  ;;  %v2108_v1 = vadd.f32 %v1644_v58, %v1958_v38  ;;  %v568_v2 = vpop.f32.mrb[19].mxu0  ;;  %v2111_v3 = vadd.f32 %v1672_v60, %v1958_v38  ;;  %v680_v4 = vpop.f32.mrb[19].mxu1  ;;  %v745_v36 = vsel %vm726_vm0, %v2084_v49, -1e+30 }
 0x125   : > { %3036 = vst [vmem:[#allocation21_spill] sm:$0xff] %v2096_v57  ;;  %3037 = vst [vmem:[#allocation22_spill] sm:$0xff] %v2099_v59  ;;  %803 = vmax.xlane.f32.xlu0 %v737_v62  ;;  %v2114_v7 = vadd.f32 %v1958_v38, %v568_v2  ;;  %v2117_v8 = vadd.f32 %v1958_v38, %v680_v4  ;;  %v2171_v2 = vadd.f32 %v2043_v25, %v1958_v38 }
 0x126   : > { %3038 = vst [vmem:[#allocation23_spill] sm:$0xff] %v2108_v1  ;;  %3039 = vst [vmem:[#allocation24_spill] sm:$0xff] %v2111_v3  ;;  %805 = vmax.xlane.f32.xlu1 %v738_v61  ;;  %v2175_v4 = vadd.f32 %v2051_v29, %v1958_v38 }
 0x127   : > { %3040 = vst [vmem:[#allocation25_spill] sm:$0xff] %v2114_v7  ;;  %3041 = vst [vmem:[#allocation26_spill] sm:$0xff] %v2117_v8 }
 0x128   : > { %3054 = vst [vmem:[#allocation39_spill] sm:$0xff] %v2171_v2  ;;  %3055 = vst [vmem:[#allocation40_spill] sm:$0xff] %v2175_v4 }
 0x129   : > { %859 = vmax.xlane.f32.xlu0 %v765_v14  ;;  %v1647_v17 = vpop.f32.mrb[20].mxu0  ;;  %v1675_v18 = vpop.f32.mrb[20].mxu1  ;;  %v763_v14 = vsel %vm726_vm0, %v2139_v33, -1e+30 }
 0x12a   : > { %861 = vmax.xlane.f32.xlu1 %v766_v13  ;;  %v2132_v23 = vadd.f32 %v1647_v17, %v1958_v38  ;;  %v581_v11 = vpop.f32.mrb[21].mxu0  ;;  %v2135_v24 = vadd.f32 %v1675_v18, %v1958_v38  ;;  %v693_v19 = vpop.f32.mrb[21].mxu1  ;;  %v764_v13 = vsel %vm726_vm0, %v2143_v34, -1e+30 }
 0x12b   : > { %v2146_v43 = vadd.f32 %v1958_v38, %v581_v11  ;;  %v1648_v44 = vpop.f32.mrb[22].mxu0  ;;  %v2149_v45 = vadd.f32 %v1958_v38, %v693_v19  ;;  %v1676_v46 = vpop.f32.mrb[22].mxu1 }
 0x12c   : > { %3044 = vst [vmem:[#allocation29_spill] sm:$0xff] %v2132_v23  ;;  %3045 = vst [vmem:[#allocation30_spill] sm:$0xff] %v2135_v24  ;;  %v2158_v52 = vadd.f32 %v1648_v44, %v1958_v38  ;;  %v584_v20 = vpop.f32.mrb[23].mxu0  ;;  %v2161_v58 = vadd.f32 %v1676_v46, %v1958_v38  ;;  %v696_v60 = vpop.f32.mrb[23].mxu1  ;;  %v2191_v44 = vadd.f32 %v2045_v26, %v1958_v38  ;;  %v741_v26 = vsel %vm726_vm0, %v2171_v2, -1e+30 }
 0x12d   : > { %3048 = vst [vmem:[#allocation33_spill] sm:$0xff] %v2146_v43  ;;  %3049 = vst [vmem:[#allocation34_spill] sm:$0xff] %v2149_v45  ;;  %799 = vmax.xlane.f32.xlu0 %v735_v12  ;;  %v2164_v61 = vadd.f32 %v1958_v38, %v584_v20  ;;  %v2167_v62 = vadd.f32 %v1958_v38, %v696_v60  ;;  %v2195_v46 = vadd.f32 %v2053_v30, %v1958_v38 }
 0x12e   : > { %3050 = vst [vmem:[#allocation35_spill] sm:$0xff] %v2158_v52  ;;  %3051 = vst [vmem:[#allocation36_spill] sm:$0xff] %v2161_v58  ;;  %801 = vmax.xlane.f32.xlu1 %v736_v50 }
 0x12f   : > { %3052 = vst [vmem:[#allocation37_spill] sm:$0xff] %v2164_v61  ;;  %3053 = vst [vmem:[#allocation38_spill] sm:$0xff] %v2167_v62 }
 0x130   : > { %3058 = vst [vmem:[#allocation43_spill] sm:$0xff] %v2191_v44  ;;  %3059 = vst [vmem:[#allocation44_spill] sm:$0xff] %v2195_v46 }
 0x131   : > { %855 = vmax.xlane.f32.xlu0 %v763_v14  ;;  %v1651_v17 = vpop.f32.mrb[24].mxu0  ;;  %v1679_v18 = vpop.f32.mrb[24].mxu1 }
 0x132   : > { %857 = vmax.xlane.f32.xlu1 %v764_v13  ;;  %v2184_v11 = vadd.f32 %v1651_v17, %v1958_v38  ;;  %v597_v25 = vpop.f32.mrb[25].mxu0  ;;  %v2187_v19 = vadd.f32 %v1679_v18, %v1958_v38  ;;  %v709_v29 = vpop.f32.mrb[25].mxu1  ;;  %v742_v13 = vsel %vm726_vm0, %v2175_v4, -1e+30 }
 0x133   : > { %v2198_v50 = vadd.f32 %v1958_v38, %v597_v25  ;;  %v1652_v12 = vpop.f32.mrb[26].mxu0  ;;  %v2201_v20 = vadd.f32 %v1958_v38, %v709_v29  ;;  %v1680_v60 = vpop.f32.mrb[26].mxu1 }
 0x134   : > { %3056 = vst [vmem:[#allocation41_spill] sm:$0xff] %v2184_v11  ;;  %3057 = vst [vmem:[#allocation42_spill] sm:$0xff] %v2187_v19  ;;  %v2210_v14 = vadd.f32 %v1652_v12, %v1958_v38  ;;  %v600_v30 = vpop.f32.mrb[27].mxu0  ;;  %v2213_v17 = vadd.f32 %v1680_v60, %v1958_v38  ;;  %v712_v18 = vpop.f32.mrb[27].mxu1  ;;  %v2227_v12 = vadd.f32 %v1958_v38, %v2067_v35  ;;  %v770_v60 = vsel %vm726_vm0, %v2195_v46, -1e+30 }
 0x135   : > { %3060 = vst [vmem:[#allocation45_spill] sm:$0xff] %v2198_v50  ;;  %3061 = vst [vmem:[#allocation46_spill] sm:$0xff] %v2201_v20  ;;  %811 = vmax.xlane.f32.xlu0 %v741_v26  ;;  %v2216_v25 = vadd.f32 %v1958_v38, %v600_v30  ;;  %v2219_v29 = vadd.f32 %v1958_v38, %v712_v18  ;;  %v2237_v26 = vadd.f32 %v1958_v38, %v2049_v28 }
 0x136   : > { %3062 = vst [vmem:[#allocation47_spill] sm:$0xff] %v2210_v14  ;;  %3063 = vst [vmem:[#allocation48_spill] sm:$0xff] %v2213_v17  ;;  %813 = vmax.xlane.f32.xlu1 %v742_v13  ;;  %v769_v13 = vsel %vm726_vm0, %v2191_v44, -1e+30  ;;  %v740_v35 = vsel %vm726_vm0, %v2227_v12, -1e+30 }
 0x137   : > { %3064 = vst [vmem:[#allocation49_spill] sm:$0xff] %v2216_v25  ;;  %3065 = vst [vmem:[#allocation50_spill] sm:$0xff] %v2219_v29  ;;  %v739_v30 = vsel %vm726_vm0, %v2223_v55, -1e+30  ;;  %v768_v18 = vsel %vm726_vm0, %v2241_v27, -1e+30 }
 0x138   : > { %3067 = vst [vmem:[#allocation52_spill] sm:$0xff] %v2227_v12  ;;  %3068 = vst [vmem:[#allocation53_spill] sm:$0xff] %v2237_v26  ;;  %v767_v28 = vsel %vm726_vm0, %v2237_v26, -1e+30  ;;  %v746_v38 = vsel %vm726_vm0, %v2108_v1, -1e+30 }
 0x139   : > { %867 = vmax.xlane.f32.xlu0 %v769_v13  ;;  %v773_v13 = vsel %vm726_vm0, %v2087_v51, -1e+30 }
 0x13a   : > { %869 = vmax.xlane.f32.xlu1 %v770_v60  ;;  %v774_v60 = vsel %vm726_vm0, %v2111_v3, -1e+30 }
 0x13d   : > { %807 = vmax.xlane.f32.xlu0 %v739_v30  ;;  %v743_v30 = vsel %vm726_vm0, %v2096_v57, -1e+30 }
 0x13e   : > { %809 = vmax.xlane.f32.xlu1 %v740_v35  ;;  %v744_v35 = vsel %vm726_vm0, %v2114_v7, -1e+30 }
 0x141   : > { %863 = vmax.xlane.f32.xlu0 %v767_v28  ;;  %v771_v28 = vsel %vm726_vm0, %v2099_v59, -1e+30 }
 0x142   : > { %865 = vmax.xlane.f32.xlu1 %v768_v18  ;;  %v772_v18 = vsel %vm726_vm0, %v2117_v8, -1e+30 }
 0x145   : > { %819 = vmax.xlane.f32.xlu0 %v745_v36  ;;  %v749_v36 = vsel %vm726_vm0, %v2132_v23, -1e+30 }
 0x146   : > { %821 = vmax.xlane.f32.xlu1 %v746_v38  ;;  %v750_v38 = vsel %vm726_vm0, %v2158_v52, -1e+30 }
 0x149   : > { %875 = vmax.xlane.f32.xlu0 %v773_v13  ;;  %v747_v13 = vsel %vm726_vm0, %v2146_v43, -1e+30 }
 0x14a   : > { %877 = vmax.xlane.f32.xlu1 %v774_v60  ;;  %v748_v60 = vsel %vm726_vm0, %v2164_v61, -1e+30 }
 0x14d   : > { %815 = vmax.xlane.f32.xlu0 %v743_v30  ;;  %v753_v30 = vsel %vm726_vm0, %v2184_v11, -1e+30 }
 0x14e   : > { %817 = vmax.xlane.f32.xlu1 %v744_v35  ;;  %v754_v35 = vsel %vm726_vm0, %v2210_v14, -1e+30 }
 0x151   : > { %871 = vmax.xlane.f32.xlu0 %v771_v28  ;;  %v751_v28 = vsel %vm726_vm0, %v2198_v50, -1e+30 }
 0x152   : > { %873 = vmax.xlane.f32.xlu1 %v772_v18  ;;  %v752_v18 = vsel %vm726_vm0, %v2216_v25, -1e+30 }
 0x155   : > { %827 = vmax.xlane.f32.xlu0 %v749_v36  ;;  %v775_v36 = vsel %vm726_vm0, %v2149_v45, -1e+30 }
 0x156   : > { %829 = vmax.xlane.f32.xlu1 %v750_v38  ;;  %v776_v38 = vsel %vm726_vm0, %v2167_v62, -1e+30 }
 0x159   : > { %823 = vmax.xlane.f32.xlu0 %v747_v13  ;;  %v777_v13 = vsel %vm726_vm0, %v2135_v24, -1e+30 }
 0x15a   : > { %825 = vmax.xlane.f32.xlu1 %v748_v60  ;;  %v778_v60 = vsel %vm726_vm0, %v2161_v58, -1e+30 }
 0x15d   : > { %835 = vmax.xlane.f32.xlu0 %v753_v30  ;;  %v779_v30 = vsel %vm726_vm0, %v2201_v20, -1e+30 }
 0x15e   : > { %837 = vmax.xlane.f32.xlu1 %v754_v35  ;;  %v782_v35 = vsel %vm726_vm0, %v2213_v17, -1e+30 }
 0x161   : > { %831 = vmax.xlane.f32.xlu0 %v751_v28  ;;  %v781_v28 = vsel %vm726_vm0, %v2187_v19, -1e+30 }
 0x162   : > { %833 = vmax.xlane.f32.xlu1 %v752_v18  ;;  %v894_v18 = vsel %vm893_vm1, %v782_v35, -inf }
 0x165   : > { %879 = vmax.xlane.f32.xlu0 %v775_v36 }
 0x166   : > { %881 = vmax.xlane.f32.xlu1 %v776_v38  ;;  %v780_v38 = vsel %vm726_vm0, %v2219_v29, -1e+30 }
 0x169   : > { %883 = vmax.xlane.f32.xlu0 %v777_v13 }
 0x16a   : > { %885 = vmax.xlane.f32.xlu1 %v778_v60 }
 0x16d   : > { %895 = vmax.xlane.f32.xlu0 %v894_v18 }
 0x16e   : > { %887 = vmax.xlane.f32.xlu1 %v779_v30 }
 0x171   : > { %889 = vmax.xlane.f32.xlu0 %v780_v38 }
 0x172   : > { %891 = vmax.xlane.f32.xlu1 %v781_v28 }
 0x192   : > { %v2328_v36 = vpop.xlane.xlu0 %843 }
 0x193   : > { %v788_v60 = vpop.xlane.xlu1 %787 }
 0x196   : > { %v784_v17 = vpop.xlane.xlu0 %783 }
 0x197   : > { %v790_v13 = vpop.xlane.xlu1 %789 }
 0x19a   : > { %v2332_v35 = vpop.xlane.xlu0 %839 }
 0x19b   : > { %v2330_v20 = vpop.xlane.xlu1 %845 }
 0x19e   : > { %v786_v18 = vpop.xlane.xlu0 %785 }
 0x19f   : > { %v2334_v30 = vpop.xlane.xlu1 %841 }
 0x1a2   : > { %v796_v19 = vpop.xlane.xlu0 %795 }
 0x1a3   : > { %v798_v24 = vpop.xlane.xlu1 %797  ;;  %v899_v43 = vmax.f32 %v788_v60, %v796_v19 }
 0x1a4   : > { %v900_v52 = vmax.f32 %v790_v13, %v798_v24 }
 0x1a6   : > { %v852_v45 = vpop.xlane.xlu0 %851 }
 0x1a7   : > { %v854_v58 = vpop.xlane.xlu1 %853 }
 0x1aa   : > { %v792_v29 = vpop.xlane.xlu0 %791 }
 0x1ab   : > { %v794_v62 = vpop.xlane.xlu1 %793  ;;  %v897_v2 = vmax.f32 %v784_v17, %v792_v29 }
 0x1ac   : > { %v898_v7 = vmax.f32 %v786_v18, %v794_v62 }
 0x1ae   : > { %v2338_v38 = vpop.xlane.xlu0 %847 }
 0x1af   : > { %v2336_v28 = vpop.xlane.xlu1 %849 }
 0x1b2   : > { %v804_v3 = vpop.xlane.xlu0 %803 }
 0x1b3   : > { %v806_v51 = vpop.xlane.xlu1 %805  ;;  %v903_v57 = vmax.f32 %v899_v43, %v804_v3 }
 0x1b4   : > { %v904_v1 = vmax.f32 %v900_v52, %v806_v51 }
 0x1b6   : > { %v2342_v8 = vpop.xlane.xlu0 %859 }
 0x1b7   : > { %v2340_v59 = vpop.xlane.xlu1 %861 }
 0x1ba   : > { %v800_v46 = vpop.xlane.xlu0 %799 }
 0x1bb   : > { %v802_v44 = vpop.xlane.xlu1 %801  ;;  %v901_v37 = vmax.f32 %v897_v2, %v800_v46 }
 0x1bc   : > { %v902_v40 = vmax.f32 %v898_v7, %v802_v44 }
 0x1be   : > { %v2346_v27 = vpop.xlane.xlu0 %855 }
 0x1bf   : > { %v2344_v26 = vpop.xlane.xlu1 %857 }
 0x1c2   : > { %v812_v33 = vpop.xlane.xlu0 %811 }
 0x1c3   : > { %v814_v56 = vpop.xlane.xlu1 %813  ;;  %v907_v55 = vmax.f32 %v903_v57, %v812_v33 }
 0x1c4   : > { %v908_v4 = vmax.f32 %v904_v1, %v814_v56 }
 0x1c6   : > { %v868_v15 = vpop.xlane.xlu0 %867 }
 0x1c7   : > { %v870_v34 = vpop.xlane.xlu1 %869 }
 0x1ca   : > { %v808_v31 = vpop.xlane.xlu0 %807 }
 0x1cb   : > { %v810_v16 = vpop.xlane.xlu1 %809  ;;  %v905_v6 = vmax.f32 %v901_v37, %v808_v31 }
 0x1cc   : > { %v906_v5 = vmax.f32 %v902_v40, %v810_v16 }
 0x1ce   : > { %v864_v42 = vpop.xlane.xlu0 %863 }
 0x1cf   : > { %v866_v32 = vpop.xlane.xlu1 %865 }
 0x1d2   : > { %v820_v53 = vpop.xlane.xlu0 %819 }
 0x1d3   : > { %v822_v54 = vpop.xlane.xlu1 %821  ;;  %v911_v10 = vmax.f32 %v907_v55, %v820_v53 }
 0x1d4   : > { %v912_v9 = vmax.f32 %v908_v4, %v822_v54 }
 0x1d6   : > { %v2350_v11 = vpop.xlane.xlu0 %875 }
 0x1d7   : > { %v2348_v0 = vpop.xlane.xlu1 %877 }
 0x1da   : > { %v816_v50 = vpop.xlane.xlu0 %815 }
 0x1db   : > { %v818_v14 = vpop.xlane.xlu1 %817  ;;  %v909_v13 = vmax.f32 %v905_v6, %v816_v50 }
 0x1dc   : > { %v910_v60 = vmax.f32 %v906_v5, %v818_v14 }
 0x1de   : > { %v872_v23 = vpop.xlane.xlu0 %871 }
 0x1df   : > { %v2352_v25 = vpop.xlane.xlu1 %873 }
 0x1e2   : > { %v828_v49 = vpop.xlane.xlu0 %827 }
 0x1e3   : > { %v830_v61 = vpop.xlane.xlu1 %829  ;;  %v915_v22 = vmax.f32 %v911_v10, %v828_v49 }
 0x1e4   : > { %v916_v21 = vmax.f32 %v912_v9, %v830_v61 }
 0x1e6   : > { %v824_v39 = vpop.xlane.xlu0 %823 }
 0x1e7   : > { %v826_v12 = vpop.xlane.xlu1 %825  ;;  %v913_v52 = vmax.f32 %v909_v13, %v824_v39 }
 0x1e8   : > { %v914_v43 = vmax.f32 %v910_v60, %v826_v12 }
 0x1ea   : > { %v836_v19 = vpop.xlane.xlu0 %835 }
 0x1eb   : > { %v838_v24 = vpop.xlane.xlu1 %837  ;;  %v919_v3 = vmax.f32 %v915_v22, %v836_v19 }
 0x1ec   : > { %v920_v51 = vmax.f32 %v916_v21, %v838_v24 }
 0x1ed   : > { %v923_v57 = vmax.f32 %v919_v3, %v2328_v36  ;;  %v3071_v3 = vld [vmem:[#allocation11_spill] sm:$0xff] }
 0x1ee   : > { %v924_v56 = vmax.f32 %v920_v51, %v2330_v20  ;;  %v832_v7 = vpop.xlane.xlu0 %831  ;;  %v3070_v51 = vld [vmem:[#allocation12_spill] sm:$0xff] }
 0x1ef   : > { %v834_v1 = vpop.xlane.xlu1 %833  ;;  %v927_v53 = vmax.f32 %v923_v57, %v852_v45  ;;  %v917_v37 = vmax.f32 %v913_v52, %v832_v7  ;;  %v3072_v52 = vld [vmem:[#allocation8_spill] sm:$0xff]  ;;  %v3073_v57 = vld [vmem:[#allocation7_spill] sm:$0xff] }
 0x1f0   : > { %v928_v54 = vmax.f32 %v924_v56, %v854_v58  ;;  %v918_v16 = vmax.f32 %v914_v43, %v834_v1 }
 0x1f1   : > { %v921_v40 = vmax.f32 %v917_v37, %v2332_v35  ;;  %v931_v6 = vmax.f32 %v927_v53, %v2342_v8 }
 0x1f2   : > { %v922_v31 = vmax.f32 %v918_v16, %v2334_v30  ;;  %v932_v5 = vmax.f32 %v928_v54, %v2340_v59  ;;  %v880_v22 = vpop.xlane.xlu0 %879  ;;  %v3074_v54 = vld [vmem:[#allocation28_spill] sm:$0xff] }
 0x1f3   : > { %v882_v21 = vpop.xlane.xlu1 %881  ;;  %v925_v49 = vmax.f32 %v921_v40, %v2338_v38  ;;  %v935_v33 = vmax.f32 %v931_v6, %v868_v15 }
 0x1f4   : > { %v926_v39 = vmax.f32 %v922_v31, %v2336_v28  ;;  %v936_v10 = vmax.f32 %v932_v5, %v870_v34  ;;  %v3075_v31 = vld [vmem:[#allocation27_spill] sm:$0xff] }
 0x1f5   : > { %v929_v9 = vmax.f32 %v925_v49, %v2346_v27  ;;  %v939_v4 = vmax.f32 %v935_v33, %v2350_v11 }
 0x1f6   : > { %v930_v55 = vmax.f32 %v926_v39, %v2344_v26  ;;  %v884_v58 = vpop.xlane.xlu0 %883  ;;  %v940_v8 = vmax.f32 %v936_v10, %v2348_v0  ;;  %v3078_v10 = vld [vmem:[#allocation15_spill] sm:$0xff] }
 0x1f7   : > { %v886_v45 = vpop.xlane.xlu1 %885  ;;  %v933_v62 = vmax.f32 %v929_v9, %v864_v42  ;;  %v943_v34 = vmax.f32 %v939_v4, %v884_v58  ;;  %v3079_v58 = vld [vmem:[#allocation52_spill] sm:$0xff] }
 0x1f8   : > { %v934_v61 = vmax.f32 %v930_v55, %v866_v32  ;;  %v944_v17 = vmax.f32 %v940_v8, %v886_v45 }
 0x1f9   : > { %v937_v2 = vmax.f32 %v933_v62, %v872_v23 }
 0x1fa   : > { %v938_v59 = vmax.f32 %v934_v61, %v2352_v25  ;;  %v896_v46 = vpop.xlane.xlu0 %895 }
 0x1fb   : > { %v888_v44 = vpop.xlane.xlu1 %887  ;;  %v941_v50 = vmax.f32 %v937_v2, %v880_v22  ;;  %v948_v20 = vsel %vm893_vm1, %v896_v46, -inf  ;;  %v3077_v22 = vld [vmem:[#allocation16_spill] sm:$0xff] }
 0x1fc   : > { %v942_v14 = vmax.f32 %v938_v59, %v882_v21  ;;  %v949_v32 = vmax.f32 %v944_v17, %v948_v20  ;;  %v3081_v20 = vld [vmem:[#allocation40_spill] sm:$0xff] }
 0x1fd   : > { %v945_v12 = vmax.f32 %v941_v50, %v888_v44  ;;  %v3080_v44 = vld [vmem:[#allocation51_spill] sm:$0xff] }
 0x1fe   : > { %v890_v29 = vpop.xlane.xlu0 %889 }
 0x1ff   : > { %v892_v15 = vpop.xlane.xlu1 %891  ;;  %v946_v26 = vmax.f32 %v942_v14, %v890_v29 }
 0x200   : > { %v947_v42 = vmax.f32 %v943_v34, %v892_v15 }
 0x201   : > { %v950_v23 = vmax.f32 %v945_v12, %v946_v26 }
 0x202   : > { %v951_v25 = vmax.f32 %v947_v42, %v949_v32  ;;  %v3082_v32 = vld [vmem:[#allocation39_spill] sm:$0xff] }
 0x204   : > { %v952_v27 = vmax.f32 %v950_v23, %v951_v25  ;;  %v3083_v25 = vld [vmem:[#allocation25_spill] sm:$0xff] }
 0x206   : > { %v953_v0 = vrot.slane %v952_v27, 4 }
 0x208   : > { %v954_v36 = vmax.f32 %v952_v27, %v953_v0 }
 0x20a   : > { %v955_v11 = vrot.slane %v954_v36, 2 }
 0x20c   : > { %v956_v35 = vmax.f32 %v954_v36, %v955_v11 }
 0x20e   : > { %v957_v30 = vrot.slane %v956_v35, 1 }
 0x210   : > { %v2368_v18 = vmax.f32 %v956_v35, %v957_v30  ;;  %v3084_v30 = vld [vmem:[#allocation21_spill] sm:$0xff] }
 0x212   : > { %v2372_v28 = vsub.f32 %v1992_v63, %v2368_v18  ;;  %v2376_v38 = vsub.f32 %v1968_v47, %v2368_v18  ;;  %v2380_v24 = vsub.f32 %v1971_v48, %v2368_v18  ;;  %v2385_v60 = vsub.f32 %v1962_v41, %v2368_v18 }
 0x213   : > { %v2390_v63 = vsub.f32 %v3070_v51, %v2368_v18  ;;  %v2395_v43 = vsub.f32 %v3071_v3, %v2368_v18  ;;  %v2400_v41 = vsub.f32 %v3072_v52, %v2368_v18  ;;  %v2405_v1 = vsub.f32 %v3073_v57, %v2368_v18  ;;  %v3085_v51 = vld [vmem:[#allocation23_spill] sm:$0xff] }
 0x214   : > { %v1017_v19 = vmul.f32 1.442695, %v2372_v28  ;;  %v1015_v13 = vmul.f32 1.442695, %v2376_v38  ;;  %v1021_v47 = vmul.f32 1.442695, %v2380_v24  ;;  %v2410_v53 = vsub.f32 %v3074_v54, %v2368_v18 }
 0x215   : > { %v1019_v48 = vmul.f32 1.442695, %v2385_v60  ;;  %v1025_v56 = vmul.f32 1.442695, %v2390_v63  ;;  %v1023_v7 = vmul.f32 1.442695, %v2395_v43  ;;  %v2415_v40 = vsub.f32 %v3075_v31, %v2368_v18 }
 0x216   : > { %1743 = vpow2.f32 %v1017_v19  ;;  %v1029_v16 = vmul.f32 1.442695, %v2400_v41  ;;  %v1027_v21 = vmul.f32 1.442695, %v2405_v1  ;;  %v2422_v39 = vsub.f32 %v3077_v22, %v2368_v18 }
 0x217   : > { %1745 = vpow2.f32 %v1015_v13  ;;  %v1033_v49 = vmul.f32 1.442695, %v2410_v53  ;;  %v2427_v33 = vsub.f32 %v3078_v10, %v2368_v18  ;;  %v1031_v45 = vmul.f32 1.442695, %v2415_v40 }
 0x218   : > { %1747 = vpow2.f32 %v1021_v47  ;;  %v2432_v61 = vsub.f32 %v3079_v58, %v2368_v18  ;;  %v1037_v62 = vmul.f32 1.442695, %v2422_v39  ;;  %v2441_v46 = vsub.f32 %v3080_v44, %v2368_v18  ;;  %v3089_v58 = vld [vmem:[#allocation35_spill] sm:$0xff] }
 0x219   : > { %1749 = vpow2.f32 %v1019_v48  ;;  %v1035_v50 = vmul.f32 1.442695, %v2427_v33  ;;  %v2446_v14 = vsub.f32 %v3081_v20, %v2368_v18  ;;  %v2455_v42 = vsub.f32 %v3082_v32, %v2368_v18 }
 0x21a   : > { %1751 = vpow2.f32 %v1025_v56  ;;  %v1041_v17 = vmul.f32 1.442695, %v2432_v61  ;;  %v1039_v26 = vmul.f32 1.442695, %v2441_v46  ;;  %v2460_v23 = vsub.f32 %v3083_v25, %v2368_v18 }
 0x21b   : > { %1753 = vpow2.f32 %v1023_v7  ;;  %v1045_v27 = vmul.f32 1.442695, %v2446_v14  ;;  %v2469_v19 = vsub.f32 %v3084_v30, %v2368_v18  ;;  %v1043_v13 = vmul.f32 1.442695, %v2455_v42  ;;  %v3086_v7 = vld [vmem:[#allocation17_spill] sm:$0xff] }
 0x21c   : > { %1755 = vpow2.f32 %v1029_v16  ;;  %v2474_v47 = vsub.f32 %v3085_v51, %v2368_v18  ;;  %v1049_v3 = vmul.f32 1.442695, %v2460_v23  ;;  %v2483_v54 = vsub.f32 %v3086_v7, %v2368_v18  ;;  %v3095_v7 = vld [vmem:[#allocation6_spill] sm:$0xff] }
 0x21d   : > { %1757 = vpow2.f32 %v1027_v21  ;;  %v1047_v16 = vmul.f32 1.442695, %v2469_v19 }
 0x21e   : > { %1759 = vpow2.f32 %v1033_v49 }
 0x21f   : > { %1761 = vpow2.f32 %v1031_v45  ;;  %v1051_v45 = vmul.f32 1.442695, %v2483_v54 }
 0x220   : > { %v1744_v37 = vpop.eup %1743  ;;  %1763 = vpow2.f32 %v1037_v62  ;;  %v2502_v62 = vsub.f32 %v3089_v58, %v2368_v18  ;;  %v3097_v58 = vld [vmem:[#allocation5_spill] sm:$0xff] }
 0x221   : > { %v1128_v6 = vsel %vm726_vm0, %v1744_v37, 0.0  ;;  %v1746_v55 = vpop.eup %1745  ;;  %1765 = vpow2.f32 %v1035_v50  ;;  %v3087_v37 = vld [vmem:[#allocation37_spill] sm:$0xff] }
 0x222   : > { %1185 = vadd.xlane.f32.xlu1 %v1128_v6  ;;  %v1748_v9 = vpop.eup %1747  ;;  %v1127_v2 = vsel %vm726_vm0, %v1746_v55, 0.0  ;;  %1767 = vpow2.f32 %v1041_v17  ;;  %v2488_v31 = vsub.f32 %v3087_v37, %v2368_v18  ;;  %v1053_v6 = vmul.f32 1.442695, %v2474_v47  ;;  %v3090_v50 = vld [vmem:[#allocation29_spill] sm:$0xff] }
 0x223   : > { %v1750_v59 = vpop.eup %1749  ;;  %v1130_v8 = vsel %vm726_vm0, %v1748_v9, 0.0  ;;  %1183 = vadd.xlane.f32.xlu0 %v1127_v2  ;;  %1769 = vpow2.f32 %v1039_v26  ;;  %v3088_v9 = vld [vmem:[#allocation33_spill] sm:$0xff]  ;;  %v2511_v20 = vsub.f32 %v3090_v50, %v2368_v18 }
 0x224   : > { %v1752_v4 = vpop.eup %1751  ;;  %v1129_v15 = vsel %vm726_vm0, %v1750_v59, 0.0  ;;  %1771 = vpow2.f32 %v1045_v27  ;;  %v2497_v10 = vsub.f32 %v3088_v9, %v2368_v18  ;;  %v1057_v59 = vmul.f32 1.442695, %v2488_v31  ;;  %v3092_v27 = vld [vmem:[#allocation45_spill] sm:$0xff] }
 0x225   : > { %v1754_v34 = vpop.eup %1753  ;;  %v1132_v29 = vsel %vm726_vm0, %v1752_v4, 0.0  ;;  %1773 = vpow2.f32 %v1043_v13 }
 0x226   : > { %1189 = vadd.xlane.f32.xlu1 %v1130_v8  ;;  %v1756_v12 = vpop.eup %1755  ;;  %v1131_v36 = vsel %vm726_vm0, %v1754_v34, 0.0  ;;  %1775 = vpow2.f32 %v1049_v3  ;;  %v1055_v17 = vmul.f32 1.442695, %v2497_v10  ;;  %v3091_v34 = vld [vmem:[#allocation49_spill] sm:$0xff] }
 0x227   : > { %1187 = vadd.xlane.f32.xlu0 %v1129_v15  ;;  %v1758_v0 = vpop.eup %1757  ;;  %v1134_v11 = vsel %vm726_vm0, %v1756_v12, 0.0  ;;  %1777 = vpow2.f32 %v1047_v16  ;;  %v2516_v15 = vsub.f32 %v3091_v34, %v2368_v18  ;;  %v2544_v16 = vsub.f32 %v3095_v7, %v2368_v18 }
 0x228   : > { %v1760_v35 = vpop.eup %1759  ;;  %v1133_v52 = vsel %vm726_vm0, %v1758_v0, 0.0  ;;  %1779 = vpow2.f32 %v1053_v6  ;;  %v2525_v0 = vsub.f32 %v3092_v27, %v2368_v18 }
 0x229   : > { %v1762_v48 = vpop.eup %1761  ;;  %v1136_v56 = vsel %vm726_vm0, %v1760_v35, 0.0  ;;  %1781 = vpow2.f32 %v1051_v45  ;;  %v1065_v30 = vmul.f32 1.442695, %v2516_v15 }
 0x22a   : > { %1193 = vadd.xlane.f32.xlu1 %v1132_v29  ;;  %v1764_v57 = vpop.eup %1763  ;;  %v1135_v22 = vsel %vm726_vm0, %v1762_v48, 0.0  ;;  %v1061_v29 = vmul.f32 1.442695, %v2502_v62  ;;  %1783 = vpow2.f32 %v1057_v59  ;;  %v2558_v59 = vsub.f32 %v3097_v58, %v2368_v18 }
 0x22b   : > { %1191 = vadd.xlane.f32.xlu0 %v1131_v36  ;;  %v1766_v21 = vpop.eup %1765  ;;  %v1138_v49 = vsel %vm726_vm0, %v1764_v57, 0.0  ;;  %v1059_v36 = vmul.f32 1.442695, %v2511_v20  ;;  %1785 = vpow2.f32 %v1055_v17  ;;  %v1063_v57 = vmul.f32 1.442695, %v2525_v0  ;;  %v3098_v17 = vld [vmem:[#allocation3_spill] sm:$0xff] }
 0x22c   : > { %v1768_v55 = vpop.eup %1767  ;;  %v1137_v8 = vsel %vm726_vm0, %v1766_v21, 0.0  ;;  %1787 = vpow2.f32 %v1061_v29  ;;  %v2567_v34 = vsub.f32 %v3098_v17, %v2368_v18 }
 0x22d   : > { %v1770_v2 = vpop.eup %1769  ;;  %v1140_v4 = vsel %vm726_vm0, %v1768_v55, 0.0  ;;  %1789 = vpow2.f32 %v1059_v36  ;;  %v3096_v55 = vld [vmem:[#allocation4_spill] sm:$0xff] }
 0x22e   : > { %1197 = vadd.xlane.f32.xlu1 %v1134_v11  ;;  %v1772_v44 = vpop.eup %1771  ;;  %v1139_v32 = vsel %vm726_vm0, %v1770_v2, 0.0  ;;  %v3093_v11 = vld [vmem:[#allocation47_spill] sm:$0xff]  ;;  %1791 = vpow2.f32 %v1065_v30  ;;  %v2553_v9 = vsub.f32 %v3096_v55, %v2368_v18  ;;  %v1073_v2 = vmul.f32 1.442695, %v2544_v16  ;;  %v3100_v30 = vld [vmem:[#allocation13_spill] sm:$0xff]  ;;  %v3103_v55 = vld [vmem:[#allocation32_spill] sm:$0xff] }
 0x22f   : > { %1195 = vadd.xlane.f32.xlu0 %v1133_v52  ;;  %v1774_v12 = vpop.eup %1773  ;;  %v1142_v26 = vsel %vm726_vm0, %v1772_v44, 0.0  ;;  %v2530_v35 = vsub.f32 %v3093_v11, %v2368_v18  ;;  %v3094_v52 = vld [vmem:[#allocation41_spill] sm:$0xff]  ;;  %1793 = vpow2.f32 %v1063_v57 }
 0x230   : > { %v1776_v25 = vpop.eup %1775  ;;  %v1141_v51 = vsel %vm726_vm0, %v1774_v12, 0.0  ;;  %v1071_v29 = vmul.f32 1.442695, %v2553_v9  ;;  %v3099_v12 = vld [vmem:[#allocation14_spill] sm:$0xff] }
 0x231   : > { %v1778_v13 = vpop.eup %1777  ;;  %v1144_v3 = vsel %vm726_vm0, %v1776_v25, 0.0  ;;  %v1069_v37 = vmul.f32 1.442695, %v2530_v35 }
 0x232   : > { %1201 = vadd.xlane.f32.xlu1 %v1136_v56  ;;  %v1780_v48 = vpop.eup %1779  ;;  %v2539_v56 = vsub.f32 %v3094_v52, %v2368_v18  ;;  %v1143_v21 = vsel %vm726_vm0, %v1778_v13, 0.0  ;;  %v2581_v13 = vsub.f32 %v3100_v30, %v2368_v18 }
 0x233   : > { %1199 = vadd.xlane.f32.xlu0 %v1135_v22  ;;  %v1782_v6 = vpop.eup %1781  ;;  %v1146_v22 = vsel %vm726_vm0, %v1780_v48, 0.0  ;;  %1795 = vpow2.f32 %v1069_v37 }
 0x234   : > { %v1067_v45 = vmul.f32 1.442695, %v2539_v56 }
 0x236   : > { %1205 = vadd.xlane.f32.xlu1 %v1138_v49  ;;  %v1784_v49 = vpop.eup %1783  ;;  %1797 = vpow2.f32 %v1067_v45  ;;  %v2600_v45 = vsub.f32 %v3103_v55, %v2368_v18 }
 0x237   : > { %1203 = vadd.xlane.f32.xlu0 %v1137_v8  ;;  %v1786_v8 = vpop.eup %1785  ;;  %v1148_v44 = vsel %vm726_vm0, %v1784_v49, 0.0  ;;  %1799 = vpow2.f32 %v1073_v2  ;;  %v1079_v49 = vmul.f32 1.442695, %v2581_v13 }
 0x238   : > { %v1788_v50 = vpop.eup %1787  ;;  %v1147_v27 = vsel %vm726_vm0, %v1786_v8, 0.0  ;;  %1801 = vpow2.f32 %v1071_v29 }
 0x239   : > { %v1790_v25 = vpop.eup %1789  ;;  %v1150_v36 = vsel %vm726_vm0, %v1788_v50, 0.0  ;;  %v3104_v50 = vld [vmem:[#allocation31_spill] sm:$0xff] }
 0x23a   : > { %1209 = vadd.xlane.f32.xlu1 %v1140_v4  ;;  %v1145_v4 = vsel %vm726_vm0, %v1782_v6, 0.0  ;;  %v1792_v11 = vpop.eup %1791  ;;  %v1149_v7 = vsel %vm726_vm0, %v1790_v25, 0.0  ;;  %v2609_v17 = vsub.f32 %v3104_v50, %v2368_v18  ;;  %v1089_v25 = vmul.f32 1.442695, %v2600_v45 }
 0x23b   : > { %1207 = vadd.xlane.f32.xlu0 %v1139_v32  ;;  %v2572_v32 = vsub.f32 %v3099_v12, %v2368_v18  ;;  %v1794_v57 = vpop.eup %1793  ;;  %v1152_v37 = vsel %vm726_vm0, %v1792_v11, 0.0  ;;  %v3105_v12 = vld [vmem:[#allocation20_spill] sm:$0xff] }
 0x23c   : > { %v1151_v8 = vsel %vm726_vm0, %v1794_v57, 0.0  ;;  %v3107_v57 = vld [vmem:[#allocation54_spill] sm:$0xff] }
 0x23d   : > { %v1081_v52 = vmul.f32 1.442695, %v2572_v32  ;;  %v1796_v6 = vpop.eup %1795 }
 0x23e   : > { %1213 = vadd.xlane.f32.xlu1 %v1142_v26  ;;  %v1077_v26 = vmul.f32 1.442695, %v2558_v59 }
 0x23f   : > { %1211 = vadd.xlane.f32.xlu0 %v1141_v51  ;;  %v1075_v51 = vmul.f32 1.442695, %v2567_v34 }
 0x240   : > { %1803 = vpow2.f32 %v1077_v26  ;;  %v1798_v2 = vpop.eup %1797  ;;  %v2614_v26 = vsub.f32 %v3105_v12, %v2368_v18 }
 0x241   : > { %1805 = vpow2.f32 %v1075_v51  ;;  %v3106_v51 = vld [vmem:[#allocation19_spill] sm:$0xff] }
 0x242   : > { %1217 = vadd.xlane.f32.xlu1 %v1144_v3  ;;  %v3101_v3 = vld [vmem:[#allocation10_spill] sm:$0xff]  ;;  %1807 = vpow2.f32 %v1081_v52  ;;  %v1087_v52 = vmul.f32 1.442695, %v2609_v17 }
 0x243   : > { %1215 = vadd.xlane.f32.xlu0 %v1143_v21  ;;  %v2586_v48 = vsub.f32 %v3101_v3, %v2368_v18  ;;  %v3102_v21 = vld [vmem:[#allocation9_spill] sm:$0xff]  ;;  %1809 = vpow2.f32 %v1079_v49  ;;  %v2623_v3 = vsub.f32 %v3106_v51, %v2368_v18  ;;  %v3115_v51 = vld [vmem:[#allocation26_spill] sm:$0xff] }
 0x245   : > { %v1085_v58 = vmul.f32 1.442695, %v2586_v48 }
 0x246   : > { %1221 = vadd.xlane.f32.xlu1 %v1146_v22  ;;  %v2595_v22 = vsub.f32 %v3102_v21, %v2368_v18 }
 0x247   : > { %1219 = vadd.xlane.f32.xlu0 %v1145_v4  ;;  %v1154_v4 = vsel %vm726_vm0, %v1796_v6, 0.0  ;;  %1811 = vpow2.f32 %v1085_v58  ;;  %v3109_v58 = vld [vmem:[#allocation53_spill] sm:$0xff] }
 0x248   : > { %v1083_v29 = vmul.f32 1.442695, %v2595_v22 }
 0x24a   : > { %1225 = vadd.xlane.f32.xlu1 %v1148_v44  ;;  %v1800_v44 = vpop.eup %1799  ;;  %1813 = vpow2.f32 %v1083_v29 }
 0x24b   : > { %1223 = vadd.xlane.f32.xlu0 %v1147_v27  ;;  %v1802_v27 = vpop.eup %1801  ;;  %v1156_v11 = vsel %vm726_vm0, %v1800_v44, 0.0  ;;  %1815 = vpow2.f32 %v1089_v25 }
 0x24c   : > { %v1804_v30 = vpop.eup %1803  ;;  %v1155_v21 = vsel %vm726_vm0, %v1802_v27, 0.0  ;;  %1817 = vpow2.f32 %v1087_v52  ;;  %v2656_v52 = vsub.f32 %v3115_v51, %v2368_v18  ;;  %v3121_v51 = vld [vmem:[#allocation18_spill] sm:$0xff] }
 0x24d   : > { %v1806_v6 = vpop.eup %1805  ;;  %v1158_v49 = vsel %vm726_vm0, %v1804_v30, 0.0 }
 0x24e   : > { %1229 = vadd.xlane.f32.xlu1 %v1150_v36  ;;  %v1153_v36 = vsel %vm726_vm0, %v1798_v2, 0.0  ;;  %v1808_v55 = vpop.eup %1807  ;;  %v2637_v2 = vsub.f32 %v3109_v58, %v2368_v18  ;;  %v1157_v12 = vsel %vm726_vm0, %v1806_v6, 0.0  ;;  %3116 = vst [vmem:[#allocation28_spill] sm:$0xff] %v2656_v52 }
 0x24f   : > { %1227 = vadd.xlane.f32.xlu0 %v1149_v7  ;;  %v2628_v7 = vsub.f32 %v3107_v57, %v2368_v18  ;;  %v1810_v29 = vpop.eup %1809  ;;  %v1160_v25 = vsel %vm726_vm0, %v1808_v55, 0.0  ;;  %v3117_v55 = vld [vmem:[#allocation22_spill] sm:$0xff] }
 0x250   : > { %3110 = vst [vmem:[#allocation11_spill] sm:$0xff] %v2637_v2  ;;  %v1095_v30 = vmul.f32 1.442695, %v2637_v2  ;;  %v1159_v6 = vsel %vm726_vm0, %v1810_v29, 0.0  ;;  %v2665_v58 = vsub.f32 %v3117_v55, %v2368_v18 }
 0x251   : > { %3108 = vst [vmem:[#allocation12_spill] sm:$0xff] %v2628_v7  ;;  %v1097_v50 = vmul.f32 1.442695, %v2628_v7  ;;  %v1812_v27 = vpop.eup %1811 }
 0x252   : > { %1233 = vadd.xlane.f32.xlu1 %v1152_v37  ;;  %v1093_v37 = vmul.f32 1.442695, %v2614_v26  ;;  %3118 = vst [vmem:[#allocation27_spill] sm:$0xff] %v2665_v58 }
 0x253   : > { %1231 = vadd.xlane.f32.xlu0 %v1151_v8  ;;  %v1091_v8 = vmul.f32 1.442695, %v2623_v3 }
 0x254   : > { %1819 = vpow2.f32 %v1093_v37  ;;  %v1814_v37 = vpop.eup %1813 }
 0x255   : > { %1821 = vpow2.f32 %v1091_v8 }
 0x256   : > { %1237 = vadd.xlane.f32.xlu1 %v1154_v4  ;;  %v3111_v4 = vld [vmem:[#allocation44_spill] sm:$0xff]  ;;  %1823 = vpow2.f32 %v1097_v50 }
 0x257   : > { %1235 = vadd.xlane.f32.xlu0 %v1153_v36  ;;  %v2642_v44 = vsub.f32 %v3111_v4, %v2368_v18  ;;  %v3113_v36 = vld [vmem:[#allocation43_spill] sm:$0xff]  ;;  %1825 = vpow2.f32 %v1095_v30  ;;  %v3119_v4 = vld [vmem:[#allocation24_spill] sm:$0xff]  ;;  %v2679_v30 = vsub.f32 %v3121_v51, %v2368_v18 }
 0x258   : > { %v2670_v50 = vsub.f32 %v3119_v4, %v2368_v18 }
 0x259   : > { %3112 = vst [vmem:[#allocation8_spill] sm:$0xff] %v2642_v44  ;;  %v1101_v57 = vmul.f32 1.442695, %v2642_v44  ;;  %3122 = vst [vmem:[#allocation16_spill] sm:$0xff] %v2679_v30  ;;  %v1107_v51 = vmul.f32 1.442695, %v2679_v30 }
 0x25a   : > { %1241 = vadd.xlane.f32.xlu1 %v1156_v11  ;;  %v2651_v11 = vsub.f32 %v3113_v36, %v2368_v18  ;;  %3120 = vst [vmem:[#allocation2_spill] sm:$0xff] %v2670_v50  ;;  %v1109_v55 = vmul.f32 1.442695, %v2670_v50 }
 0x25b   : > { %1239 = vadd.xlane.f32.xlu0 %v1155_v21  ;;  %v1162_v21 = vsel %vm726_vm0, %v1812_v27, 0.0  ;;  %1827 = vpow2.f32 %v1101_v57 }
 0x25c   : > { %3114 = vst [vmem:[#allocation7_spill] sm:$0xff] %v2651_v11  ;;  %v1099_v8 = vmul.f32 1.442695, %v2651_v11 }
 0x25e   : > { %1245 = vadd.xlane.f32.xlu1 %v1158_v49  ;;  %v1816_v49 = vpop.eup %1815  ;;  %1829 = vpow2.f32 %v1099_v8 }
 0x25f   : > { %1243 = vadd.xlane.f32.xlu0 %v1157_v12  ;;  %v1105_v12 = vmul.f32 1.442695, %v2656_v52  ;;  %v1818_v29 = vpop.eup %1817  ;;  %v1164_v27 = vsel %vm726_vm0, %v1816_v49, 0.0 }
 0x260   : > { %v1820_v36 = vpop.eup %1819  ;;  %v1163_v49 = vsel %vm726_vm0, %v1818_v29, 0.0 }
 0x261   : > { %1831 = vpow2.f32 %v1105_v12  ;;  %v1166_v4 = vsel %vm726_vm0, %v1820_v36, 0.0 }
 0x262   : > { %1249 = vadd.xlane.f32.xlu1 %v1160_v25  ;;  %v1161_v25 = vsel %vm726_vm0, %v1814_v37, 0.0  ;;  %v1822_v37 = vpop.eup %1821 }
 0x263   : > { %1247 = vadd.xlane.f32.xlu0 %v1159_v6  ;;  %v1103_v6 = vmul.f32 1.442695, %v2665_v58  ;;  %v1165_v36 = vsel %vm726_vm0, %v1822_v37, 0.0 }
 0x265   : > { %1833 = vpow2.f32 %v1103_v6 }
 0x266   : > { %1253 = vadd.xlane.f32.xlu1 %v1162_v21  ;;  %v3123_v21 = vld [vmem:[#allocation38_spill] sm:$0xff]  ;;  %1835 = vpow2.f32 %v1109_v55 }
 0x267   : > { %1251 = vadd.xlane.f32.xlu0 %v1161_v25  ;;  %v2684_v57 = vsub.f32 %v3123_v21, %v2368_v18  ;;  %v1824_v25 = vpop.eup %1823  ;;  %v3127_v21 = vld [vmem:[#allocation36_spill] sm:$0xff]  ;;  %1837 = vpow2.f32 %v1107_v51  ;;  %v3135_v51 = vld [vmem:[#allocation46_spill] sm:$0xff] }
 0x268   : > { %v2698_v12 = vsub.f32 %v3127_v21, %v2368_v18  ;;  %v1826_v29 = vpop.eup %1825 }
 0x269   : > { %3124 = vst [vmem:[#allocation15_spill] sm:$0xff] %v2684_v57  ;;  %v1113_v50 = vmul.f32 1.442695, %v2684_v57  ;;  %v3131_v57 = vld [vmem:[#allocation50_spill] sm:$0xff] }
 0x26a   : > { %1257 = vadd.xlane.f32.xlu1 %v1164_v27  ;;  %v3125_v27 = vld [vmem:[#allocation34_spill] sm:$0xff]  ;;  %3128 = vst [vmem:[#allocation51_spill] sm:$0xff] %v2698_v12  ;;  %v2712_v55 = vsub.f32 %v3131_v57, %v2368_v18  ;;  %v1117_v30 = vmul.f32 1.442695, %v2698_v12 }
 0x26b   : > { %1255 = vadd.xlane.f32.xlu0 %v1163_v49  ;;  %v2693_v8 = vsub.f32 %v3125_v27, %v2368_v18  ;;  %v1168_v49 = vsel %vm726_vm0, %v1824_v25, 0.0  ;;  %v3129_v27 = vld [vmem:[#allocation30_spill] sm:$0xff]  ;;  %1839 = vpow2.f32 %v1113_v50  ;;  %v3133_v25 = vld [vmem:[#allocation48_spill] sm:$0xff]  ;;  %v2726_v50 = vsub.f32 %v3135_v51, %v2368_v18 }
 0x26c   : > { %v2707_v6 = vsub.f32 %v3129_v27, %v2368_v18  ;;  %3132 = vst [vmem:[#allocation39_spill] sm:$0xff] %v2712_v55  ;;  %v2717_v52 = vsub.f32 %v3133_v25, %v2368_v18  ;;  %v1121_v12 = vmul.f32 1.442695, %v2712_v55 }
 0x26d   : > { %3126 = vst [vmem:[#allocation52_spill] sm:$0xff] %v2693_v8  ;;  %v1111_v21 = vmul.f32 1.442695, %v2693_v8  ;;  %3136 = vst [vmem:[#allocation21_spill] sm:$0xff] %v2726_v50  ;;  %v1119_v51 = vmul.f32 1.442695, %v2726_v50 }
 0x26e   : > { %1261 = vadd.xlane.f32.xlu1 %v1166_v4  ;;  %v1828_v4 = vpop.eup %1827  ;;  %3130 = vst [vmem:[#allocation40_spill] sm:$0xff] %v2707_v6  ;;  %3134 = vst [vmem:[#allocation25_spill] sm:$0xff] %v2717_v52  ;;  %v1115_v57 = vmul.f32 1.442695, %v2707_v6  ;;  %v1125_v8 = vmul.f32 1.442695, %v2717_v52 }
 0x26f   : > { %1259 = vadd.xlane.f32.xlu0 %v1165_v36  ;;  %v1830_v37 = vpop.eup %1829  ;;  %v1167_v36 = vsel %vm726_vm0, %v1826_v29, 0.0  ;;  %1841 = vpow2.f32 %v1111_v21  ;;  %v3137_v21 = vld [vmem:[#allocation42_spill] sm:$0xff] }
 0x270   : > { %v1832_v27 = vpop.eup %1831  ;;  %1843 = vpow2.f32 %v1117_v30  ;;  %v1169_v29 = vsel %vm726_vm0, %v1830_v37, 0.0 }
 0x271   : > { %v1834_v25 = vpop.eup %1833  ;;  %1845 = vpow2.f32 %v1115_v57 }
 0x272   : > { %1265 = vadd.xlane.f32.xlu1 %v1168_v49  ;;  %v1170_v49 = vsel %vm726_vm0, %v1828_v4, 0.0  ;;  %v1172_v4 = vsel %vm726_vm0, %v1832_v27, 0.0  ;;  %1847 = vpow2.f32 %v1121_v12  ;;  %v1171_v52 = vsel %vm726_vm0, %v1834_v25, 0.0 }
 0x273   : > { %1263 = vadd.xlane.f32.xlu0 %v1167_v36  ;;  %v1836_v36 = vpop.eup %1835  ;;  %1849 = vpow2.f32 %v1125_v8 }
 0x274   : > { %v1838_v30 = vpop.eup %1837  ;;  %v1174_v37 = vsel %vm726_vm0, %v1836_v36, 0.0  ;;  %1851 = vpow2.f32 %v1119_v51 }
 0x275   : > { %v1840_v27 = vpop.eup %1839 }
 0x276   : > { %1269 = vadd.xlane.f32.xlu1 %v1170_v49  ;;  %v2736_v49 = vsub.f32 %v3137_v21, %v2368_v18  ;;  %v1173_v18 = vsel %vm726_vm0, %v1838_v30, 0.0  ;;  %v1176_v12 = vsel %vm726_vm0, %v1840_v27, 0.0 }
 0x277   : > { %1267 = vadd.xlane.f32.xlu0 %v1169_v29 }
 0x278   : > { %3138 = vst [vmem:[#allocation23_spill] sm:$0xff] %v2736_v49  ;;  %v1123_v57 = vmul.f32 1.442695, %v2736_v49 }
 0x279   : > { %v1842_v29 = vpop.eup %1841 }
 0x27a   : > { %1273 = vadd.xlane.f32.xlu1 %v1172_v4  ;;  %v1844_v8 = vpop.eup %1843  ;;  %1853 = vpow2.f32 %v1123_v57  ;;  %v1175_v4 = vsel %vm726_vm0, %v1842_v29, 0.0 }
 0x27b   : > { %1271 = vadd.xlane.f32.xlu0 %v1171_v52  ;;  %v1846_v25 = vpop.eup %1845  ;;  %v1178_v52 = vsel %vm726_vm0, %v1844_v8, 0.0 }
 0x27c   : > { %v1848_v36 = vpop.eup %1847  ;;  %v1177_v51 = vsel %vm726_vm0, %v1846_v25, 0.0 }
 0x27d   : > { %v1850_v21 = vpop.eup %1849  ;;  %v1180_v30 = vsel %vm726_vm0, %v1848_v36, 0.0 }
 0x27e   : > { %1277 = vadd.xlane.f32.xlu1 %v1174_v37  ;;  %v1852_v37 = vpop.eup %1851  ;;  %v1182_v27 = vsel %vm726_vm0, %v1850_v21, 0.0 }
 0x27f   : > { %1275 = vadd.xlane.f32.xlu0 %v1173_v18  ;;  %v1179_v57 = vsel %vm726_vm0, %v1852_v37, 0.0  ;;  %v1293_v29 = vsel %vm893_vm1, %v1182_v27, 0.0 }
 0x282   : > { %1281 = vadd.xlane.f32.xlu1 %v1176_v12 }
 0x283   : > { %1279 = vadd.xlane.f32.xlu0 %v1175_v4 }
 0x284   : > { %v1854_v18 = vpop.eup %1853 }
 0x285   : > { %v1181_v12 = vsel %vm726_vm0, %v1854_v18, 0.0 }
 0x286   : > { %1285 = vadd.xlane.f32.xlu1 %v1178_v52 }
 0x287   : > { %1283 = vadd.xlane.f32.xlu0 %v1177_v51 }
 0x28a   : > { %1289 = vadd.xlane.f32.xlu1 %v1180_v30 }
 0x28b   : > { %1287 = vadd.xlane.f32.xlu0 %v1179_v57 }
 0x28e   : > { %1294 = vadd.xlane.f32.xlu1 %v1293_v29 }
 0x28f   : > { %1291 = vadd.xlane.f32.xlu0 %v1181_v12 }
 0x2af   : > { %v1186_v8 = vpop.xlane.xlu1 %1185 }
 0x2b0   : > { %v1184_v25 = vpop.xlane.xlu0 %1183 }
 0x2b1   : > { %v1296_v52 = vadd.f32 %v1186_v8, %v1184_v25 }
 0x2b3   : > { %v1190_v4 = vpop.xlane.xlu1 %1189 }
 0x2b4   : > { %v1188_v36 = vpop.xlane.xlu0 %1187 }
 0x2b5   : > { %v1297_v30 = vadd.f32 %v1296_v52, %v1188_v36 }
 0x2b7   : > { %v1194_v51 = vpop.xlane.xlu1 %1193  ;;  %v1298_v21 = vadd.f32 %v1297_v30, %v1190_v4 }
 0x2b8   : > { %v1192_v49 = vpop.xlane.xlu0 %1191 }
 0x2b9   : > { %v1299_v37 = vadd.f32 %v1298_v21, %v1192_v49 }
 0x2bb   : > { %v1198_v55 = vpop.xlane.xlu1 %1197  ;;  %v1300_v50 = vadd.f32 %v1299_v37, %v1194_v51 }
 0x2bc   : > { %v1196_v27 = vpop.xlane.xlu0 %1195 }
 0x2bd   : > { %v1301_v57 = vadd.f32 %v1300_v50, %v1196_v27 }
 0x2bf   : > { %v1202_v6 = vpop.xlane.xlu1 %1201  ;;  %v1302_v29 = vadd.f32 %v1301_v57, %v1198_v55 }
 0x2c0   : > { %v1200_v58 = vpop.xlane.xlu0 %1199 }
 0x2c1   : > { %v1303_v18 = vadd.f32 %v1302_v29, %v1200_v58 }
 0x2c3   : > { %v1206_v5 = vpop.xlane.xlu1 %1205  ;;  %v1304_v12 = vadd.f32 %v1303_v18, %v1202_v6 }
 0x2c4   : > { %v1204_v44 = vpop.xlane.xlu0 %1203 }
 0x2c5   : > { %v1305_v7 = vadd.f32 %v1304_v12, %v1204_v44 }
 0x2c7   : > { %v1210_v11 = vpop.xlane.xlu1 %1209  ;;  %v1306_v8 = vadd.f32 %v1305_v7, %v1206_v5 }
 0x2c8   : > { %v1208_v25 = vpop.xlane.xlu0 %1207 }
 0x2c9   : > { %v1307_v52 = vadd.f32 %v1306_v8, %v1208_v25 }
 0x2cb   : > { %v1214_v2 = vpop.xlane.xlu1 %1213  ;;  %v1308_v4 = vadd.f32 %v1307_v52, %v1210_v11 }
 0x2cc   : > { %v1212_v36 = vpop.xlane.xlu0 %1211 }
 0x2cd   : > { %v1309_v49 = vadd.f32 %v1308_v4, %v1212_v36 }
 0x2cf   : > { %v1218_v30 = vpop.xlane.xlu1 %1217  ;;  %v1310_v51 = vadd.f32 %v1309_v49, %v1214_v2 }
 0x2d0   : > { %v1216_v21 = vpop.xlane.xlu0 %1215 }
 0x2d1   : > { %v1311_v50 = vadd.f32 %v1310_v51, %v1216_v21 }
 0x2d3   : > { %v1222_v37 = vpop.xlane.xlu1 %1221  ;;  %v1312_v55 = vadd.f32 %v1311_v50, %v1218_v30 }
 0x2d4   : > { %v1220_v27 = vpop.xlane.xlu0 %1219 }
 0x2d5   : > { %v1313_v58 = vadd.f32 %v1312_v55, %v1220_v27 }
 0x2d7   : > { %v1226_v57 = vpop.xlane.xlu1 %1225  ;;  %v1314_v6 = vadd.f32 %v1313_v58, %v1222_v37 }
 0x2d8   : > { %v1224_v29 = vpop.xlane.xlu0 %1223 }
 0x2d9   : > { %v1315_v44 = vadd.f32 %v1314_v6, %v1224_v29 }
 0x2db   : > { %v1230_v18 = vpop.xlane.xlu1 %1229  ;;  %v1316_v7 = vadd.f32 %v1315_v44, %v1226_v57 }
 0x2dc   : > { %v1228_v5 = vpop.xlane.xlu0 %1227 }
 0x2dd   : > { %v1317_v8 = vadd.f32 %v1316_v7, %v1228_v5 }
 0x2df   : > { %v1234_v12 = vpop.xlane.xlu1 %1233  ;;  %v1318_v11 = vadd.f32 %v1317_v8, %v1230_v18 }
 0x2e0   : > { %v1232_v25 = vpop.xlane.xlu0 %1231 }
 0x2e1   : > { %v1319_v4 = vadd.f32 %v1318_v11, %v1232_v25 }
 0x2e3   : > { %v1238_v52 = vpop.xlane.xlu1 %1237  ;;  %v1320_v2 = vadd.f32 %v1319_v4, %v1234_v12 }
 0x2e4   : > { %v1236_v36 = vpop.xlane.xlu0 %1235 }
 0x2e5   : > { %v1321_v51 = vadd.f32 %v1320_v2, %v1236_v36 }
 0x2e7   : > { %v1242_v49 = vpop.xlane.xlu1 %1241  ;;  %v1322_v30 = vadd.f32 %v1321_v51, %v1238_v52 }
 0x2e8   : > { %v1240_v21 = vpop.xlane.xlu0 %1239 }
 0x2e9   : > { %v1323_v55 = vadd.f32 %v1322_v30, %v1240_v21 }
 0x2eb   : > { %v1246_v50 = vpop.xlane.xlu1 %1245  ;;  %v1324_v37 = vadd.f32 %v1323_v55, %v1242_v49 }
 0x2ec   : > { %v1244_v27 = vpop.xlane.xlu0 %1243 }
 0x2ed   : > { %v1325_v6 = vadd.f32 %v1324_v37, %v1244_v27 }
 0x2ef   : > { %v1250_v58 = vpop.xlane.xlu1 %1249  ;;  %v1326_v57 = vadd.f32 %v1325_v6, %v1246_v50 }
 0x2f0   : > { %v1248_v29 = vpop.xlane.xlu0 %1247 }
 0x2f1   : > { %v1327_v7 = vadd.f32 %v1326_v57, %v1248_v29 }
 0x2f3   : > { %v1254_v44 = vpop.xlane.xlu1 %1253  ;;  %v1328_v18 = vadd.f32 %v1327_v7, %v1250_v58 }
 0x2f4   : > { %v1252_v5 = vpop.xlane.xlu0 %1251 }
 0x2f5   : > { %v1329_v11 = vadd.f32 %v1328_v18, %v1252_v5 }
 0x2f7   : > { %v1258_v8 = vpop.xlane.xlu1 %1257  ;;  %v1330_v12 = vadd.f32 %v1329_v11, %v1254_v44 }
 0x2f8   : > { %v1256_v25 = vpop.xlane.xlu0 %1255 }
 0x2f9   : > { %v1331_v2 = vadd.f32 %v1330_v12, %v1256_v25 }
 0x2fb   : > { %v1262_v4 = vpop.xlane.xlu1 %1261  ;;  %v1332_v52 = vadd.f32 %v1331_v2, %v1258_v8 }
 0x2fc   : > { %v1260_v36 = vpop.xlane.xlu0 %1259 }
 0x2fd   : > { %v1333_v30 = vadd.f32 %v1332_v52, %v1260_v36 }
 0x2ff   : > { %v1266_v51 = vpop.xlane.xlu1 %1265  ;;  %v1334_v49 = vadd.f32 %v1333_v30, %v1262_v4 }
 0x300   : > { %v1264_v21 = vpop.xlane.xlu0 %1263 }
 0x301   : > { %v1335_v37 = vadd.f32 %v1334_v49, %v1264_v21 }
 0x303   : > { %v1270_v55 = vpop.xlane.xlu1 %1269  ;;  %v1336_v50 = vadd.f32 %v1335_v37, %v1266_v51 }
 0x304   : > { %v1268_v27 = vpop.xlane.xlu0 %1267 }
 0x305   : > { %v1337_v57 = vadd.f32 %v1336_v50, %v1268_v27 }
 0x307   : > { %v1274_v6 = vpop.xlane.xlu1 %1273  ;;  %v1338_v58 = vadd.f32 %v1337_v57, %v1270_v55 }
 0x308   : > { %v1272_v29 = vpop.xlane.xlu0 %1271 }
 0x309   : > { %v1339_v18 = vadd.f32 %v1338_v58, %v1272_v29 }
 0x30b   : > { %v1278_v7 = vpop.xlane.xlu1 %1277  ;;  %v1340_v44 = vadd.f32 %v1339_v18, %v1274_v6 }
 0x30c   : > { %v1276_v5 = vpop.xlane.xlu0 %1275 }
 0x30d   : > { %v1341_v12 = vadd.f32 %v1340_v44, %v1276_v5 }
 0x30f   : > { %v1282_v11 = vpop.xlane.xlu1 %1281  ;;  %v1342_v8 = vadd.f32 %v1341_v12, %v1278_v7 }
 0x310   : > { %v1280_v25 = vpop.xlane.xlu0 %1279 }
 0x311   : > { %v1343_v52 = vadd.f32 %v1342_v8, %v1280_v25 }
 0x313   : > { %v1286_v2 = vpop.xlane.xlu1 %1285  ;;  %v1344_v4 = vadd.f32 %v1343_v52, %v1282_v11 }
 0x314   : > { %v1284_v36 = vpop.xlane.xlu0 %1283 }
 0x315   : > { %v1345_v49 = vadd.f32 %v1344_v4, %v1284_v36 }
 0x317   : > { %v1290_v30 = vpop.xlane.xlu1 %1289  ;;  %v1346_v51 = vadd.f32 %v1345_v49, %v1286_v2  ;;  %v3141_v49 = vld [vmem:[#allocation7_spill] sm:$0xff] }
 0x318   : > { %v1288_v21 = vpop.xlane.xlu0 %1287 }
 0x319   : > { %v1347_v37 = vadd.f32 %v1346_v51, %v1288_v21  ;;  %v3142_v51 = vld [vmem:[#allocation8_spill] sm:$0xff]  ;;  %v3143_v21 = vld [vmem:[#allocation27_spill] sm:$0xff] }
 0x31b   : > { %v1295_v55 = vpop.xlane.xlu1 %1294  ;;  %v1348_v50 = vadd.f32 %v1347_v37, %v1290_v30 }
 0x31c   : > { %v1350_v27 = vsel %vm893_vm1, %v1295_v55, 0.0  ;;  %v1292_v6 = vpop.xlane.xlu0 %1291  ;;  %v3144_v55 = vld [vmem:[#allocation28_spill] sm:$0xff] }
 0x31d   : > { %v1349_v57 = vadd.f32 %v1348_v50, %v1292_v6 }
 0x31f   : > { %v1351_v58 = vadd.f32 %v1350_v27, %v1349_v57  ;;  %v3145_v27 = vld [vmem:[#allocation16_spill] sm:$0xff]  ;;  %v3146_v57 = vld [vmem:[#allocation2_spill] sm:$0xff] }
 0x321   : > { %v1352_v29 = vrot.slane %v1351_v58, 4 }
 0x323   : > { %v1353_v7 = vadd.f32 %v1352_v29, %v1351_v58  ;;  %v3147_v29 = vld [vmem:[#allocation52_spill] sm:$0xff] }
 0x325   : > { %v1354_v18 = vrot.slane %v1353_v7, 2 }
 0x327   : > { %v1355_v44 = vadd.f32 %v1354_v18, %v1353_v7  ;;  %v3148_v18 = vld [vmem:[#allocation15_spill] sm:$0xff] }
 0x329   : > { %v1356_v5 = vrot.slane %v1355_v44, 1 }
 0x32b   : > { %v1357_v11 = vadd.f32 %v1356_v5, %v1355_v44  ;;  %v3149_v5 = vld [vmem:[#allocation40_spill] sm:$0xff] }
 0x32d   : > { %1855 = vlog2.f32 %v1357_v11 }
 0x337   : > { %v1856_v12 = vpop.eup %1855 }
 0x338   : > { %v2765_v8 = vmul.f32 0.6931472, %v1856_v12  ;;  %v3150_v12 = vld [vmem:[#allocation51_spill] sm:$0xff] }
 0x33a   : > { %v1360_v25 = vsub.f32 %v2376_v38, %v2765_v8  ;;  %v1361_v2 = vsub.f32 %v2372_v28, %v2765_v8  ;;  %v1362_v52 = vsub.f32 %v2385_v60, %v2765_v8  ;;  %v1363_v4 = vsub.f32 %v2380_v24, %v2765_v8 }
 0x33b   : > { %v1364_v36 = vsub.f32 %v2395_v43, %v2765_v8  ;;  %v1365_v30 = vsub.f32 %v2390_v63, %v2765_v8  ;;  %v1366_v38 = vsub.f32 %v2405_v1, %v2765_v8  ;;  %v1367_v28 = vsub.f32 %v2400_v41, %v2765_v8 }
 0x33c   : > { %v1368_v60 = vsub.f32 %v2415_v40, %v2765_v8  ;;  %v1369_v24 = vsub.f32 %v2410_v53, %v2765_v8  ;;  %v1370_v43 = vsub.f32 %v2427_v33, %v2765_v8  ;;  %v1371_v63 = vsub.f32 %v2422_v39, %v2765_v8  ;;  %1416 = vst [vmem:[%s2770_s14] sm:$0xff] %v1360_v25 }
 0x33d   : > { %1417 = vst [vmem:[%s2770_s14 + $0x8] sm:$0xff] %v1361_v2  ;;  %1418 = vst [vmem:[%s2770_s14 + $0x10] sm:$0xff] %v1362_v52  ;;  %v1372_v41 = vsub.f32 %v2441_v46, %v2765_v8  ;;  %v1373_v1 = vsub.f32 %v2432_v61, %v2765_v8  ;;  %v1374_v53 = vsub.f32 %v2455_v42, %v2765_v8  ;;  %v3151_v2 = vld [vmem:[#allocation21_spill] sm:$0xff] }
 0x33e   : > { %1419 = vst [vmem:[%s2770_s14 + $0x18] sm:$0xff] %v1363_v4  ;;  %v1375_v40 = vsub.f32 %v2446_v14, %v2765_v8  ;;  %1420 = vst [vmem:[%s2770_s14 + $0x20] sm:$0xff] %v1364_v36  ;;  %v1376_v39 = vsub.f32 %v2469_v19, %v2765_v8  ;;  %v1377_v33 = vsub.f32 %v2460_v23, %v2765_v8  ;;  %v3152_v4 = vld [vmem:[#allocation39_spill] sm:$0xff] }
 0x33f   : > { %1421 = vst [vmem:[%s2770_s14 + $0x28] sm:$0xff] %v1365_v30  ;;  %1422 = vst [vmem:[%s2770_s14 + $0x30] sm:$0xff] %v1366_v38  ;;  %v1378_v61 = vsub.f32 %v2483_v54, %v2765_v8  ;;  %v1379_v46 = vsub.f32 %v2474_v47, %v2765_v8  ;;  %v1380_v14 = vsub.f32 %v2497_v10, %v2765_v8  ;;  %v3153_v30 = vld [vmem:[#allocation23_spill] sm:$0xff] }
 0x340   : > { %1423 = vst [vmem:[%s2770_s14 + $0x38] sm:$0xff] %v1367_v28  ;;  %1424 = vst [vmem:[%s2770_s14 + $0x40] sm:$0xff] %v1368_v60  ;;  %v1381_v42 = vsub.f32 %v2488_v31, %v2765_v8  ;;  %v1382_v23 = vsub.f32 %v2511_v20, %v2765_v8  ;;  %v1383_v19 = vsub.f32 %v2502_v62, %v2765_v8  ;;  %v3154_v28 = vld [vmem:[#allocation25_spill] sm:$0xff] }
 0x341   : > { %1425 = vst [vmem:[%s2770_s14 + $0x48] sm:$0xff] %v1369_v24  ;;  %1426 = vst [vmem:[%s2770_s14 + $0x50] sm:$0xff] %v1370_v43  ;;  %v1384_v47 = vsub.f32 %v2525_v0, %v2765_v8  ;;  %v1385_v54 = vsub.f32 %v2516_v15, %v2765_v8  ;;  %v1386_v31 = vsub.f32 %v2539_v56, %v2765_v8 }
 0x342   : > { %1427 = vst [vmem:[%s2770_s14 + $0x58] sm:$0xff] %v1371_v63  ;;  %1428 = vst [vmem:[%s2770_s14 + $0x60] sm:$0xff] %v1372_v41  ;;  %v1387_v10 = vsub.f32 %v2530_v35, %v2765_v8  ;;  %v1388_v62 = vsub.f32 %v2553_v9, %v2765_v8  ;;  %v1389_v20 = vsub.f32 %v2544_v16, %v2765_v8 }
 0x343   : > { %1429 = vst [vmem:[%s2770_s14 + $0x68] sm:$0xff] %v1373_v1  ;;  %1430 = vst [vmem:[%s2770_s14 + $0x70] sm:$0xff] %v1374_v53  ;;  %v1390_v15 = vsub.f32 %v2567_v34, %v2765_v8  ;;  %v1391_v0 = vsub.f32 %v2558_v59, %v2765_v8  ;;  %v1392_v35 = vsub.f32 %v2581_v13, %v2765_v8 }
 0x344   : > { %1431 = vst [vmem:[%s2770_s14 + $0x78] sm:$0xff] %v1375_v40  ;;  %1432 = vst [vmem:[%s2770_s14 + $0x80] sm:$0xff] %v1376_v39  ;;  %v1393_v56 = vsub.f32 %v2572_v32, %v2765_v8  ;;  %v1394_v16 = vsub.f32 %v2595_v22, %v2765_v8  ;;  %v1395_v9 = vsub.f32 %v2586_v48, %v2765_v8  ;;  %v3139_v48 = vld [vmem:[#allocation11_spill] sm:$0xff] }
 0x345   : > { %1433 = vst [vmem:[%s2770_s14 + $0x88] sm:$0xff] %v1377_v33  ;;  %1434 = vst [vmem:[%s2770_s14 + $0x90] sm:$0xff] %v1378_v61  ;;  %v1396_v59 = vsub.f32 %v2609_v17, %v2765_v8  ;;  %v1397_v34 = vsub.f32 %v2600_v45, %v2765_v8  ;;  %v1398_v32 = vsub.f32 %v2623_v3, %v2765_v8  ;;  %v3140_v17 = vld [vmem:[#allocation12_spill] sm:$0xff] }
 0x346   : > { %1435 = vst [vmem:[%s2770_s14 + $0x98] sm:$0xff] %v1379_v46  ;;  %1436 = vst [vmem:[%s2770_s14 + $0xa0] sm:$0xff] %v1380_v14  ;;  %v1399_v13 = vsub.f32 %v2614_v26, %v2765_v8  ;;  %v1400_v22 = vsub.f32 %v3139_v48, %v2765_v8  ;;  %v1401_v45 = vsub.f32 %v3140_v17, %v2765_v8 }
 0x347   : > { %1437 = vst [vmem:[%s2770_s14 + $0xa8] sm:$0xff] %v1381_v42  ;;  %1438 = vst [vmem:[%s2770_s14 + $0xb0] sm:$0xff] %v1382_v23  ;;  %v1402_v3 = vsub.f32 %v3141_v49, %v2765_v8  ;;  %v1403_v26 = vsub.f32 %v3142_v51, %v2765_v8  ;;  %v1404_v37 = vsub.f32 %v3143_v21, %v2765_v8 }
 0x348   : > { %1439 = vst [vmem:[%s2770_s14 + $0xb8] sm:$0xff] %v1383_v19  ;;  %1440 = vst [vmem:[%s2770_s14 + $0xc0] sm:$0xff] %v1384_v47  ;;  %v1405_v50 = vsub.f32 %v3144_v55, %v2765_v8  ;;  %v1406_v6 = vsub.f32 %v3145_v27, %v2765_v8  ;;  %v1407_v58 = vsub.f32 %v3146_v57, %v2765_v8 }
 0x349   : > { %1441 = vst [vmem:[%s2770_s14 + $0xc8] sm:$0xff] %v1385_v54  ;;  %1442 = vst [vmem:[%s2770_s14 + $0xd0] sm:$0xff] %v1386_v31  ;;  %v1408_v7 = vsub.f32 %v3147_v29, %v2765_v8  ;;  %v1409_v44 = vsub.f32 %v3148_v18, %v2765_v8  ;;  %v1410_v11 = vsub.f32 %v3149_v5, %v2765_v8 }
 0x34a   : > { %1443 = vst [vmem:[%s2770_s14 + $0xd8] sm:$0xff] %v1387_v10  ;;  %1444 = vst [vmem:[%s2770_s14 + $0xe0] sm:$0xff] %v1388_v62  ;;  %v1411_v25 = vsub.f32 %v3150_v12, %v2765_v8  ;;  %v1412_v52 = vsub.f32 %v3151_v2, %v2765_v8  ;;  %v1413_v36 = vsub.f32 %v3152_v4, %v2765_v8 }
 0x34b   : > { %1445 = vst [vmem:[%s2770_s14 + $0xe8] sm:$0xff] %v1389_v20  ;;  %1446 = vst [vmem:[%s2770_s14 + $0xf0] sm:$0xff] %v1390_v15  ;;  %v1414_v38 = vsub.f32 %v3153_v30, %v2765_v8  ;;  %v1415_v60 = vsub.f32 %v3154_v28, %v2765_v8 }
 0x34c   : > { %1447 = vst [vmem:[%s2770_s14 + $0xf8] sm:$0xff] %v1391_v0  ;;  %1448 = vst [vmem:[%s2770_s14 + $0x100] sm:$0xff] %v1392_v35 }
 0x34d   : > { %1449 = vst [vmem:[%s2770_s14 + $0x108] sm:$0xff] %v1393_v56  ;;  %1450 = vst [vmem:[%s2770_s14 + $0x110] sm:$0xff] %v1394_v16 }
 0x34e   : > { %1451 = vst [vmem:[%s2770_s14 + $0x118] sm:$0xff] %v1395_v9  ;;  %1452 = vst [vmem:[%s2770_s14 + $0x120] sm:$0xff] %v1396_v59 }
 0x34f   : > { %1453 = vst [vmem:[%s2770_s14 + $0x128] sm:$0xff] %v1397_v34  ;;  %1454 = vst [vmem:[%s2770_s14 + $0x130] sm:$0xff] %v1398_v32 }
 0x350   : > { %1455 = vst [vmem:[%s2770_s14 + $0x138] sm:$0xff] %v1399_v13  ;;  %1456 = vst [vmem:[%s2770_s14 + $0x140] sm:$0xff] %v1400_v22 }
 0x351   : > { %1457 = vst [vmem:[%s2770_s14 + $0x148] sm:$0xff] %v1401_v45  ;;  %1458 = vst [vmem:[%s2770_s14 + $0x150] sm:$0xff] %v1402_v3 }
 0x352   : > { %1459 = vst [vmem:[%s2770_s14 + $0x158] sm:$0xff] %v1403_v26  ;;  %1460 = vst [vmem:[%s2770_s14 + $0x160] sm:$0xff] %v1404_v37 }
 0x353   : > { %1461 = vst [vmem:[%s2770_s14 + $0x168] sm:$0xff] %v1405_v50  ;;  %1462 = vst [vmem:[%s2770_s14 + $0x170] sm:$0xff] %v1406_v6 }
 0x354   : > { %1463 = vst [vmem:[%s2770_s14 + $0x178] sm:$0xff] %v1407_v58  ;;  %1464 = vst [vmem:[%s2770_s14 + $0x180] sm:$0xff] %v1408_v7 }
 0x355   : > { %1465 = vst [vmem:[%s2770_s14 + $0x188] sm:$0xff] %v1409_v44  ;;  %1466 = vst [vmem:[%s2770_s14 + $0x190] sm:$0xff] %v1410_v11 }
 0x356   : > { %1467 = vst [vmem:[%s2770_s14 + $0x198] sm:$0xff] %v1411_v25  ;;  %1468 = vst [vmem:[%s2770_s14 + $0x1a0] sm:$0xff] %v1412_v52 }
 0x357   : > { %1469 = vst [vmem:[%s2770_s14 + $0x1a8] sm:$0xff] %v1413_v36  ;;  %1470 = vst [vmem:[%s2770_s14 + $0x1b0] sm:$0xff] %v1414_v38 }
 0x358   : > { %1471 = vst [vmem:[%s2770_s14 + $0x1b8] sm:$0x1] %v1415_v60 }
 0x359 PF: > { %s13_s12 = sadd.s32 1, %s1863_s12  }
 0x35a   : > { %p10_p4 = scmp.ge.s32.totalorder %s13_s12, 4  }
 0x35c   :  { %12 = sbr.rel (!%p10_p4) target bundleno = 1 (0x1), region = 62 }

</bundles_post_ra>
